<compile_context>
chip_gen: v5e
topology: v5e:2x2
jax: 0.10.0
libtpu: 0.0.40
codegen_flags: <defaults>
</compile_context>

<pallas_src>
import functools

import jax
import jax.numpy as jnp
from jax.experimental import pallas as pl
from jax.experimental.pallas import tpu as pltpu


def _conv_bn_kernel(w_ref, x_ref, gamma_ref, beta_ref, o_ref, *, eps, inv_m):
    # 1x1 conv == matmul on the MXU: (Cout_blk, Cin) @ (Cin, Mp) -> f32 (Cout_blk, Mp).
    y = jnp.dot(w_ref[...], x_ref[...], preferred_element_type=jnp.float32)

    # BatchNorm2d training-mode batch statistics per output channel over the
    # *real* M columns.  The padded columns of x are zero, so they contribute
    # zero to both sums; inv_m = 1/M_real.  Biased variance (matches PyTorch BN
    # normalization), sum-of-squares form so padding never corrupts the stats.
    s1 = jnp.sum(y, axis=1, keepdims=True)                 # (Cout_blk, 1)
    s2 = jnp.sum(y * y, axis=1, keepdims=True)             # (Cout_blk, 1)
    mean = s1 * inv_m
    var = s2 * inv_m - mean * mean

    # Fold affine + normalization into one per-channel FMA on the output tile.
    scale = gamma_ref[...] * jax.lax.rsqrt(var + eps)      # (Cout_blk, 1)
    shift = beta_ref[...] - mean * scale                   # (Cout_blk, 1)
    o_ref[...] = (y * scale + shift).astype(o_ref.dtype)


def _tensorcores_per_chip():
    """Best-effort TC-per-chip count: 2 on v7x, 1 on v5e/v6e."""
    try:
        info = pltpu.get_tpu_info()
        ver = str(getattr(info, "chip_version", "")).lower()
        if ver:
            return 2 if "7" in ver else 1
    except Exception:
        pass
    try:
        if "v7" in jax.devices()[0].device_kind.lower():
            return 2
    except Exception:
        pass
    return 1


def conv2d_1x1_batchnorm(x_nchw, conv_w, gamma, beta, eps=1e-5):
    """x_nchw: (N, Cin, H, W); conv_w: (Cout, Cin, 1, 1); gamma/beta: (Cout,)."""
    N, Cin, H, W = x_nchw.shape
    Cout = conv_w.shape[0]
    M = N * H * W
    LANE = 128
    Mp = ((M + LANE - 1) // LANE) * LANE                   # lane-dense last dim

    # Layout glue -- free reshape only for the module's N == 1 case.
    if N == 1:
        x2 = x_nchw.reshape(Cin, M)
    else:
        x2 = jnp.transpose(x_nchw, (1, 0, 2, 3)).reshape(Cin, M)

    # bf16 operands (halve the dominant HBM reads); zero-pad M to a lane multiple.
    x2 = x2.astype(jnp.bfloat16)
    if Mp != M:
        x2 = jnp.pad(x2, ((0, 0), (0, Mp - M)))
    w2 = conv_w.reshape(Cout, Cin).astype(jnp.bfloat16)    # weight stays lane-dense
    g2 = gamma.reshape(Cout, 1).astype(jnp.float32)
    b2 = beta.reshape(Cout, 1).astype(jnp.float32)

    # One grid step (everything fits VMEM; extra steps are pure overhead),
    # except on v7x where Cout is split exactly across the 2 TensorCores.
    n_split = _tensorcores_per_chip()
    if n_split < 1 or Cout % (8 * n_split) != 0:
        n_split = 1
    cb = Cout // n_split

    if n_split == 1:
        dim_sem = ("arbitrary",)
    else:
        dim_sem = (getattr(pltpu, "CORE_PARALLEL", "parallel"),)

    kernel = functools.partial(_conv_bn_kernel, eps=float(eps), inv_m=1.0 / float(M))

    out2 = pl.pallas_call(
        kernel,
        out_shape=jax.ShapeDtypeStruct((Cout, Mp), x_nchw.dtype),
        grid=(n_split,),
        in_specs=[
            pl.BlockSpec((cb, Cin), lambda i: (i, 0)),     # weight slice per core
            pl.BlockSpec((Cin, Mp), lambda i: (0, 0)),     # full (padded) activations
            pl.BlockSpec((cb, 1), lambda i: (i, 0)),       # gamma slice
            pl.BlockSpec((cb, 1), lambda i: (i, 0)),       # beta slice
        ],
        out_specs=pl.BlockSpec((cb, Mp), lambda i: (i, 0)),
        compiler_params=pltpu.CompilerParams(dimension_semantics=dim_sem),
    )(w2, x2, g2, b2)

    # Drop the padded columns; free reshape back to NCHW when N == 1.
    out2 = out2[:, :M]
    if N == 1:
        return out2.reshape(1, Cout, H, W)
    return jnp.transpose(out2.reshape(Cout, N, H, W), (1, 0, 2, 3))


def _reference(x_nchw, conv_w, gamma, beta, eps=1e-5, cast=None):
    # Plain-JAX reference: 1x1 conv + training-mode BatchNorm2d forward.
    # cast=jnp.bfloat16 reproduces the kernel's operand rounding (f32 math otherwise).
    N, Cin, H, W = x_nchw.shape
    Cout = conv_w.shape[0]
    w2 = conv_w.reshape(Cout, Cin)
    x = x_nchw
    if cast is not None:
        w2 = w2.astype(cast).astype(jnp.float32)
        x = x.astype(cast).astype(jnp.float32)
    y = jnp.einsum("oc,nchw->nohw", w2, x, precision=jax.lax.Precision.HIGHEST)
    m = jnp.mean(y, axis=(0, 2, 3), keepdims=True)
    v = jnp.var(y, axis=(0, 2, 3), keepdims=True)          # biased, like BN
    return ((y - m) * jax.lax.rsqrt(v + eps)
            * gamma.reshape(1, Cout, 1, 1) + beta.reshape(1, Cout, 1, 1))


if __name__ == "__main__":
    # Module-implied shapes: Conv2d(1632, 272, 1x1, bias=False), input (1, 1632, 7, 7).
    N, Cin, H, W = 1, 1632, 7, 7
    Cout = 272

    key = jax.random.PRNGKey(0)
    kx, kw = jax.random.split(key)

    x = jax.random.normal(kx, (N, Cin, H, W), dtype=jnp.float32)
    conv_w = jax.random.normal(kw, (Cout, Cin, 1, 1), dtype=jnp.float32) * (1.0 / (Cin ** 0.5))
    gamma = jnp.ones((Cout,), dtype=jnp.float32)   # BatchNorm2d default affine init
    beta = jnp.zeros((Cout,), dtype=jnp.float32)

    out = conv2d_1x1_batchnorm(x, conv_w, gamma, beta, eps=1e-5)
    jax.block_until_ready(out)

    assert out.shape == (N, Cout, H, W), out.shape

    # Tight check against a reference with the same bf16 operand rounding.
    ref_bf16 = _reference(x, conv_w, gamma, beta, eps=1e-5, cast=jnp.bfloat16)
    err_bf16 = float(jnp.max(jnp.abs(out - ref_bf16)))
    assert jnp.allclose(out, ref_bf16, atol=2e-3, rtol=2e-3), err_bf16

    # Loose check against the full-precision module semantics (bf16 input rounding).
    ref_f32 = _reference(x, conv_w, gamma, beta, eps=1e-5)
    err_f32 = float(jnp.max(jnp.abs(out - ref_f32)))
    assert jnp.allclose(out, ref_f32, atol=5e-2, rtol=5e-2), err_f32

    print("KERNEL_OK")
</pallas_src>

<mosaic_0001>
module attributes {stable_mosaic.version = 11 : i64} {
  func.func @_conv_bn_kernel(%arg0: i32, %arg1: memref<272x1632xbf16, #tpu.memory_space<vmem>>, %arg2: memref<1632x128xbf16, #tpu.memory_space<vmem>>, %arg3: memref<272x1xf32, #tpu.memory_space<vmem>>, %arg4: memref<272x1xf32, #tpu.memory_space<vmem>>, %arg5: memref<272x128xf32, #tpu.memory_space<vmem>>) attributes {dimension_semantics = [#tpu.dimension_semantics<arbitrary>], iteration_bounds = array<i64: 1>, scalar_prefetch = 0 : i64, scratch_operands = 0 : i64, tpu.core_type = #tpu.core_type<tc>, window_params = [{transform_indices = @transform_0, window_bounds = array<i64: 272, 1632>}, {pipeline_mode = #tpu.pipeline_mode<synchronous>, transform_indices = @transform_1, window_bounds = array<i64: 1632, 128>}, {transform_indices = @transform_2, window_bounds = array<i64: 272, 1>}, {transform_indices = @transform_3, window_bounds = array<i64: 272, 1>}, {transform_indices = @transform_4, window_bounds = array<i64: 272, 128>}]} {
    %c0 = arith.constant 0 : index
    %c0_0 = arith.constant 0 : index
    %0 = vector.load %arg1[%c0, %c0_0] : memref<272x1632xbf16, #tpu.memory_space<vmem>>, vector<272x1632xbf16>
    %c0_1 = arith.constant 0 : index
    %c0_2 = arith.constant 0 : index
    %1 = vector.load %arg2[%c0_1, %c0_2] : memref<1632x128xbf16, #tpu.memory_space<vmem>>, vector<1632x128xbf16>
    %cst = arith.constant dense<0.000000e+00> : vector<272x128xf32>
    %2 = tpu.matmul %0, %1, %cst {dimension_numbers = #tpu.dot_dimension_numbers<[1], [0], [0], [1], [0, 0, 1, 1], [], []>} : vector<272x1632xbf16>, vector<1632x128xbf16>, vector<272x128xf32> -> vector<272x128xf32>
    %cst_3 = arith.constant dense<0.000000e+00> : vector<272xf32>
    %3 = vector.multi_reduction <add>, %2, %cst_3 [1] : vector<272x128xf32> to vector<272xf32>
    %4 = vector.shape_cast %3 : vector<272xf32> to vector<272x1xf32>
    %5 = arith.mulf %2, %2 : vector<272x128xf32>
    %cst_4 = arith.constant dense<0.000000e+00> : vector<272xf32>
    %6 = vector.multi_reduction <add>, %5, %cst_4 [1] : vector<272x128xf32> to vector<272xf32>
    %7 = vector.shape_cast %6 : vector<272xf32> to vector<272x1xf32>
    %cst_5 = arith.constant 0.0204081628 : f32
    %8 = vector.broadcast %cst_5 : f32 to vector<272x1xf32>
    %9 = arith.mulf %4, %8 : vector<272x1xf32>
    %cst_6 = arith.constant 0.0204081628 : f32
    %10 = vector.broadcast %cst_6 : f32 to vector<272x1xf32>
    %11 = arith.mulf %7, %10 : vector<272x1xf32>
    %12 = arith.mulf %9, %9 : vector<272x1xf32>
    %13 = arith.subf %11, %12 : vector<272x1xf32>
    %c0_7 = arith.constant 0 : index
    %c0_8 = arith.constant 0 : index
    %14 = vector.load %arg3[%c0_7, %c0_8] : memref<272x1xf32, #tpu.memory_space<vmem>>, vector<272x1xf32>
    %cst_9 = arith.constant 9.99999974E-6 : f32
    %15 = vector.broadcast %cst_9 : f32 to vector<272x1xf32>
    %16 = arith.addf %13, %15 : vector<272x1xf32>
    %17 = math.rsqrt %16 : vector<272x1xf32>
    %18 = arith.mulf %14, %17 : vector<272x1xf32>
    %c0_10 = arith.constant 0 : index
    %c0_11 = arith.constant 0 : index
    %19 = vector.load %arg4[%c0_10, %c0_11] : memref<272x1xf32, #tpu.memory_space<vmem>>, vector<272x1xf32>
    %20 = arith.mulf %9, %18 : vector<272x1xf32>
    %21 = arith.subf %19, %20 : vector<272x1xf32>
    %22 = vector.broadcast %18 : vector<272x1xf32> to vector<272x128xf32>
    %23 = arith.mulf %2, %22 : vector<272x128xf32>
    %24 = vector.broadcast %21 : vector<272x1xf32> to vector<272x128xf32>
    %25 = arith.addf %23, %24 : vector<272x128xf32>
    %c0_12 = arith.constant 0 : index
    %c0_13 = arith.constant 0 : index
    %26 = vector.load %arg5[%c0_12, %c0_13] : memref<272x128xf32, #tpu.memory_space<vmem>>, vector<272x128xf32>
    tpu.vector_store %arg5[%c0_12, %c0_13], %25 {strides = array<i32>} : memref<272x128xf32, #tpu.memory_space<vmem>>, vector<272x128xf32>,
    return
  }
  func.func @transform_0(%arg0: i32) -> (i32, i32) {
    %c0_i32 = arith.constant 0 : i32
    %c0_i32_0 = arith.constant 0 : i32
    return %arg0, %c0_i32 : i32, i32
  }
  func.func @transform_1(%arg0: i32) -> (i32, i32) {
    %c0_i32 = arith.constant 0 : i32
    %c0_i32_0 = arith.constant 0 : i32
    %c0_i32_1 = arith.constant 0 : i32
    return %c0_i32, %c0_i32_0 : i32, i32
  }
  func.func @transform_2(%arg0: i32) -> (i32, i32) {
    %c0_i32 = arith.constant 0 : i32
    %c0_i32_0 = arith.constant 0 : i32
    return %arg0, %c0_i32 : i32, i32
  }
  func.func @transform_3(%arg0: i32) -> (i32, i32) {
    %c0_i32 = arith.constant 0 : i32
    %c0_i32_0 = arith.constant 0 : i32
    return %arg0, %c0_i32 : i32, i32
  }
  func.func @transform_4(%arg0: i32) -> (i32, i32) {
    %c0_i32 = arith.constant 0 : i32
    %c0_i32_0 = arith.constant 0 : i32
    return %arg0, %c0_i32 : i32, i32
  }
}

</mosaic_0001>

<bundles_post_ra>
// kernel: tpu_custom_call.1
= control target key start
LH: loop header
LB: loop body
LE: loop exit
PB: predicated region body
PF: predicated region fallthrough
CT: control target
= control target key end

     0   :  { %9 = vsyncpa [#allocation3], 0  ;;  %s8155_s0 = inlined_call_operand.hbm [shape: bf16[272,1632], index: 0, kind: input, shape index: {}]   ;;  %s8156_s1 = inlined_call_operand.hbm [shape: bf16[1632,128], index: 1, kind: input, shape index: {}]   ;;  %s8157_s2 = inlined_call_operand.vmem [shape: f32[272,1], index: 2, kind: input, shape index: {}]   ;;  %s8158_s3 = inlined_call_operand.vmem [shape: f32[272,1], index: 3, kind: input, shape index: {}]   ;;  %s8159_s4 = inlined_call_operand.hbm [shape: f32[272,128], index: 4, kind: output, shape index: {}]  }
   0x1   :  { %10 = vsyncpa [#allocation6], 0 }
   0x2   :  { %11 = vsyncpa [#allocation4], 0  ;;  %s16_s17 = sshll.u32 %s8155_s0, 4  ;;  %s6611_s18 = smov [#allocation2]   ;;  %s17_s17 = int_to_ptr.hbm [resolvable:$true] %s16_s17 }
   0x3   :  { %s18_s19 = sshll.u32 %s6611_s18, 4  ;;  %s29_s22 = sshll.u32 %s8156_s1, 4  ;;  %s19_s19 = int_to_ptr.vmem [resolvable:$true] %s18_s19  ;;  %s30_s22 = int_to_ptr.hbm [resolvable:$true] %s29_s22 }
   0x4   :  { %s6612_s23 = smov 832   ;;  %s6613_s24 = smov 52  }
   0x5   :  { %24 = dma.hbm_to_vmem [thread:$0]  %s17_s17, 28288, %s19_s19, [#allocation3], %s6612_s23, %s6612_s23, %s6613_s24  }
   0x6   :  { %s6614_s25 = smov [#allocation5]   ;;  %s6615_s27 = smov 64  }
   0x7   :  { %s31_s26 = sshll.u32 %s6614_s25, 4  ;;  %s6616_s28 = smov 4   ;;  %s32_s26 = int_to_ptr.vmem [resolvable:$true] %s31_s26 }
   0x8   :  { %37 = dma.hbm_to_vmem [thread:$0]  %s30_s22, 13056, %s32_s26, [#allocation6], %s6615_s27, %s6615_s27, %s6616_s28  }
   0x9   :  { %6605 = dma.done.wait [#allocation3], 28288  }
   0xa   :  { %6606 = vsyncadd [#allocation3], 4294939008 }
   0xb   :  { %6607 = dma.done.wait [#allocation6], 13056  }
   0xc   :  { %6608 = vsyncadd [#allocation6], 4294954240  ;;  %v6333_v0 = vld [vmem:[#allocation5 + $0x38] sm:$0xff]  ;;  %v6332_v1 = vld [vmem:[#allocation5 + $0x30] sm:$0xff]  ;;  %vm2210_vm0 = vcmask 785408   ;;  %s4782_s27 = sshll.u32 %s8159_s4, 4  ;;  %s4783_s27 = int_to_ptr.hbm [resolvable:$true] %s4782_s27 }
   0xd   :  { %2262 = vmatpush.bf16.msra.mxu0 %v6333_v0  ;;  %6428 = vmatpush.bf16.msra.mxu1 %v6333_v0  ;;  %v6331_v2 = vld [vmem:[#allocation5 + $0x28] sm:$0xff]  ;;  %v6330_v3 = vld [vmem:[#allocation5 + $0x20] sm:$0xff]  ;;  %v6329_v4 = vld [vmem:[#allocation5 + $0x18] sm:$0xff]  ;;  %s6619_s28 = smov 128   ;;  %s6620_s0 = smov 8  }
   0xe   :  { %6430 = vmatpush.bf16.msra.mxu3 %v6333_v0  ;;  %6429 = vmatpush.bf16.msra.mxu2 %v6333_v0  ;;  %v6328_v5 = vld [vmem:[#allocation5 + $0x10] sm:$0xff]  ;;  %v6327_v6 = vld [vmem:[#allocation5 + $0x8] sm:$0xff]  ;;  %v6326_v7 = vld [vmem:[#allocation5] sm:$0xff] }
   0xf   :  { %v4798_v8 = vld [vmem:[#allocation2] sm:$0xf]  ;;  %v6111_v9 = vld [vmem:[#allocation2 + $0x30] sm:$0xf0]  ;;  %v5058_v10 = vld [vmem:[#allocation2 + $0x208] sm:$0xf] }
  0x10   :  { %v6176_v11 = vld [vmem:[#allocation2 + $0x238] sm:$0xf0]  ;;  %v5422_v12 = vld [vmem:[#allocation2 + $0x4e0] sm:$0xf]  ;;  %v6267_v13 = vld [vmem:[#allocation2 + $0x510] sm:$0xf0]  ;;  %v4799_v17 = vor.u32 %v6111_v9, %v4798_v8 }
  0x11   :  { %2263 = vmatpush.bf16.msra.mxu0 %v6332_v1  ;;  %6431 = vmatpush.bf16.msra.mxu1 %v6332_v1  ;;  %v6341_v14 = vld [vmem:[#allocation5 + $0x78] sm:$0xff]  ;;  %v5059_v18 = vor.u32 %v6176_v11, %v5058_v10  ;;  %v5423_v19 = vor.u32 %v6267_v13, %v5422_v12  ;;  %v6340_v20 = vld [vmem:[#allocation5 + $0x70] sm:$0xff]  ;;  %v5318_v23 = vld [vmem:[#allocation2 + $0x410] sm:$0xf] }
  0x12   :  { %6433 = vmatpush.bf16.msra.mxu3 %v6332_v1  ;;  %6432 = vmatpush.bf16.msra.mxu2 %v6332_v1  ;;  %v6357_v15 = vld [vmem:[#allocation5 + $0xf8] sm:$0xff]  ;;  %v6356_v21 = vld [vmem:[#allocation5 + $0xf0] sm:$0xff]  ;;  %v6339_v25 = vld [vmem:[#allocation5 + $0x68] sm:$0xff] }
  0x13   :  { %v6365_v16 = vld [vmem:[#allocation5 + $0x138] sm:$0xff]  ;;  %v6364_v22 = vld [vmem:[#allocation5 + $0x130] sm:$0xff]  ;;  %v6355_v28 = vld [vmem:[#allocation5 + $0xe8] sm:$0xff] }
  0x14   :  { %v6241_v24 = vld [vmem:[#allocation2 + $0x440] sm:$0xf0]  ;;  %v6363_v29 = vld [vmem:[#allocation5 + $0x128] sm:$0xff]  ;;  %v6348_v30 = vld [vmem:[#allocation5 + $0xb0] sm:$0xff] }
  0x15   :  { %2264 = vmatpush.bf16.msra.mxu0 %v6331_v2  ;;  %6434 = vmatpush.bf16.msra.mxu1 %v6331_v2  ;;  %v5319_v26 = vor.u32 %v6241_v24, %v5318_v23  ;;  %v6349_v27 = vld [vmem:[#allocation5 + $0xb8] sm:$0xff]  ;;  %v6338_v31 = vld [vmem:[#allocation5 + $0x60] sm:$0xff]  ;;  %v6124_v35 = vld [vmem:[#allocation2 + $0x98] sm:$0xf0] }
  0x16   :  { %6436 = vmatpush.bf16.msra.mxu3 %v6331_v2  ;;  %6435 = vmatpush.bf16.msra.mxu2 %v6331_v2  ;;  %v6354_v32 = vld [vmem:[#allocation5 + $0xe0] sm:$0xff]  ;;  %v5110_v36 = vld [vmem:[#allocation2 + $0x270] sm:$0xf]  ;;  %v6189_v37 = vld [vmem:[#allocation2 + $0x2a0] sm:$0xf0] }
  0x17   :  { %v6362_v33 = vld [vmem:[#allocation5 + $0x120] sm:$0xff]  ;;  %v6347_v38 = vld [vmem:[#allocation5 + $0xa8] sm:$0xff]  ;;  %v6280_v40 = vld [vmem:[#allocation2 + $0x578] sm:$0xf0]  ;;  %v5111_v44 = vor.u32 %v6189_v37, %v5110_v36 }
  0x18   :  { %v4850_v34 = vld [vmem:[#allocation2 + $0x68] sm:$0xf]  ;;  %v6337_v41 = vld [vmem:[#allocation5 + $0x58] sm:$0xff]  ;;  %v6352_v47 = vld [vmem:[#allocation5 + $0xd0] sm:$0xff] }
  0x19   :  { %2265 = vmatpush.bf16.msra.mxu0 %v6330_v3  ;;  %6437 = vmatpush.bf16.msra.mxu1 %v6330_v3  ;;  %v5474_v39 = vld [vmem:[#allocation2 + $0x548] sm:$0xf]  ;;  %v6353_v42 = vld [vmem:[#allocation5 + $0xd8] sm:$0xff]  ;;  %v4851_v43 = vor.u32 %v6124_v35, %v4850_v34  ;;  %v6336_v49 = vld [vmem:[#allocation5 + $0x50] sm:$0xff] }
  0x1a   :  { %6439 = vmatpush.bf16.msra.mxu3 %v6330_v3  ;;  %6438 = vmatpush.bf16.msra.mxu2 %v6330_v3  ;;  %v5475_v45 = vor.u32 %v6280_v40, %v5474_v39  ;;  %v6361_v46 = vld [vmem:[#allocation5 + $0x118] sm:$0xff]  ;;  %v6346_v48 = vld [vmem:[#allocation5 + $0xa0] sm:$0xff]  ;;  %v5370_v50 = vld [vmem:[#allocation2 + $0x478] sm:$0xf] }
  0x1b   :  { %v6254_v51 = vld [vmem:[#allocation2 + $0x4a8] sm:$0xf0]  ;;  %v6360_v53 = vld [vmem:[#allocation5 + $0x110] sm:$0xff]  ;;  %v6345_v54 = vld [vmem:[#allocation5 + $0x98] sm:$0xff] }
  0x1c   :  { %v5371_v52 = vor.u32 %v6254_v51, %v5370_v50  ;;  %v6351_v55 = vld [vmem:[#allocation5 + $0xc8] sm:$0xff]  ;;  %v6344_v58 = vld [vmem:[#allocation5 + $0x90] sm:$0xff]  ;;  %v6137_v59 = vld [vmem:[#allocation2 + $0x100] sm:$0xf0] }
  0x1d   :  { %2266 = vmatpush.bf16.msra.mxu0 %v6329_v4  ;;  %6440 = vmatpush.bf16.msra.mxu1 %v6329_v4  ;;  %v6335_v56 = vld [vmem:[#allocation5 + $0x48] sm:$0xff]  ;;  %v5162_v60 = vld [vmem:[#allocation2 + $0x2d8] sm:$0xf]  ;;  %v6202_v61 = vld [vmem:[#allocation2 + $0x308] sm:$0xf0] }
  0x1e   :  { %6442 = vmatpush.bf16.msra.mxu3 %v6329_v4  ;;  %6441 = vmatpush.bf16.msra.mxu2 %v6329_v4  ;;  %v4902_v57 = vld [vmem:[#allocation2 + $0xd0] sm:$0xf]  ;;  %v6293_v63 = vld [vmem:[#allocation2 + $0x5e0] sm:$0xf0]  ;;  %v5163_v1 = vor.u32 %v6202_v61, %v5162_v60  ;;  %v6342_v4 = vld [vmem:[#allocation5 + $0x80] sm:$0xff] }
  0x1f   :  { %v5526_v62 = vld [vmem:[#allocation2 + $0x5b0] sm:$0xf]  ;;  %v4903_v0 = vor.u32 %v6137_v59, %v4902_v57  ;;  %v6350_v8 = vld [vmem:[#allocation5 + $0xc0] sm:$0xff]  ;;  %v6381_v11 = vld [vmem:[#allocation5 + $0x1b8] sm:$0xff] }
  0x20   :  { %v5527_v2 = vor.u32 %v6293_v63, %v5526_v62  ;;  %v6343_v3 = vld [vmem:[#allocation5 + $0x88] sm:$0xff]  ;;  %v6334_v9 = vld [vmem:[#allocation5 + $0x40] sm:$0xff]  ;;  %v4954_v13 = vld [vmem:[#allocation2 + $0x138] sm:$0xf] }
  0x21   :  { %2267 = vmatpush.bf16.msra.mxu0 %v6328_v5  ;;  %6443 = vmatpush.bf16.msra.mxu1 %v6328_v5  ;;  %v6358_v10 = vld [vmem:[#allocation5 + $0x100] sm:$0xff]  ;;  %v6373_v23 = vld [vmem:[#allocation5 + $0x178] sm:$0xff]  ;;  %v4858_v24 = vld [vmem:[#allocation2 + $0x70] sm:$0xf] }
  0x22   :  { %6445 = vmatpush.bf16.msra.mxu3 %v6328_v5  ;;  %6444 = vmatpush.bf16.msra.mxu2 %v6328_v5  ;;  %v6359_v5 = vld [vmem:[#allocation5 + $0x108] sm:$0xff]  ;;  %v4910_v37 = vld [vmem:[#allocation2 + $0xd8] sm:$0xf]  ;;  %v6105_v40 = vld [vmem:[#allocation2 + $0x4] sm:$0xf] }
  0x23   :  { %v6388_v50 = vld [vmem:[#allocation5 + $0x1f0] sm:$0xff]  ;;  %v4852_v57 = vld [vmem:[#allocation2 + $0x9c] sm:$0xf0]  ;;  %v6126_v59 = vld [vmem:[#allocation2 + $0xa8] sm:$0xf0] }
  0x24   :  { %v6372_v51 = vld [vmem:[#allocation5 + $0x170] sm:$0xff]  ;;  %v6119_v60 = vld [vmem:[#allocation2 + $0x74] sm:$0xf]  ;;  %v4860_v61 = vld [vmem:[#allocation2 + $0xa4] sm:$0xf0] }
  0x25   :  { %2268 = vmatpush.bf16.msra.mxu0 %v6327_v6  ;;  %6446 = vmatpush.bf16.msra.mxu1 %v6327_v6 }
  0x26   :  { %6448 = vmatpush.bf16.msra.mxu3 %v6327_v6  ;;  %6447 = vmatpush.bf16.msra.mxu2 %v6327_v6  ;;  %v4806_v6 = vld [vmem:[#allocation2 + $0x8] sm:$0xf] }
  0x29   :  { %2269 = vmatpush.bf16.msra.mxu0 %v6326_v7  ;;  %6449 = vmatpush.bf16.msra.mxu1 %v6326_v7 }
  0x2a   :  { %6451 = vmatpush.bf16.msra.mxu3 %v6326_v7  ;;  %6450 = vmatpush.bf16.msra.mxu2 %v6326_v7  ;;  %v6112_v7 = vld [vmem:[#allocation2 + $0x38] sm:$0xf0] }
  0x2b   :  { %v4807_v12 = vor.u32 %v6112_v7, %v4806_v6  ;;  %v4918_v6 = vld [vmem:[#allocation2 + $0xe0] sm:$0xf]  ;;  %v6139_v7 = vld [vmem:[#allocation2 + $0x110] sm:$0xf0] }
  0x2c   :  { %2270 = vmatmul.bf16.vlgmr.msra.gmra.mxu0 %v4799_v17  ;;  %2295 = vmatmul.bf16.vlgmr.msra.gmra.mxu1 %v5059_v18  ;;  %v5578_v17 = vld [vmem:[#allocation2 + $0x618] sm:$0xf]  ;;  %v6306_v18 = vld [vmem:[#allocation2 + $0x648] sm:$0xf0] }
  0x2d   :  { %2356 = vmatpush.bf16.msrb.mxu1 %v6341_v14  ;;  %2638 = vmatpush.bf16.msrb.mxu0 %v6365_v16  ;;  %v6150_v14 = vld [vmem:[#allocation2 + $0x168] sm:$0xf0]  ;;  %v6215_v16 = vld [vmem:[#allocation2 + $0x370] sm:$0xf0] }
  0x2e   :  { %2544 = vmatpush.bf16.msrb.mxu3 %v6357_v15  ;;  %2320 = vmatmul.bf16.vlgmr.msra.gmra.mxu2 %v5319_v26  ;;  %v5214_v15 = vld [vmem:[#allocation2 + $0x340] sm:$0xf] }
  0x2f   :  { %2330 = vmatmul.bf16.vlgmr.msra.gmra.mxu3 %v5423_v19  ;;  %2450 = vmatpush.bf16.msrb.mxu2 %v6349_v27  ;;  %v4955_v19 = vor.u32 %v6150_v14, %v4954_v13  ;;  %v6397_v26 = vld [vmem:[#allocation5 + $0x238] sm:$0xff]  ;;  %v6379_v13 = vld [vmem:[#allocation5 + $0x1a8] sm:$0xff] }
  0x30   :  { %v6387_v14 = vld [vmem:[#allocation5 + $0x1e8] sm:$0xff] }
  0x31   :  { %2357 = vmatpush.bf16.msrb.mxu1 %v6340_v20  ;;  %2639 = vmatpush.bf16.msrb.mxu0 %v6364_v22  ;;  %v5215_v20 = vor.u32 %v6215_v16, %v5214_v15  ;;  %v6389_v22 = vld [vmem:[#allocation5 + $0x1f8] sm:$0xff]  ;;  %v5066_v15 = vld [vmem:[#allocation2 + $0x210] sm:$0xf] }
  0x32   :  { %2545 = vmatpush.bf16.msrb.mxu3 %v6356_v21  ;;  %v5579_v21 = vor.u32 %v6306_v18, %v5578_v17  ;;  %v6177_v16 = vld [vmem:[#allocation2 + $0x240] sm:$0xf0]  ;;  %v6371_v18 = vld [vmem:[#allocation5 + $0x168] sm:$0xff] }
  0x33   :  { %2451 = vmatpush.bf16.msrb.mxu2 %v6348_v30  ;;  %v5266_v30 = vld [vmem:[#allocation2 + $0x3a8] sm:$0xf]  ;;  %v5067_v17 = vor.u32 %v6177_v16, %v5066_v15 }
  0x35   :  { %2358 = vmatpush.bf16.msrb.mxu1 %v6339_v25  ;;  %2640 = vmatpush.bf16.msrb.mxu0 %v6363_v29  ;;  %v6125_v25 = vld [vmem:[#allocation2 + $0xa0] sm:$0xf0]  ;;  %v6163_v29 = vld [vmem:[#allocation2 + $0x1d0] sm:$0xf0] }
  0x36   :  { %2546 = vmatpush.bf16.msrb.mxu3 %v6355_v28  ;;  %v4859_v27 = vor.u32 %v6125_v25, %v4858_v24  ;;  %v5006_v28 = vld [vmem:[#allocation2 + $0x1a0] sm:$0xf]  ;;  %v4964_v24 = vld [vmem:[#allocation2 + $0x174] sm:$0xf0] }
  0x37   :  { %2452 = vmatpush.bf16.msrb.mxu2 %v6347_v38  ;;  %v5007_v34 = vor.u32 %v6163_v29, %v5006_v28  ;;  %v6138_v38 = vld [vmem:[#allocation2 + $0x108] sm:$0xf0] }
  0x38   :  { %v4911_v39 = vor.u32 %v6138_v38, %v4910_v37  ;;  %v6157_v38 = vld [vmem:[#allocation2 + $0x1a4] sm:$0xf] }
  0x39   :  { %2359 = vmatpush.bf16.msrb.mxu1 %v6338_v31  ;;  %2641 = vmatpush.bf16.msrb.mxu0 %v6362_v33  ;;  %v6228_v31 = vld [vmem:[#allocation2 + $0x3d8] sm:$0xf0]  ;;  %v6319_v33 = vld [vmem:[#allocation2 + $0x6b0] sm:$0xf0] }
  0x3a   :  { %2547 = vmatpush.bf16.msrb.mxu3 %v6354_v32  ;;  %v5630_v32 = vld [vmem:[#allocation2 + $0x680] sm:$0xf]  ;;  %v5267_v35 = vor.u32 %v6228_v31, %v5266_v30 }
  0x3b   :  { %2453 = vmatpush.bf16.msrb.mxu2 %v6346_v48  ;;  %v5631_v36 = vor.u32 %v6319_v33, %v5630_v32  ;;  %v5118_v32 = vld [vmem:[#allocation2 + $0x278] sm:$0xf]  ;;  %v6190_v33 = vld [vmem:[#allocation2 + $0x2a8] sm:$0xf0] }
  0x3c   :  { %2275 = vmatmul.bf16.gmra.mxu0 %v4851_v43  ;;  %2300 = vmatmul.bf16.gmra.mxu1 %v5111_v44  ;;  %v6113_v43 = vld [vmem:[#allocation2 + $0x40] sm:$0xf0]  ;;  %v6106_v44 = vld [vmem:[#allocation2 + $0xc] sm:$0xf] }
  0x3d   :  { %2360 = vmatpush.bf16.msrb.mxu1 %v6337_v41  ;;  %2642 = vmatpush.bf16.msrb.mxu0 %v6361_v46  ;;  %v4800_v41 = vld [vmem:[#allocation2 + $0x34] sm:$0xf0] }
  0x3e   :  { %2548 = vmatpush.bf16.msrb.mxu3 %v6353_v42  ;;  %2325 = vmatmul.bf16.gmra.mxu2 %v5371_v52  ;;  %v4814_v42 = vld [vmem:[#allocation2 + $0x10] sm:$0xf]  ;;  %v4803_v46 = vor.u32 %v6105_v40, %v4800_v41  ;;  %v4962_v52 = vld [vmem:[#allocation2 + $0x140] sm:$0xf]  ;;  %v6165_v41 = vld [vmem:[#allocation2 + $0x1e0] sm:$0xf0] }
  0x3f   :  { %2335 = vmatmul.bf16.gmra.mxu3 %v5475_v45  ;;  %2454 = vmatpush.bf16.msrb.mxu2 %v6345_v54  ;;  %v4808_v45 = vld [vmem:[#allocation2 + $0x3c] sm:$0xf0]  ;;  %v6396_v54 = vld [vmem:[#allocation5 + $0x230] sm:$0xff]  ;;  %v5022_v40 = vld [vmem:[#allocation2 + $0x1b0] sm:$0xf] }
  0x40   :  { %v4811_v48 = vor.u32 %v6106_v44, %v4808_v45 }
  0x41   :  { %2361 = vmatpush.bf16.msrb.mxu1 %v6336_v49  ;;  %2643 = vmatpush.bf16.msrb.mxu0 %v6360_v53  ;;  %v6380_v49 = vld [vmem:[#allocation5 + $0x1b0] sm:$0xff]  ;;  %v6151_v53 = vld [vmem:[#allocation2 + $0x170] sm:$0xf0] }
  0x42   :  { %2549 = vmatpush.bf16.msrb.mxu3 %v6352_v47  ;;  %v4815_v47 = vor.u32 %v6113_v43, %v4814_v42  ;;  %v6158_v42 = vld [vmem:[#allocation2 + $0x1ac] sm:$0xf]  ;;  %v5016_v43 = vld [vmem:[#allocation2 + $0x1dc] sm:$0xf0] }
  0x43   :  { %2455 = vmatpush.bf16.msrb.mxu2 %v6344_v58  ;;  %v4866_v58 = vld [vmem:[#allocation2 + $0x78] sm:$0xf] }
  0x44   :  { %v4867_v63 = vor.u32 %v6126_v59, %v4866_v58  ;;  %v6386_v58 = vld [vmem:[#allocation5 + $0x1e0] sm:$0xff] }
  0x45   :  { %2362 = vmatpush.bf16.msrb.mxu1 %v6335_v56  ;;  %2644 = vmatpush.bf16.msrb.mxu0 %v6359_v5  ;;  %v6118_v56 = vld [vmem:[#allocation2 + $0x6c] sm:$0xf]  ;;  %v4904_v5 = vld [vmem:[#allocation2 + $0x104] sm:$0xf0] }
  0x46   :  { %2550 = vmatpush.bf16.msrb.mxu3 %v6351_v55  ;;  %v4963_v55 = vor.u32 %v6151_v53, %v4962_v52  ;;  %v4855_v62 = vor.u32 %v6118_v56, %v4852_v57  ;;  %v6378_v52 = vld [vmem:[#allocation5 + $0x1a0] sm:$0xff]  ;;  %v5170_v53 = vld [vmem:[#allocation2 + $0x2e0] sm:$0xf] }
  0x47   :  { %2456 = vmatpush.bf16.msrb.mxu2 %v6343_v3  ;;  %v6370_v59 = vld [vmem:[#allocation5 + $0x160] sm:$0xff] }
  0x49   :  { %2363 = vmatpush.bf16.msrb.mxu1 %v6334_v9  ;;  %2645 = vmatpush.bf16.msrb.mxu0 %v6358_v10  ;;  %v4912_v9 = vld [vmem:[#allocation2 + $0x10c] sm:$0xf0] }
  0x4a   :  { %2551 = vmatpush.bf16.msrb.mxu3 %v6350_v8  ;;  %v6132_v8 = vld [vmem:[#allocation2 + $0xdc] sm:$0xf] }
  0x4b   :  { %2457 = vmatpush.bf16.msrb.mxu2 %v6342_v4  ;;  %v6131_v4 = vld [vmem:[#allocation2 + $0xd4] sm:$0xf] }
  0x4c   :  { %2280 = vmatmul.bf16.gmra.mxu0 %v4903_v0  ;;  %2305 = vmatmul.bf16.gmra.mxu1 %v5163_v1  ;;  %v4863_v0 = vor.u32 %v6119_v60, %v4860_v61  ;;  %v5014_v1 = vld [vmem:[#allocation2 + $0x1a8] sm:$0xf]  ;;  %v4907_v10 = vor.u32 %v6131_v4, %v4904_v5  ;;  %v6170_v60 = vld [vmem:[#allocation2 + $0x20c] sm:$0xf]  ;;  %v5060_v61 = vld [vmem:[#allocation2 + $0x23c] sm:$0xf0] }
  0x4d   :  { %2732 = vmatpush.bf16.msra.mxu1 %v6373_v23  ;;  %3014 = vmatpush.bf16.msra.mxu0 %v6397_v26  ;;  %v6145_v23 = vld [vmem:[#allocation2 + $0x144] sm:$0xf]  ;;  %v5063_v4 = vor.u32 %v6170_v60, %v5060_v61 }
  0x4e   :  { %2458 = vmatmul.bf16.vlgmr.msrb.gmra.mxu2 %v4807_v12  ;;  %2920 = vmatpush.bf16.msra.mxu3 %v6389_v22  ;;  %v4915_v12 = vor.u32 %v6132_v8, %v4912_v9  ;;  %v6152_v22 = vld [vmem:[#allocation2 + $0x178] sm:$0xf0]  ;;  %v4967_v30 = vor.u32 %v6145_v23, %v4964_v24  ;;  %v6394_v9 = vld [vmem:[#allocation5 + $0x220] sm:$0xff] }
  0x4f   :  { %2340 = vmatmul.bf16.gmra.mxu3 %v5527_v2  ;;  %2826 = vmatpush.bf16.msra.mxu2 %v6381_v11  ;;  %v6164_v2 = vld [vmem:[#allocation2 + $0x1d8] sm:$0xf0]  ;;  %v4919_v11 = vor.u32 %v6139_v7, %v4918_v6 }
  0x50   :  { %v5015_v3 = vor.u32 %v6164_v2, %v5014_v1  ;;  %v6171_v1 = vld [vmem:[#allocation2 + $0x214] sm:$0xf]  ;;  %v5068_v2 = vld [vmem:[#allocation2 + $0x244] sm:$0xf0] }
  0x51   :  { %2733 = vmatpush.bf16.msra.mxu1 %v6372_v51  ;;  %3015 = vmatpush.bf16.msra.mxu0 %v6396_v54  ;;  %v6203_v54 = vld [vmem:[#allocation2 + $0x310] sm:$0xf0]  ;;  %v5071_v8 = vor.u32 %v6171_v1, %v5068_v2 }
  0x52   :  { %2921 = vmatpush.bf16.msra.mxu3 %v6388_v50  ;;  %v5171_v57 = vor.u32 %v6203_v54, %v5170_v53  ;;  %v5178_v53 = vld [vmem:[#allocation2 + $0x2e8] sm:$0xf]  ;;  %v6204_v54 = vld [vmem:[#allocation2 + $0x318] sm:$0xf0] }
  0x53   :  { %2827 = vmatpush.bf16.msra.mxu2 %v6380_v49  ;;  %v5019_v49 = vor.u32 %v6158_v42, %v5016_v43  ;;  %v6377_v43 = vld [vmem:[#allocation5 + $0x198] sm:$0xff] }
  0x55   :  { %2734 = vmatpush.bf16.msra.mxu1 %v6371_v18  ;;  %v5112_v18 = vld [vmem:[#allocation2 + $0x2a4] sm:$0xf0] }
  0x56   :  { %2922 = vmatpush.bf16.msra.mxu3 %v6387_v14 }
  0x57   :  { %2828 = vmatpush.bf16.msra.mxu2 %v6379_v13  ;;  %v6216_v13 = vld [vmem:[#allocation2 + $0x378] sm:$0xf0] }
  0x59   :  { %2735 = vmatpush.bf16.msra.mxu1 %v6370_v59 }
  0x5a   :  { %2923 = vmatpush.bf16.msra.mxu3 %v6386_v58  ;;  %v5172_v58 = vld [vmem:[#allocation2 + $0x314] sm:$0xf0] }
  0x5b   :  { %2829 = vmatpush.bf16.msra.mxu2 %v6378_v52  ;;  %v5164_v52 = vld [vmem:[#allocation2 + $0x30c] sm:$0xf0] }
  0x5c   :  { %2285 = vmatmul.bf16.gmra.mxu0 %v4955_v19  ;;  %2310 = vmatmul.bf16.gmra.mxu1 %v5215_v20  ;;  %v6144_v19 = vld [vmem:[#allocation2 + $0x13c] sm:$0xf]  ;;  %v4956_v20 = vld [vmem:[#allocation2 + $0x16c] sm:$0xf0] }
  0x5d   :  { %v4959_v25 = vor.u32 %v6144_v19, %v4956_v20  ;;  %v5126_v19 = vld [vmem:[#allocation2 + $0x280] sm:$0xf]  ;;  %v6191_v20 = vld [vmem:[#allocation2 + $0x2b0] sm:$0xf0] }
  0x5e   :  { %2463 = vmatmul.bf16.gmra.mxu2 %v4859_v27  ;;  %v6395_v27 = vld [vmem:[#allocation5 + $0x228] sm:$0xff] }
  0x5f   :  { %2345 = vmatmul.bf16.gmra.mxu3 %v5579_v21  ;;  %v4970_v21 = vld [vmem:[#allocation2 + $0x148] sm:$0xf]  ;;  %3016 = vmatpush.bf16.msra.mxu0 %v6395_v27 }
  0x60   :  { %v4971_v26 = vor.u32 %v6152_v22, %v4970_v21  ;;  %v6184_v21 = vld [vmem:[#allocation2 + $0x27c] sm:$0xf]  ;;  %v5120_v22 = vld [vmem:[#allocation2 + $0x2ac] sm:$0xf0]  ;;  %2830 = vmatpush.bf16.msra.mxu2 %v6377_v43 }
  0x63   :  { %3017 = vmatpush.bf16.msra.mxu0 %v6394_v9  ;;  %v5326_v9 = vld [vmem:[#allocation2 + $0x418] sm:$0xf] }
  0x6c   :  { %2290 = vmatmul.bf16.gmra.mxu0 %v5007_v34  ;;  %2315 = vmatmul.bf16.gmra.mxu1 %v5267_v35 }
  0x6e   :  { %2468 = vmatmul.bf16.gmra.mxu2 %v4911_v39  ;;  %v5008_v39 = vld [vmem:[#allocation2 + $0x1d4] sm:$0xf0] }
  0x6f   :  { %2350 = vmatmul.bf16.gmra.mxu3 %v5631_v36  ;;  %v5119_v36 = vor.u32 %v6190_v33, %v5118_v32  ;;  %v5011_v45 = vor.u32 %v6157_v38, %v5008_v39  ;;  %v5123_v32 = vor.u32 %v6184_v21, %v5120_v22  ;;  %v5274_v38 = vld [vmem:[#allocation2 + $0x3b0] sm:$0xf]  ;;  %v6229_v39 = vld [vmem:[#allocation2 + $0x3e0] sm:$0xf0]  ;;  %v6210_v22 = vld [vmem:[#allocation2 + $0x34c] sm:$0xf] }
  0x70   :  { %v5275_v42 = vor.u32 %v6229_v39, %v5274_v38  ;;  %v6217_v21 = vld [vmem:[#allocation2 + $0x380] sm:$0xf0] }
  0x7c   :  { %2364 = vmatmul.bf16.vlgmr.msrb.gmra.mxu1 %v4803_v46  ;;  %2646 = vmatmul.bf16.vlgmr.msrb.gmra.mxu0 %v4815_v47  ;;  %v5023_v46 = vor.u32 %v6165_v41, %v5022_v40 }
  0x7e   :  { %2473 = vmatmul.bf16.gmra.mxu2 %v4963_v55 }
  0x7f   :  { %2552 = vmatmul.bf16.vlgmr.msrb.gmra.mxu3 %v4811_v48 }
  0x8c   :  { %2369 = vmatmul.bf16.gmra.mxu1 %v4855_v62  ;;  %2651 = vmatmul.bf16.gmra.mxu0 %v4867_v63  ;;  %v5074_v62 = vld [vmem:[#allocation2 + $0x218] sm:$0xf]  ;;  %v6178_v63 = vld [vmem:[#allocation2 + $0x248] sm:$0xf0] }
  0x8d   :  { %v5075_v5 = vor.u32 %v6178_v63, %v5074_v62  ;;  %v5179_v62 = vor.u32 %v6204_v54, %v5178_v53  ;;  %v5378_v54 = vld [vmem:[#allocation2 + $0x480] sm:$0xf] }
  0x8e   :  { %2478 = vmatmul.bf16.gmra.mxu2 %v5015_v3 }
  0x8f   :  { %2557 = vmatmul.bf16.gmra.mxu3 %v4863_v0 }
  0x9c   :  { %2374 = vmatmul.bf16.gmra.mxu1 %v4907_v10  ;;  %2656 = vmatmul.bf16.gmra.mxu0 %v4919_v11 }
  0x9e   :  { %2483 = vmatmul.bf16.gmra.mxu2 %v5067_v17  ;;  %v6183_v17 = vld [vmem:[#allocation2 + $0x274] sm:$0xf] }
  0x9f   :  { %2562 = vmatmul.bf16.gmra.mxu3 %v4915_v12  ;;  %v5222_v12 = vld [vmem:[#allocation2 + $0x348] sm:$0xf] }
  0xa0   :  { %v5223_v16 = vor.u32 %v6216_v13, %v5222_v12  ;;  %v6242_v12 = vld [vmem:[#allocation2 + $0x448] sm:$0xf0] }
  0xa9   :  { %v6652_v28 = vpop.f32.mrf.mxu0  ;;  %v6654_v29 = vpop.f32.mrf.mxu1 }
  0xac   :  { %2379 = vmatmul.bf16.gmra.mxu1 %v4959_v25  ;;  %2661 = vmatmul.bf16.gmra.mxu0 %v4971_v26  ;;  %v5115_v25 = vor.u32 %v6183_v17, %v5112_v18  ;;  %v5127_v26 = vor.u32 %v6191_v20, %v5126_v19  ;;  %v5327_v17 = vor.u32 %v6242_v12, %v5326_v9  ;;  %v6209_v18 = vld [vmem:[#allocation2 + $0x344] sm:$0xf]  ;;  %v5216_v19 = vld [vmem:[#allocation2 + $0x374] sm:$0xf0]  ;;  %v5230_v20 = vld [vmem:[#allocation2 + $0x350] sm:$0xf] }
  0xad   :  { %v5219_v38 = vor.u32 %v6209_v18, %v5216_v19  ;;  %v5231_v39 = vor.u32 %v6217_v21, %v5230_v20  ;;  %v6376_v9 = vld [vmem:[#allocation5 + $0x190] sm:$0xff]  ;;  %v6222_v18 = vld [vmem:[#allocation2 + $0x3ac] sm:$0xf]  ;;  %v6223_v21 = vld [vmem:[#allocation2 + $0x3b4] sm:$0xf] }
  0xae   :  { %2488 = vmatmul.bf16.gmra.mxu2 %v5119_v36  ;;  %v6384_v12 = vld [vmem:[#allocation5 + $0x1d0] sm:$0xff]  ;;  %v6230_v20 = vld [vmem:[#allocation2 + $0x3e8] sm:$0xf0] }
  0xaf   :  { %2567 = vmatmul.bf16.gmra.mxu3 %v4967_v30  ;;  %v5282_v19 = vld [vmem:[#allocation2 + $0x3b8] sm:$0xf]  ;;  %2831 = vmatpush.bf16.msra.mxu2 %v6376_v9 }
  0xb1   :  { %v6658_v34 = vpop.f32.mrf.mxu0  ;;  %v6660_v35 = vpop.f32.mrf.mxu1 }
  0xb2   :  { %v6656_v31 = vpop.f32.mrf.mxu3  ;;  %v6662_v37 = vpop.f32.mrf.mxu2 }
  0xb9   :  { %v6666_v47 = vpop.f32.mrf.mxu0  ;;  %v6668_v48 = vpop.f32.mrf.mxu1 }
  0xba   :  { %v6664_v44 = vpop.f32.mrf.mxu3  ;;  %v6670_v50 = vpop.f32.mrf.mxu2 }
  0xbc   :  { %2384 = vmatmul.bf16.gmra.mxu1 %v5011_v45  ;;  %2666 = vmatmul.bf16.gmra.mxu0 %v5023_v46  ;;  %v6385_v45 = vld [vmem:[#allocation5 + $0x1d8] sm:$0xff] }
  0xbd   :  { %v6369_v46 = vld [vmem:[#allocation5 + $0x158] sm:$0xff]  ;;  %2924 = vmatpush.bf16.msra.mxu3 %v6385_v45 }
  0xbe   :  { %2493 = vmatmul.bf16.gmra.mxu2 %v5171_v57  ;;  %2736 = vmatpush.bf16.msra.mxu1 %v6369_v46  ;;  %v6197_v57 = vld [vmem:[#allocation2 + $0x2e4] sm:$0xf] }
  0xbf   :  { %2572 = vmatmul.bf16.gmra.mxu3 %v5019_v49  ;;  %v6196_v49 = vld [vmem:[#allocation2 + $0x2dc] sm:$0xf]  ;;  %v5175_v2 = vor.u32 %v6197_v57, %v5172_v58  ;;  %v6255_v57 = vld [vmem:[#allocation2 + $0x4b0] sm:$0xf0] }
  0xc0   :  { %v5167_v61 = vor.u32 %v6196_v49, %v5164_v52 }
  0xc1   :  { %v6674_v55 = vpop.f32.mrf.mxu0  ;;  %v6676_v56 = vpop.f32.mrf.mxu1  ;;  %2925 = vmatpush.bf16.msra.mxu3 %v6384_v12 }
  0xc2   :  { %v6672_v51 = vpop.f32.mrf.mxu3  ;;  %v6678_v0 = vpop.f32.mrf.mxu2 }
  0xc9   :  { %v6682_v6 = vpop.f32.mrf.mxu0  ;;  %v6684_v7 = vpop.f32.mrf.mxu1 }
  0xca   :  { %v6680_v3 = vpop.f32.mrf.mxu3  ;;  %v6686_v10 = vpop.f32.mrf.mxu2 }
  0xcc   :  { %2389 = vmatmul.bf16.gmra.mxu1 %v5063_v4  ;;  %2671 = vmatmul.bf16.gmra.mxu0 %v5075_v5  ;;  %v6393_v4 = vld [vmem:[#allocation5 + $0x218] sm:$0xff] }
  0xcd   :  { %3018 = vmatpush.bf16.msra.mxu0 %v6393_v4 }
  0xce   :  { %2498 = vmatmul.bf16.gmra.mxu2 %v5223_v16 }
  0xcf   :  { %2577 = vmatmul.bf16.gmra.mxu3 %v5071_v8 }
  0xd1   :  { %v6690_v14 = vpop.f32.mrf.mxu0  ;;  %v6692_v15 = vpop.f32.mrf.mxu1 }
  0xd2   :  { %v6688_v11 = vpop.f32.mrf.mxu3  ;;  %v6694_v23 = vpop.f32.mrf.mxu2 }
  0xd9   :  { %v6698_v27 = vpop.f32.mrf.mxu0  ;;  %v6700_v30 = vpop.f32.mrf.mxu1 }
  0xda   :  { %v6696_v24 = vpop.f32.mrf.mxu3  ;;  %v6702_v33 = vpop.f32.mrf.mxu2 }
  0xdc   :  { %2394 = vmatmul.bf16.gmra.mxu1 %v5115_v25  ;;  %2676 = vmatmul.bf16.gmra.mxu0 %v5127_v26  ;;  %v5224_v25 = vld [vmem:[#allocation2 + $0x37c] sm:$0xf0] }
  0xdd   :  { %v5227_v45 = vor.u32 %v6210_v22, %v5224_v25  ;;  %v5276_v22 = vld [vmem:[#allocation2 + $0x3e4] sm:$0xf0] }
  0xde   :  { %2503 = vmatmul.bf16.gmra.mxu2 %v5275_v42 }
  0xdf   :  { %2582 = vmatmul.bf16.gmra.mxu3 %v5123_v32 }
  0xe1   :  { %v6706_v40 = vpop.f32.mrf.mxu0  ;;  %v6708_v41 = vpop.f32.mrf.mxu1 }
  0xe2   :  { %v6704_v36 = vpop.f32.mrf.mxu3  ;;  %v6710_v59 = vpop.f32.mrf.mxu2 }
  0xe9   :  { %v6714_v63 = vpop.f32.mrf.mxu0  ;;  %v6716_v1 = vpop.f32.mrf.mxu1 }
  0xea   :  { %v6712_v60 = vpop.f32.mrf.mxu3  ;;  %v6718_v5 = vpop.f32.mrf.mxu2 }
  0xec   :  { %2399 = vmatmul.bf16.gmra.mxu1 %v5167_v61  ;;  %2681 = vmatmul.bf16.gmra.mxu0 %v5179_v62 }
  0xee   :  { %2508 = vmatmul.bf16.gmra.mxu2 %v5327_v17 }
  0xef   :  { %2587 = vmatmul.bf16.gmra.mxu3 %v5175_v2  ;;  %v5379_v2 = vor.u32 %v6255_v57, %v5378_v54  ;;  %v6392_v57 = vld [vmem:[#allocation5 + $0x210] sm:$0xff] }
  0xf0   :  { %3019 = vmatpush.bf16.msra.mxu0 %v6392_v57 }
  0xf1   :  { %v6722_v13 = vpop.f32.mrf.mxu0  ;;  %v6724_v16 = vpop.f32.mrf.mxu1 }
  0xf2   :  { %v6720_v8 = vpop.f32.mrf.mxu3  ;;  %v6726_v26 = vpop.f32.mrf.mxu2 }
  0xf9   :  { %v2365_v42 = vpop.f32.mrf.mxu1  ;;  %v2647_v43 = vpop.f32.mrf.mxu0 }
  0xfa   :  { %v6728_v32 = vpop.f32.mrf.mxu3  ;;  %v2366_v46 = vadd.f32 %v2365_v42, %v6652_v28  ;;  %v6732_v52 = vpop.f32.mrf.mxu2 }
  0xfc   :  { %2404 = vmatmul.bf16.gmra.mxu1 %v5219_v38  ;;  %2686 = vmatmul.bf16.gmra.mxu0 %v5231_v39  ;;  %v2460_v49 = vadd.f32 %v6694_v23, %v2366_v46  ;;  %v5268_v23 = vld [vmem:[#allocation2 + $0x3dc] sm:$0xf0]  ;;  %v5279_v46 = vor.u32 %v6223_v21, %v5276_v22  ;;  %v6243_v21 = vld [vmem:[#allocation2 + $0x450] sm:$0xf0]  ;;  %v6236_v22 = vld [vmem:[#allocation2 + $0x41c] sm:$0xf] }
  0xfd   :  { %v5271_v39 = vor.u32 %v6222_v18, %v5268_v23 }
  0xfe   :  { %2513 = vmatmul.bf16.gmra.mxu2 %v5379_v2  ;;  %v5430_v2 = vld [vmem:[#allocation2 + $0x4e8] sm:$0xf] }
  0xff   :  { %2592 = vmatmul.bf16.gmra.mxu3 %v5227_v45 }
 0x101   :  { %v2367_v61 = vpop.f32.mrf.mxu1  ;;  %v2649_v62 = vpop.f32.mrf.mxu0 }
 0x102   :  { %v2553_v53 = vpop.f32.mrf.mxu3  ;;  %v2368_v4 = vadd.f32 %v2367_v61, %v6658_v34  ;;  %v6738_v25 = vpop.f32.mrf.mxu2  ;;  %v5283_v34 = vor.u32 %v6230_v20, %v5282_v19  ;;  %v6235_v19 = vld [vmem:[#allocation2 + $0x414] sm:$0xf]  ;;  %v5334_v20 = vld [vmem:[#allocation2 + $0x420] sm:$0xf] }
 0x103   :  { %v2554_v58 = vadd.f32 %v2553_v53, %v2460_v49  ;;  %v6368_v49 = vld [vmem:[#allocation5 + $0x150] sm:$0xff] }
 0x104   :  { %v2462_v28 = vadd.f32 %v6702_v33, %v2368_v4  ;;  %2737 = vmatpush.bf16.msra.mxu1 %v6368_v49  ;;  %v6268_v4 = vld [vmem:[#allocation2 + $0x518] sm:$0xf0] }
 0x105   :  { %v6735_v17 = vadd.f32 %v2647_v43, %v2554_v58  ;;  %v5431_v18 = vor.u32 %v6268_v4, %v5430_v2  ;;  %v5482_v2 = vld [vmem:[#allocation2 + $0x550] sm:$0xf]  ;;  %v6281_v4 = vld [vmem:[#allocation2 + $0x580] sm:$0xf0] }
 0x109   :  { %v2370_v45 = vpop.f32.mrf.mxu1  ;;  %v2652_v43 = vpop.f32.mrf.mxu0 }
 0x10a   :  { %v2555_v38 = vpop.f32.mrf.mxu3  ;;  %v2371_v33 = vadd.f32 %v2370_v45, %v6666_v47  ;;  %v6744_v58 = vpop.f32.mrf.mxu2  ;;  %v5335_v45 = vor.u32 %v6243_v21, %v5334_v20  ;;  %v5386_v20 = vld [vmem:[#allocation2 + $0x488] sm:$0xf]  ;;  %v6256_v21 = vld [vmem:[#allocation2 + $0x4b8] sm:$0xf0] }
 0x10b   :  { %v2556_v42 = vadd.f32 %v2555_v38, %v2462_v28  ;;  %v5328_v38 = vld [vmem:[#allocation2 + $0x44c] sm:$0xf0] }
 0x10c   :  { %2409 = vmatmul.bf16.gmra.mxu1 %v5271_v39  ;;  %2691 = vmatmul.bf16.gmra.mxu0 %v5283_v34  ;;  %v2465_v54 = vadd.f32 %v6710_v59, %v2371_v33  ;;  %v5320_v59 = vld [vmem:[#allocation2 + $0x444] sm:$0xf0] }
 0x10d   :  { %v6741_v53 = vadd.f32 %v2649_v62, %v2556_v42  ;;  %v5323_v42 = vor.u32 %v6235_v19, %v5320_v59  ;;  %v6375_v19 = vld [vmem:[#allocation5 + $0x188] sm:$0xff]  ;;  %v6248_v59 = vld [vmem:[#allocation2 + $0x47c] sm:$0xf] }
 0x10e   :  { %2518 = vmatmul.bf16.gmra.mxu2 %v5431_v18 }
 0x10f   :  { %2597 = vmatmul.bf16.gmra.mxu3 %v5279_v46  ;;  %2832 = vmatpush.bf16.msra.mxu2 %v6375_v19 }
 0x111   :  { %v2372_v12 = vpop.f32.mrf.mxu1  ;;  %v2654_v28 = vpop.f32.mrf.mxu0 }
 0x112   :  { %v2558_v61 = vpop.f32.mrf.mxu3  ;;  %v2373_v47 = vadd.f32 %v2372_v12, %v6674_v55  ;;  %v6750_v39 = vpop.f32.mrf.mxu2  ;;  %v5331_v55 = vor.u32 %v6236_v22, %v5328_v38  ;;  %v6249_v22 = vld [vmem:[#allocation2 + $0x484] sm:$0xf]  ;;  %v5380_v38 = vld [vmem:[#allocation2 + $0x4b4] sm:$0xf0] }
 0x113   :  { %v2559_v9 = vadd.f32 %v2558_v61, %v2465_v54 }
 0x114   :  { %v2467_v23 = vadd.f32 %v6718_v5, %v2373_v47  ;;  %v5483_v47 = vor.u32 %v6281_v4, %v5482_v2 }
 0x115   :  { %v6747_v62 = vadd.f32 %v2652_v43, %v2559_v9 }
 0x119   :  { %v2375_v49 = vpop.f32.mrf.mxu1  ;;  %v2657_v33 = vpop.f32.mrf.mxu0 }
 0x11a   :  { %v2560_v34 = vpop.f32.mrf.mxu3  ;;  %v2376_v43 = vadd.f32 %v2375_v49, %v6682_v6  ;;  %v6756_v57 = vpop.f32.mrf.mxu2 }
 0x11b   :  { %v2561_v46 = vadd.f32 %v2560_v34, %v2467_v23 }
 0x11c   :  { %2414 = vmatmul.bf16.gmra.mxu1 %v5323_v42  ;;  %2696 = vmatmul.bf16.gmra.mxu0 %v5335_v45  ;;  %v2470_v5 = vadd.f32 %v6726_v26, %v2376_v43  ;;  %v5372_v26 = vld [vmem:[#allocation2 + $0x4ac] sm:$0xf0] }
 0x11d   :  { %v6753_v54 = vadd.f32 %v2654_v28, %v2561_v46  ;;  %v5375_v45 = vor.u32 %v6248_v59, %v5372_v26  ;;  %v5387_v46 = vor.u32 %v6256_v21, %v5386_v20  ;;  %v6383_v43 = vld [vmem:[#allocation5 + $0x1c8] sm:$0xff]  ;;  %v5424_v21 = vld [vmem:[#allocation2 + $0x514] sm:$0xf0] }
 0x11e   :  { %2523 = vmatmul.bf16.gmra.mxu2 %v5483_v47  ;;  %2926 = vmatpush.bf16.msra.mxu3 %v6383_v43  ;;  %v6294_v47 = vld [vmem:[#allocation2 + $0x5e8] sm:$0xf0]  ;;  %v6391_v59 = vld [vmem:[#allocation5 + $0x208] sm:$0xff] }
 0x11f   :  { %2602 = vmatmul.bf16.gmra.mxu3 %v5331_v55  ;;  %3020 = vmatpush.bf16.msra.mxu0 %v6391_v59 }
 0x121   :  { %v2377_v12 = vpop.f32.mrf.mxu1  ;;  %v2659_v18 = vpop.f32.mrf.mxu0 }
 0x122   :  { %v2563_v61 = vpop.f32.mrf.mxu3  ;;  %v2378_v23 = vadd.f32 %v2377_v12, %v6690_v14  ;;  %v6762_v34 = vpop.f32.mrf.mxu2  ;;  %v5534_v12 = vld [vmem:[#allocation2 + $0x5b8] sm:$0xf] }
 0x123   :  { %v2564_v9 = vadd.f32 %v2563_v61, %v2470_v5  ;;  %v6367_v5 = vld [vmem:[#allocation5 + $0x148] sm:$0xff] }
 0x124   :  { %v2472_v28 = vadd.f32 %v6732_v52, %v2378_v23  ;;  %2738 = vmatpush.bf16.msra.mxu1 %v6367_v5 }
 0x125   :  { %v6759_v6 = vadd.f32 %v2657_v33, %v2564_v9  ;;  %v5383_v33 = vor.u32 %v6249_v22, %v5380_v38  ;;  %v5438_v22 = vld [vmem:[#allocation2 + $0x4f0] sm:$0xf]  ;;  %v6269_v38 = vld [vmem:[#allocation2 + $0x520] sm:$0xf0] }
 0x129   :  { %v2380_v14 = vpop.f32.mrf.mxu1  ;;  %v2662_v55 = vpop.f32.mrf.mxu0 }
 0x12a   :  { %v2565_v42 = vpop.f32.mrf.mxu3  ;;  %v2381_v52 = vadd.f32 %v2380_v14, %v6698_v27  ;;  %v6768_v4 = vpop.f32.mrf.mxu2  ;;  %v5535_v27 = vor.u32 %v6294_v47, %v5534_v12  ;;  %v5586_v47 = vld [vmem:[#allocation2 + $0x620] sm:$0xf] }
 0x12b   :  { %v2566_v49 = vadd.f32 %v2565_v42, %v2472_v28  ;;  %v6262_v42 = vld [vmem:[#allocation2 + $0x4ec] sm:$0xf] }
 0x12c   :  { %2419 = vmatmul.bf16.gmra.mxu1 %v5375_v45  ;;  %2701 = vmatmul.bf16.gmra.mxu0 %v5387_v46  ;;  %v2475_v2 = vadd.f32 %v6738_v25, %v2381_v52  ;;  %v6261_v25 = vld [vmem:[#allocation2 + $0x4e4] sm:$0xf]  ;;  %v5432_v45 = vld [vmem:[#allocation2 + $0x51c] sm:$0xf0] }
 0x12d   :  { %v6765_v61 = vadd.f32 %v2659_v18, %v2566_v49  ;;  %v5427_v14 = vor.u32 %v6261_v25, %v5424_v21  ;;  %v5435_v5 = vor.u32 %v6262_v42, %v5432_v45  ;;  %v5476_v21 = vld [vmem:[#allocation2 + $0x57c] sm:$0xf0]  ;;  %v5484_v42 = vld [vmem:[#allocation2 + $0x584] sm:$0xf0] }
 0x12e   :  { %2528 = vmatmul.bf16.gmra.mxu2 %v5535_v27 }
 0x12f   :  { %2607 = vmatmul.bf16.gmra.mxu3 %v5383_v33  ;;  %v5439_v33 = vor.u32 %v6269_v38, %v5438_v22  ;;  %v6282_v22 = vld [vmem:[#allocation2 + $0x588] sm:$0xf0]  ;;  %v6275_v38 = vld [vmem:[#allocation2 + $0x554] sm:$0xf] }
 0x131   :  { %v2382_v19 = vpop.f32.mrf.mxu1  ;;  %v2664_v28 = vpop.f32.mrf.mxu0 }
 0x132   :  { %v2568_v9 = vpop.f32.mrf.mxu3  ;;  %v2383_v26 = vadd.f32 %v2382_v19, %v6706_v40  ;;  %v6774_v46 = vpop.f32.mrf.mxu2 }
 0x133   :  { %v2569_v23 = vadd.f32 %v2568_v9, %v2475_v2 }
 0x134   :  { %v2477_v20 = vadd.f32 %v6744_v58, %v2383_v26 }
 0x135   :  { %v6771_v18 = vadd.f32 %v2662_v55, %v2569_v23  ;;  %v6307_v23 = vld [vmem:[#allocation2 + $0x650] sm:$0xf0] }
 0x136   :  { %v5587_v26 = vor.u32 %v6307_v23, %v5586_v47  ;;  %v6366_v47 = vld [vmem:[#allocation5 + $0x140] sm:$0xff] }
 0x137   :  { %2739 = vmatpush.bf16.msra.mxu1 %v6366_v47 }
 0x139   :  { %v2385_v52 = vpop.f32.mrf.mxu1  ;;  %v2667_v40 = vpop.f32.mrf.mxu0 }
 0x13a   :  { %v2570_v49 = vpop.f32.mrf.mxu3  ;;  %v2386_v55 = vadd.f32 %v2385_v52, %v6714_v63  ;;  %v6780_v9 = vpop.f32.mrf.mxu2 }
 0x13b   :  { %v2571_v43 = vadd.f32 %v2570_v49, %v2477_v20 }
 0x13c   :  { %2424 = vmatmul.bf16.gmra.mxu1 %v5427_v14  ;;  %2706 = vmatmul.bf16.gmra.mxu0 %v5439_v33  ;;  %v2480_v58 = vadd.f32 %v6750_v39, %v2386_v55  ;;  %v5490_v39 = vld [vmem:[#allocation2 + $0x558] sm:$0xf] }
 0x13d   :  { %v6777_v2 = vadd.f32 %v2664_v28, %v2571_v43  ;;  %v6274_v28 = vld [vmem:[#allocation2 + $0x54c] sm:$0xf]  ;;  %v5491_v33 = vor.u32 %v6282_v22, %v5490_v39  ;;  %v6287_v22 = vld [vmem:[#allocation2 + $0x5b4] sm:$0xf] }
 0x13e   :  { %2533 = vmatmul.bf16.gmra.mxu2 %v5587_v26  ;;  %v5479_v14 = vor.u32 %v6274_v28, %v5476_v21  ;;  %v6320_v26 = vld [vmem:[#allocation2 + $0x6b8] sm:$0xf0]  ;;  %v6390_v21 = vld [vmem:[#allocation5 + $0x200] sm:$0xff] }
 0x13f   :  { %2612 = vmatmul.bf16.gmra.mxu3 %v5435_v5  ;;  %3021 = vmatpush.bf16.msra.mxu0 %v6390_v21 }
 0x141   :  { %v2387_v59 = vpop.f32.mrf.mxu1  ;;  %v2669_v27 = vpop.f32.mrf.mxu0 }
 0x142   :  { %v2573_v12 = vpop.f32.mrf.mxu3  ;;  %v2388_v20 = vadd.f32 %v2387_v59, %v6722_v13  ;;  %v6786_v45 = vpop.f32.mrf.mxu2  ;;  %v5487_v13 = vor.u32 %v6275_v38, %v5484_v42  ;;  %v5638_v59 = vld [vmem:[#allocation2 + $0x688] sm:$0xf]  ;;  %v5542_v42 = vld [vmem:[#allocation2 + $0x5c0] sm:$0xf] }
 0x143   :  { %v2574_v19 = vadd.f32 %v2573_v12, %v2480_v58  ;;  %v5639_v28 = vor.u32 %v6320_v26, %v5638_v59  ;;  %v5528_v38 = vld [vmem:[#allocation2 + $0x5e4] sm:$0xf0]  ;;  %v4822_v26 = vld [vmem:[#allocation2 + $0x18] sm:$0xf] }
 0x144   :  { %v2482_v63 = vadd.f32 %v6756_v57, %v2388_v20  ;;  %v6382_v57 = vld [vmem:[#allocation5 + $0x1c0] sm:$0xff] }
 0x145   :  { %v6783_v25 = vadd.f32 %v2667_v40, %v2574_v19  ;;  %v6374_v40 = vld [vmem:[#allocation5 + $0x180] sm:$0xff]  ;;  %2927 = vmatpush.bf16.msra.mxu3 %v6382_v57 }
 0x146   :  { %2833 = vmatpush.bf16.msra.mxu2 %v6374_v40 }
 0x149   :  { %v2390_v52 = vpop.f32.mrf.mxu1  ;;  %v2672_v5 = vpop.f32.mrf.mxu0 }
 0x14a   :  { %v2575_v49 = vpop.f32.mrf.mxu3  ;;  %v2391_v55 = vadd.f32 %v2390_v52, %v6654_v29  ;;  %v6792_v23 = vpop.f32.mrf.mxu2 }
 0x14b   :  { %v2576_v43 = vadd.f32 %v2575_v49, %v2482_v63  ;;  %v6295_v49 = vld [vmem:[#allocation2 + $0x5f0] sm:$0xf0] }
 0x14c   :  { %2429 = vmatmul.bf16.gmra.mxu1 %v5479_v14  ;;  %2711 = vmatmul.bf16.gmra.mxu0 %v5491_v33  ;;  %v2485_v12 = vadd.f32 %v6762_v34, %v2391_v55  ;;  %v6288_v14 = vld [vmem:[#allocation2 + $0x5bc] sm:$0xf]  ;;  %v5536_v33 = vld [vmem:[#allocation2 + $0x5ec] sm:$0xf0]  ;;  %v5543_v40 = vor.u32 %v6295_v49, %v5542_v42  ;;  %v6301_v49 = vld [vmem:[#allocation2 + $0x624] sm:$0xf] }
 0x14d   :  { %v6789_v58 = vadd.f32 %v2669_v27, %v2576_v43  ;;  %v6308_v42 = vld [vmem:[#allocation2 + $0x658] sm:$0xf0] }
 0x14e   :  { %2538 = vmatmul.bf16.gmra.mxu2 %v5639_v28 }
 0x14f   :  { %2617 = vmatmul.bf16.gmra.mxu3 %v5487_v13  ;;  %v5531_v13 = vor.u32 %v6287_v22, %v5528_v38  ;;  %v5580_v38 = vld [vmem:[#allocation2 + $0x64c] sm:$0xf0] }
 0x151   :  { %v2392_v63 = vpop.f32.mrf.mxu1  ;;  %v2674_v29 = vpop.f32.mrf.mxu0 }
 0x152   :  { %v2578_v19 = vpop.f32.mrf.mxu3  ;;  %v2393_v27 = vadd.f32 %v2392_v63, %v6660_v35  ;;  %v6798_v43 = vpop.f32.mrf.mxu2 }
 0x153   :  { %v2579_v20 = vadd.f32 %v2578_v19, %v2485_v12 }
 0x154   :  { %v2487_v34 = vadd.f32 %v6768_v4, %v2393_v27 }
 0x155   :  { %v6795_v39 = vadd.f32 %v2672_v5, %v2579_v20  ;;  %v5539_v5 = vor.u32 %v6288_v14, %v5536_v33  ;;  %v6114_v20 = vld [vmem:[#allocation2 + $0x48] sm:$0xf0]  ;;  %v5588_v14 = vld [vmem:[#allocation2 + $0x654] sm:$0xf0] }
 0x156   :  { %v4823_v21 = vor.u32 %v6114_v20, %v4822_v26  ;;  %v6405_v26 = vld [vmem:[#allocation5 + $0x278] sm:$0xff] }
 0x157   :  { %3108 = vmatpush.bf16.msrb.mxu1 %v6405_v26 }
 0x159   :  { %v2395_v35 = vpop.f32.mrf.mxu1  ;;  %v2677_v57 = vpop.f32.mrf.mxu0 }
 0x15a   :  { %v2580_v52 = vpop.f32.mrf.mxu3  ;;  %v2396_v12 = vadd.f32 %v2395_v35, %v6668_v48  ;;  %v6804_v19 = vpop.f32.mrf.mxu2 }
 0x15b   :  { %v2581_v55 = vadd.f32 %v2580_v52, %v2487_v34 }
 0x15c   :  { %2434 = vmatmul.bf16.gmra.mxu1 %v5531_v13  ;;  %2716 = vmatmul.bf16.gmra.mxu0 %v5543_v40  ;;  %v2490_v47 = vadd.f32 %v6774_v46, %v2396_v12  ;;  %v5594_v46 = vld [vmem:[#allocation2 + $0x628] sm:$0xf]  ;;  %v6413_v12 = vld [vmem:[#allocation5 + $0x2b8] sm:$0xff] }
 0x15d   :  { %v6801_v4 = vadd.f32 %v2674_v29, %v2581_v55  ;;  %v6300_v29 = vld [vmem:[#allocation2 + $0x61c] sm:$0xf]  ;;  %v5595_v40 = vor.u32 %v6308_v42, %v5594_v46  ;;  %3202 = vmatpush.bf16.msrb.mxu2 %v6413_v12  ;;  %v6313_v42 = vld [vmem:[#allocation2 + $0x684] sm:$0xf] }
 0x15e   :  { %2834 = vmatmul.bf16.vlgmr.msra.gmra.mxu2 %v4823_v21  ;;  %v5583_v13 = vor.u32 %v6300_v29, %v5580_v38  ;;  %v6127_v21 = vld [vmem:[#allocation2 + $0xb0] sm:$0xf0] }
 0x15f   :  { %2622 = vmatmul.bf16.gmra.mxu3 %v5539_v5  ;;  %v6427_v38 = vld [vmem:[#allocation5 + $0x328] sm:$0xff] }
 0x160   :  { %3392 = vmatpush.bf16.msrb.mxu0 %v6427_v38 }
 0x161   :  { %v2397_v28 = vpop.f32.mrf.mxu1  ;;  %v2679_v27 = vpop.f32.mrf.mxu0 }
 0x162   :  { %v2583_v59 = vpop.f32.mrf.mxu3  ;;  %v2398_v34 = vadd.f32 %v2397_v28, %v6676_v56  ;;  %v6810_v33 = vpop.f32.mrf.mxu2  ;;  %v5591_v56 = vor.u32 %v6301_v49, %v5588_v14  ;;  %v4874_v28 = vld [vmem:[#allocation2 + $0x80] sm:$0xf]  ;;  %v5632_v49 = vld [vmem:[#allocation2 + $0x6b4] sm:$0xf0]  ;;  %v5646_v14 = vld [vmem:[#allocation2 + $0x690] sm:$0xf] }
 0x163   :  { %v2584_v63 = vadd.f32 %v2583_v59, %v2490_v47  ;;  %v6421_v59 = vld [vmem:[#allocation5 + $0x2f8] sm:$0xff] }
 0x164   :  { %v2492_v48 = vadd.f32 %v6780_v9, %v2398_v34  ;;  %3296 = vmatpush.bf16.msrb.mxu3 %v6421_v59 }
 0x165   :  { %v6807_v22 = vadd.f32 %v2677_v57, %v2584_v63 }
 0x169   :  { %v2400_v35 = vpop.f32.mrf.mxu1  ;;  %v2682_v5 = vpop.f32.mrf.mxu0 }
 0x16a   :  { %v2585_v52 = vpop.f32.mrf.mxu3  ;;  %v2401_v57 = vadd.f32 %v2400_v35, %v6684_v7  ;;  %v6816_v20 = vpop.f32.mrf.mxu2 }
 0x16b   :  { %v2586_v55 = vadd.f32 %v2585_v52, %v2492_v48  ;;  %v6321_v52 = vld [vmem:[#allocation2 + $0x6c0] sm:$0xf0] }
 0x16c   :  { %2439 = vmatmul.bf16.gmra.mxu1 %v5583_v13  ;;  %2721 = vmatmul.bf16.gmra.mxu0 %v5595_v40  ;;  %v2495_v47 = vadd.f32 %v6786_v45, %v2401_v57  ;;  %v6314_v13 = vld [vmem:[#allocation2 + $0x68c] sm:$0xf]  ;;  %v5640_v40 = vld [vmem:[#allocation2 + $0x6bc] sm:$0xf0]  ;;  %v5647_v57 = vor.u32 %v6321_v52, %v5646_v14  ;;  %v6115_v14 = vld [vmem:[#allocation2 + $0x50] sm:$0xf0] }
 0x16d   :  { %v6813_v9 = vadd.f32 %v2679_v27, %v2586_v55  ;;  %v4875_v27 = vor.u32 %v6127_v21, %v4874_v28  ;;  %v4926_v21 = vld [vmem:[#allocation2 + $0xe8] sm:$0xf]  ;;  %v6108_v52 = vld [vmem:[#allocation2 + $0x1c] sm:$0xf] }
 0x16f   :  { %2627 = vmatmul.bf16.gmra.mxu3 %v5591_v56  ;;  %2839 = vmatmul.bf16.gmra.mxu2 %v4875_v27  ;;  %v5635_v56 = vor.u32 %v6313_v42, %v5632_v49  ;;  %v4816_v49 = vld [vmem:[#allocation2 + $0x44] sm:$0xf0] }
 0x171   :  { %v2402_v7 = vpop.f32.mrf.mxu1  ;;  %v2684_v48 = vpop.f32.mrf.mxu0 }
 0x172   :  { %v2588_v63 = vpop.f32.mrf.mxu3  ;;  %v2403_v29 = vadd.f32 %v2402_v7, %v6692_v15  ;;  %v6822_v55 = vpop.f32.mrf.mxu2 }
 0x173   :  { %v2589_v34 = vadd.f32 %v2588_v63, %v2495_v47 }
 0x174   :  { %v2497_v45 = vadd.f32 %v6792_v23, %v2403_v29 }
 0x175   :  { %v6819_v46 = vadd.f32 %v2682_v5, %v2589_v34  ;;  %v5643_v5 = vor.u32 %v6314_v13, %v5640_v40  ;;  %v6140_v34 = vld [vmem:[#allocation2 + $0x118] sm:$0xf0]  ;;  %v4824_v13 = vld [vmem:[#allocation2 + $0x4c] sm:$0xf0] }
 0x176   :  { %v4927_v38 = vor.u32 %v6140_v34, %v4926_v21 }
 0x179   :  { %v2405_v15 = vpop.f32.mrf.mxu1  ;;  %v2687_v47 = vpop.f32.mrf.mxu0 }
 0x17a   :  { %v2590_v35 = vpop.f32.mrf.mxu3  ;;  %v2406_v59 = vadd.f32 %v2405_v15, %v6700_v30  ;;  %v6828_v63 = vpop.f32.mrf.mxu2 }
 0x17b   :  { %v2591_v12 = vadd.f32 %v2590_v35, %v2497_v45 }
 0x17c   :  { %2444 = vmatmul.bf16.gmra.mxu1 %v5635_v56  ;;  %2726 = vmatmul.bf16.gmra.mxu0 %v5647_v57  ;;  %v2500_v26 = vadd.f32 %v6798_v43, %v2406_v59  ;;  %v4830_v43 = vld [vmem:[#allocation2 + $0x20] sm:$0xf] }
 0x17d   :  { %v6825_v23 = vadd.f32 %v2684_v48, %v2591_v12  ;;  %v6107_v48 = vld [vmem:[#allocation2 + $0x14] sm:$0xf]  ;;  %v4831_v57 = vor.u32 %v6115_v14, %v4830_v43  ;;  %v6120_v43 = vld [vmem:[#allocation2 + $0x7c] sm:$0xf]  ;;  %v4868_v14 = vld [vmem:[#allocation2 + $0xac] sm:$0xf0] }
 0x17e   :  { %v4819_v56 = vor.u32 %v6107_v48, %v4816_v49 }
 0x17f   :  { %2632 = vmatmul.bf16.gmra.mxu3 %v5643_v5  ;;  %2844 = vmatmul.bf16.gmra.mxu2 %v4927_v38 }
 0x181   :  { %v2407_v27 = vpop.f32.mrf.mxu1  ;;  %v2689_v29 = vpop.f32.mrf.mxu0 }
 0x182   :  { %v2593_v28 = vpop.f32.mrf.mxu3  ;;  %v2408_v45 = vadd.f32 %v2407_v27, %v6708_v41  ;;  %v6834_v40 = vpop.f32.mrf.mxu2  ;;  %v4827_v41 = vor.u32 %v6108_v52, %v4824_v13  ;;  %v6153_v27 = vld [vmem:[#allocation2 + $0x180] sm:$0xf0]  ;;  %v4882_v52 = vld [vmem:[#allocation2 + $0x88] sm:$0xf]  ;;  %v6128_v13 = vld [vmem:[#allocation2 + $0xb8] sm:$0xf0] }
 0x183   :  { %v2594_v7 = vadd.f32 %v2593_v28, %v2500_v26  ;;  %v6412_v26 = vld [vmem:[#allocation5 + $0x2b0] sm:$0xff] }
 0x184   :  { %v2502_v30 = vadd.f32 %v6804_v19, %v2408_v45  ;;  %v6420_v28 = vld [vmem:[#allocation5 + $0x2f0] sm:$0xff]  ;;  %3203 = vmatpush.bf16.msrb.mxu2 %v6412_v26 }
 0x185   :  { %v6831_v42 = vadd.f32 %v2687_v47, %v2594_v7  ;;  %3297 = vmatpush.bf16.msrb.mxu3 %v6420_v28  ;;  %v4978_v7 = vld [vmem:[#allocation2 + $0x150] sm:$0xf] }
 0x189   :  { %v2410_v15 = vpop.f32.mrf.mxu1  ;;  %v2692_v5 = vpop.f32.mrf.mxu0 }
 0x18a   :  { %v2595_v35 = vpop.f32.mrf.mxu3  ;;  %v2411_v47 = vadd.f32 %v2410_v15, %v6716_v1  ;;  %v6840_v21 = vpop.f32.mrf.mxu2  ;;  %v6404_v1 = vld [vmem:[#allocation5 + $0x270] sm:$0xff]  ;;  %v4871_v15 = vor.u32 %v6120_v43, %v4868_v14  ;;  %v6426_v43 = vld [vmem:[#allocation5 + $0x320] sm:$0xff]  ;;  %v6133_v14 = vld [vmem:[#allocation2 + $0xe4] sm:$0xf] }
 0x18b   :  { %v2596_v12 = vadd.f32 %v2595_v35, %v2502_v30  ;;  %3109 = vmatpush.bf16.msrb.mxu1 %v6404_v1  ;;  %v6121_v35 = vld [vmem:[#allocation2 + $0x84] sm:$0xf]  ;;  %3393 = vmatpush.bf16.msrb.mxu0 %v6426_v43 }
 0x18c   :  { %2740 = vmatmul.bf16.vlgmr.msra.gmra.mxu1 %v4819_v56  ;;  %3022 = vmatmul.bf16.vlgmr.msra.gmra.mxu0 %v4831_v57  ;;  %v2505_v19 = vadd.f32 %v6810_v33, %v2411_v47  ;;  %v4876_v56 = vld [vmem:[#allocation2 + $0xb4] sm:$0xf0] }
 0x18d   :  { %v6837_v59 = vadd.f32 %v2689_v29, %v2596_v12  ;;  %v4979_v29 = vor.u32 %v6153_v27, %v4978_v7  ;;  %v4879_v26 = vor.u32 %v6121_v35, %v4876_v56  ;;  %v5030_v27 = vld [vmem:[#allocation2 + $0x1b8] sm:$0xf]  ;;  %v6134_v35 = vld [vmem:[#allocation2 + $0xec] sm:$0xf]  ;;  %v4928_v56 = vld [vmem:[#allocation2 + $0x11c] sm:$0xf0] }
 0x18f   :  { %2928 = vmatmul.bf16.vlgmr.msra.gmra.mxu3 %v4827_v41  ;;  %2849 = vmatmul.bf16.gmra.mxu2 %v4979_v29  ;;  %v4883_v41 = vor.u32 %v6128_v13, %v4882_v52  ;;  %v4934_v52 = vld [vmem:[#allocation2 + $0xf0] sm:$0xf]  ;;  %v6141_v13 = vld [vmem:[#allocation2 + $0x120] sm:$0xf0] }
 0x191   :  { %v2412_v45 = vpop.f32.mrf.mxu1  ;;  %v2694_v30 = vpop.f32.mrf.mxu0 }
 0x192   :  { %v2598_v34 = vpop.f32.mrf.mxu3  ;;  %v2413_v48 = vadd.f32 %v2412_v45, %v6724_v16  ;;  %v6846_v57 = vpop.f32.mrf.mxu2 }
 0x193   :  { %v2599_v38 = vadd.f32 %v2598_v34, %v2505_v19 }
 0x194   :  { %v2507_v33 = vadd.f32 %v6816_v20, %v2413_v48 }
 0x195   :  { %v6843_v49 = vadd.f32 %v2692_v5, %v2599_v38  ;;  %v6166_v38 = vld [vmem:[#allocation2 + $0x1e8] sm:$0xf0] }
 0x196   :  { %v5031_v48 = vor.u32 %v6166_v38, %v5030_v27 }
 0x199   :  { %v2415_v19 = vpop.f32.mrf.mxu1  ;;  %v2697_v16 = vpop.f32.mrf.mxu0 }
 0x19a   :  { %v2600_v12 = vpop.f32.mrf.mxu3  ;;  %v2416_v5 = vadd.f32 %v2415_v19, %v6662_v37  ;;  %v6852_v34 = vpop.f32.mrf.mxu2 }
 0x19b   :  { %v2601_v47 = vadd.f32 %v2600_v12, %v2507_v33 }
 0x19c   :  { %2745 = vmatmul.bf16.gmra.mxu1 %v4871_v15  ;;  %3027 = vmatmul.bf16.gmra.mxu0 %v4883_v41  ;;  %v2510_v20 = vadd.f32 %v6822_v55, %v2416_v5  ;;  %v4920_v55 = vld [vmem:[#allocation2 + $0x114] sm:$0xf0] }
 0x19d   :  { %v6849_v28 = vadd.f32 %v2694_v30, %v2601_v47  ;;  %v4923_v41 = vor.u32 %v6133_v14, %v4920_v55  ;;  %v4935_v47 = vor.u32 %v6141_v13, %v4934_v52  ;;  %v6146_v52 = vld [vmem:[#allocation2 + $0x14c] sm:$0xf]  ;;  %v4972_v13 = vld [vmem:[#allocation2 + $0x17c] sm:$0xf0] }
 0x19f   :  { %2933 = vmatmul.bf16.gmra.mxu3 %v4879_v26  ;;  %2854 = vmatmul.bf16.gmra.mxu2 %v5031_v48 }
 0x1a1   :  { %v2417_v1 = vpop.f32.mrf.mxu1  ;;  %v2699_v29 = vpop.f32.mrf.mxu0 }
 0x1a2   :  { %v2603_v7 = vpop.f32.mrf.mxu3  ;;  %v2418_v33 = vadd.f32 %v2417_v1, %v6670_v50  ;;  %v6858_v12 = vpop.f32.mrf.mxu2  ;;  %v6179_v1 = vld [vmem:[#allocation2 + $0x250] sm:$0xf0] }
 0x1a3   :  { %v2604_v45 = vadd.f32 %v2603_v7, %v2510_v20  ;;  %v6411_v7 = vld [vmem:[#allocation5 + $0x2a8] sm:$0xff] }
 0x1a4   :  { %v2512_v30 = vadd.f32 %v6828_v63, %v2418_v33  ;;  %3204 = vmatpush.bf16.msrb.mxu2 %v6411_v7 }
 0x1a5   :  { %v6855_v37 = vadd.f32 %v2697_v16, %v2604_v45  ;;  %v4931_v16 = vor.u32 %v6134_v35, %v4928_v56  ;;  %v5082_v45 = vld [vmem:[#allocation2 + $0x220] sm:$0xf]  ;;  %v4986_v35 = vld [vmem:[#allocation2 + $0x158] sm:$0xf]  ;;  %v6154_v56 = vld [vmem:[#allocation2 + $0x188] sm:$0xf0] }
 0x1a6   :  { %v5083_v14 = vor.u32 %v6179_v1, %v5082_v45 }
 0x1a9   :  { %v2420_v50 = vpop.f32.mrf.mxu1  ;;  %v2702_v26 = vpop.f32.mrf.mxu0 }
 0x1aa   :  { %v2605_v15 = vpop.f32.mrf.mxu3  ;;  %v2421_v5 = vadd.f32 %v2420_v50, %v6678_v0  ;;  %v6864_v27 = vpop.f32.mrf.mxu2  ;;  %v4975_v50 = vor.u32 %v6146_v52, %v4972_v13  ;;  %v5024_v13 = vld [vmem:[#allocation2 + $0x1e4] sm:$0xf0] }
 0x1ab   :  { %v2606_v19 = vadd.f32 %v2605_v15, %v2512_v30  ;;  %v6419_v30 = vld [vmem:[#allocation5 + $0x2e8] sm:$0xff] }
 0x1ac   :  { %2750 = vmatmul.bf16.gmra.mxu1 %v4923_v41  ;;  %3032 = vmatmul.bf16.gmra.mxu0 %v4935_v47  ;;  %v2515_v20 = vadd.f32 %v6834_v40, %v2421_v5  ;;  %v6147_v15 = vld [vmem:[#allocation2 + $0x154] sm:$0xf]  ;;  %v4980_v41 = vld [vmem:[#allocation2 + $0x184] sm:$0xf0] }
 0x1ad   :  { %v6861_v63 = vadd.f32 %v2699_v29, %v2606_v19  ;;  %v6403_v29 = vld [vmem:[#allocation5 + $0x268] sm:$0xff]  ;;  %3298 = vmatpush.bf16.msrb.mxu3 %v6419_v30 }
 0x1ae   :  { %3110 = vmatpush.bf16.msrb.mxu1 %v6403_v29 }
 0x1af   :  { %2938 = vmatmul.bf16.gmra.mxu3 %v4931_v16  ;;  %2859 = vmatmul.bf16.gmra.mxu2 %v5083_v14  ;;  %v4987_v16 = vor.u32 %v6154_v56, %v4986_v35  ;;  %v6167_v35 = vld [vmem:[#allocation2 + $0x1f0] sm:$0xf0]  ;;  %v6160_v56 = vld [vmem:[#allocation2 + $0x1bc] sm:$0xf] }
 0x1b1   :  { %v2422_v33 = vpop.f32.mrf.mxu1  ;;  %v2704_v43 = vpop.f32.mrf.mxu0 }
 0x1b2   :  { %v2608_v38 = vpop.f32.mrf.mxu3  ;;  %v2423_v0 = vadd.f32 %v2422_v33, %v6686_v10  ;;  %v6870_v47 = vpop.f32.mrf.mxu2  ;;  %v6192_v33 = vld [vmem:[#allocation2 + $0x2b8] sm:$0xf0] }
 0x1b3   :  { %v2609_v48 = vadd.f32 %v2608_v38, %v2515_v20 }
 0x1b4   :  { %v2517_v40 = vadd.f32 %v6840_v21, %v2423_v0 }
 0x1b5   :  { %v6867_v55 = vadd.f32 %v2702_v26, %v2609_v48  ;;  %v4983_v26 = vor.u32 %v6147_v15, %v4980_v41  ;;  %v5134_v48 = vld [vmem:[#allocation2 + $0x288] sm:$0xf]  ;;  %v5032_v15 = vld [vmem:[#allocation2 + $0x1ec] sm:$0xf0] }
 0x1b6   :  { %v5135_v29 = vor.u32 %v6192_v33, %v5134_v48  ;;  %v5186_v48 = vld [vmem:[#allocation2 + $0x2f0] sm:$0xf]  ;;  %v6205_v33 = vld [vmem:[#allocation2 + $0x320] sm:$0xf0] }
 0x1b9   :  { %v2425_v5 = vpop.f32.mrf.mxu1  ;;  %v2707_v20 = vpop.f32.mrf.mxu0 }
 0x1ba   :  { %v2610_v19 = vpop.f32.mrf.mxu3  ;;  %v2426_v7 = vadd.f32 %v2425_v5, %v6656_v31  ;;  %v6876_v45 = vpop.f32.mrf.mxu2 }
 0x1bb   :  { %v2611_v10 = vadd.f32 %v2610_v19, %v2517_v40 }
 0x1bc   :  { %2755 = vmatmul.bf16.gmra.mxu1 %v4975_v50  ;;  %3037 = vmatmul.bf16.gmra.mxu0 %v4987_v16  ;;  %v2520_v38 = vadd.f32 %v6846_v57, %v2426_v7  ;;  %v5038_v57 = vld [vmem:[#allocation2 + $0x1c0] sm:$0xf] }
 0x1bd   :  { %v6873_v21 = vadd.f32 %v2704_v43, %v2611_v10  ;;  %v6159_v43 = vld [vmem:[#allocation2 + $0x1b4] sm:$0xf]  ;;  %v5039_v16 = vor.u32 %v6167_v35, %v5038_v57  ;;  %v6172_v35 = vld [vmem:[#allocation2 + $0x21c] sm:$0xf] }
 0x1be   :  { %v5027_v50 = vor.u32 %v6159_v43, %v5024_v13  ;;  %v5187_v43 = vor.u32 %v6205_v33, %v5186_v48  ;;  %v6402_v13 = vld [vmem:[#allocation5 + $0x260] sm:$0xff] }
 0x1bf   :  { %2943 = vmatmul.bf16.gmra.mxu3 %v4983_v26  ;;  %2864 = vmatmul.bf16.gmra.mxu2 %v5135_v29 }
 0x1c0   :  { %3111 = vmatpush.bf16.msrb.mxu1 %v6402_v13 }
 0x1c1   :  { %v2427_v14 = vpop.f32.mrf.mxu1  ;;  %v2709_v0 = vpop.f32.mrf.mxu0 }
 0x1c2   :  { %v2613_v1 = vpop.f32.mrf.mxu3  ;;  %v2428_v40 = vadd.f32 %v2427_v14, %v6664_v44  ;;  %v6882_v41 = vpop.f32.mrf.mxu2  ;;  %v5035_v44 = vor.u32 %v6160_v56, %v5032_v15  ;;  %v5076_v56 = vld [vmem:[#allocation2 + $0x24c] sm:$0xf0]  ;;  %v5090_v15 = vld [vmem:[#allocation2 + $0x228] sm:$0xf] }
 0x1c3   :  { %v2614_v30 = vadd.f32 %v2613_v1, %v2520_v38 }
 0x1c4   :  { %v2522_v31 = vadd.f32 %v6852_v34, %v2428_v40  ;;  %v6425_v40 = vld [vmem:[#allocation5 + $0x318] sm:$0xff] }
 0x1c5   :  { %v6879_v52 = vadd.f32 %v2707_v20, %v2614_v30  ;;  %3394 = vmatpush.bf16.msrb.mxu0 %v6425_v40  ;;  %v5238_v40 = vld [vmem:[#allocation2 + $0x358] sm:$0xf] }
 0x1c9   :  { %v2430_v5 = vpop.f32.mrf.mxu1  ;;  %v2712_v26 = vpop.f32.mrf.mxu0 }
 0x1ca   :  { %v2615_v19 = vpop.f32.mrf.mxu3  ;;  %v2431_v20 = vadd.f32 %v2430_v5, %v6672_v51  ;;  %v6888_v38 = vpop.f32.mrf.mxu2  ;;  %v5079_v5 = vor.u32 %v6172_v35, %v5076_v56  ;;  %v5128_v56 = vld [vmem:[#allocation2 + $0x2b4] sm:$0xf0] }
 0x1cb   :  { %v2616_v10 = vadd.f32 %v2615_v19, %v2522_v31  ;;  %v6410_v31 = vld [vmem:[#allocation5 + $0x2a0] sm:$0xff]  ;;  %v6180_v19 = vld [vmem:[#allocation2 + $0x258] sm:$0xf0] }
 0x1cc   :  { %2760 = vmatmul.bf16.gmra.mxu1 %v5027_v50  ;;  %3042 = vmatmul.bf16.gmra.mxu0 %v5039_v16  ;;  %v2525_v34 = vadd.f32 %v6858_v12, %v2431_v20  ;;  %v6173_v50 = vld [vmem:[#allocation2 + $0x224] sm:$0xf]  ;;  %v5084_v16 = vld [vmem:[#allocation2 + $0x254] sm:$0xf0] }
 0x1cd   :  { %v6885_v7 = vadd.f32 %v2709_v0, %v2616_v10  ;;  %v6418_v0 = vld [vmem:[#allocation5 + $0x2e0] sm:$0xff]  ;;  %3205 = vmatpush.bf16.msrb.mxu2 %v6410_v31 }
 0x1ce   :  { %3299 = vmatpush.bf16.msrb.mxu3 %v6418_v0  ;;  %v6218_v31 = vld [vmem:[#allocation2 + $0x388] sm:$0xf0] }
 0x1cf   :  { %2948 = vmatmul.bf16.gmra.mxu3 %v5035_v44  ;;  %2869 = vmatmul.bf16.gmra.mxu2 %v5187_v43  ;;  %v5091_v44 = vor.u32 %v6180_v19, %v5090_v15  ;;  %v5239_v13 = vor.u32 %v6218_v31, %v5238_v40  ;;  %v6193_v15 = vld [vmem:[#allocation2 + $0x2c0] sm:$0xf0]  ;;  %v6186_v19 = vld [vmem:[#allocation2 + $0x28c] sm:$0xf]  ;;  %v5290_v40 = vld [vmem:[#allocation2 + $0x3c0] sm:$0xf] }
 0x1d0   :  { %v6231_v31 = vld [vmem:[#allocation2 + $0x3f0] sm:$0xf0] }
 0x1d1   :  { %v2432_v14 = vpop.f32.mrf.mxu1  ;;  %v2714_v29 = vpop.f32.mrf.mxu0 }
 0x1d2   :  { %v2618_v1 = vpop.f32.mrf.mxu3  ;;  %v2433_v51 = vadd.f32 %v2432_v14, %v6680_v3  ;;  %v6894_v10 = vpop.f32.mrf.mxu2 }
 0x1d3   :  { %v2619_v30 = vadd.f32 %v2618_v1, %v2525_v34  ;;  %v5087_v1 = vor.u32 %v6173_v50, %v5084_v16  ;;  %v5136_v50 = vld [vmem:[#allocation2 + $0x2bc] sm:$0xf0] }
 0x1d4   :  { %v2527_v12 = vadd.f32 %v6864_v27, %v2433_v51 }
 0x1d5   :  { %v6891_v57 = vadd.f32 %v2712_v26, %v2619_v30 }
 0x1d9   :  { %v2435_v34 = vpop.f32.mrf.mxu1  ;;  %v2717_v26 = vpop.f32.mrf.mxu0 }
 0x1da   :  { %v2620_v3 = vpop.f32.mrf.mxu3  ;;  %v2436_v27 = vadd.f32 %v2435_v34, %v6688_v11  ;;  %v6900_v30 = vpop.f32.mrf.mxu2 }
 0x1db   :  { %v2621_v20 = vadd.f32 %v2620_v3, %v2527_v12 }
 0x1dc   :  { %2765 = vmatmul.bf16.gmra.mxu1 %v5079_v5  ;;  %3047 = vmatmul.bf16.gmra.mxu0 %v5091_v44  ;;  %v2530_v33 = vadd.f32 %v6870_v47, %v2436_v27  ;;  %v5142_v47 = vld [vmem:[#allocation2 + $0x290] sm:$0xf] }
 0x1dd   :  { %v6897_v48 = vadd.f32 %v2714_v29, %v2621_v20  ;;  %v6185_v29 = vld [vmem:[#allocation2 + $0x284] sm:$0xf]  ;;  %v5143_v44 = vor.u32 %v6193_v15, %v5142_v47  ;;  %v5180_v15 = vld [vmem:[#allocation2 + $0x31c] sm:$0xf0] }
 0x1de   :  { %v5131_v5 = vor.u32 %v6185_v29, %v5128_v56  ;;  %v6409_v29 = vld [vmem:[#allocation5 + $0x298] sm:$0xff] }
 0x1df   :  { %2953 = vmatmul.bf16.gmra.mxu3 %v5087_v1  ;;  %2874 = vmatmul.bf16.gmra.mxu2 %v5239_v13 }
 0x1e0   :  { %3206 = vmatpush.bf16.msrb.mxu2 %v6409_v29 }
 0x1e1   :  { %v2437_v51 = vpop.f32.mrf.mxu1  ;;  %v2719_v0 = vpop.f32.mrf.mxu0 }
 0x1e2   :  { %v2623_v14 = vpop.f32.mrf.mxu3  ;;  %v2438_v12 = vadd.f32 %v2437_v51, %v6696_v24  ;;  %v6906_v16 = vpop.f32.mrf.mxu2  ;;  %v5139_v24 = vor.u32 %v6186_v19, %v5136_v50  ;;  %v5194_v19 = vld [vmem:[#allocation2 + $0x2f8] sm:$0xf]  ;;  %v6206_v50 = vld [vmem:[#allocation2 + $0x328] sm:$0xf0] }
 0x1e3   :  { %v2624_v43 = vadd.f32 %v2623_v14, %v2530_v33 }
 0x1e4   :  { %v2532_v11 = vadd.f32 %v6876_v45, %v2438_v12  ;;  %v5291_v12 = vor.u32 %v6231_v31, %v5290_v40  ;;  %v6424_v31 = vld [vmem:[#allocation5 + $0x310] sm:$0xff] }
 0x1e5   :  { %v6903_v35 = vadd.f32 %v2717_v26, %v2624_v43  ;;  %3395 = vmatpush.bf16.msrb.mxu0 %v6424_v31 }
 0x1e9   :  { %v2440_v34 = vpop.f32.mrf.mxu1  ;;  %v2722_v1 = vpop.f32.mrf.mxu0 }
 0x1ea   :  { %v2625_v3 = vpop.f32.mrf.mxu3  ;;  %v2441_v26 = vadd.f32 %v2440_v34, %v6704_v36  ;;  %v6912_v33 = vpop.f32.mrf.mxu2  ;;  %v6417_v36 = vld [vmem:[#allocation5 + $0x2d8] sm:$0xff]  ;;  %v5195_v34 = vor.u32 %v6206_v50, %v5194_v19  ;;  %v6219_v50 = vld [vmem:[#allocation2 + $0x390] sm:$0xf0] }
 0x1eb   :  { %v2626_v20 = vadd.f32 %v2625_v3, %v2532_v11  ;;  %3300 = vmatpush.bf16.msrb.mxu3 %v6417_v36  ;;  %v6199_v3 = vld [vmem:[#allocation2 + $0x2f4] sm:$0xf]  ;;  %v5246_v19 = vld [vmem:[#allocation2 + $0x360] sm:$0xf] }
 0x1ec   :  { %2770 = vmatmul.bf16.gmra.mxu1 %v5131_v5  ;;  %3052 = vmatmul.bf16.gmra.mxu0 %v5143_v44  ;;  %v2535_v45 = vadd.f32 %v6882_v41, %v2441_v26  ;;  %v6198_v41 = vld [vmem:[#allocation2 + $0x2ec] sm:$0xf]  ;;  %v5188_v5 = vld [vmem:[#allocation2 + $0x324] sm:$0xf0] }
 0x1ed   :  { %v6909_v27 = vadd.f32 %v2719_v0, %v2626_v20  ;;  %v6401_v0 = vld [vmem:[#allocation5 + $0x258] sm:$0xff]  ;;  %v5183_v20 = vor.u32 %v6198_v41, %v5180_v15  ;;  %v6211_v15 = vld [vmem:[#allocation2 + $0x354] sm:$0xf] }
 0x1ee   :  { %3112 = vmatpush.bf16.msrb.mxu1 %v6401_v0 }
 0x1ef   :  { %2958 = vmatmul.bf16.gmra.mxu3 %v5139_v24  ;;  %2879 = vmatmul.bf16.gmra.mxu2 %v5291_v12  ;;  %v5342_v12 = vld [vmem:[#allocation2 + $0x428] sm:$0xf] }
 0x1f1   :  { %v2442_v51 = vpop.f32.mrf.mxu1  ;;  %v2724_v13 = vpop.f32.mrf.mxu0 }
 0x1f2   :  { %v2628_v14 = vpop.f32.mrf.mxu3  ;;  %v2443_v11 = vadd.f32 %v2442_v51, %v6712_v60  ;;  %v6918_v44 = vpop.f32.mrf.mxu2 }
 0x1f3   :  { %v2629_v43 = vadd.f32 %v2628_v14, %v2535_v45  ;;  %v5191_v45 = vor.u32 %v6199_v3, %v5188_v5  ;;  %v6212_v3 = vld [vmem:[#allocation2 + $0x35c] sm:$0xf]  ;;  %v5240_v5 = vld [vmem:[#allocation2 + $0x38c] sm:$0xf0] }
 0x1f4   :  { %v2537_v47 = vadd.f32 %v6888_v38, %v2443_v11  ;;  %v6244_v11 = vld [vmem:[#allocation2 + $0x458] sm:$0xf0] }
 0x1f5   :  { %v6915_v56 = vadd.f32 %v2722_v1, %v2629_v43 }
 0x1f9   :  { %v2445_v1 = vpop.f32.mrf.mxu1  ;;  %v2727_v26 = vpop.f32.mrf.mxu0 }
 0x1fa   :  { %v2630_v60 = vpop.f32.mrf.mxu3  ;;  %v2446_v38 = vadd.f32 %v2445_v1, %v6720_v8  ;;  %v6924_v43 = vpop.f32.mrf.mxu2 }
 0x1fb   :  { %v2631_v24 = vadd.f32 %v2630_v60, %v2537_v47  ;;  %v5343_v47 = vor.u32 %v6244_v11, %v5342_v12  ;;  %v5394_v12 = vld [vmem:[#allocation2 + $0x490] sm:$0xf]  ;;  %v6257_v11 = vld [vmem:[#allocation2 + $0x4c0] sm:$0xf0] }
 0x1fc   :  { %2775 = vmatmul.bf16.gmra.mxu1 %v5183_v20  ;;  %3057 = vmatmul.bf16.gmra.mxu0 %v5195_v34  ;;  %v2540_v40 = vadd.f32 %v6894_v10, %v2446_v38  ;;  %v5232_v10 = vld [vmem:[#allocation2 + $0x384] sm:$0xf0] }
 0x1fd   :  { %v6921_v14 = vadd.f32 %v2724_v13, %v2631_v24  ;;  %v5235_v34 = vor.u32 %v6211_v15, %v5232_v10  ;;  %v5247_v24 = vor.u32 %v6219_v50, %v5246_v19  ;;  %v6408_v15 = vld [vmem:[#allocation5 + $0x290] sm:$0xff]  ;;  %v5298_v50 = vld [vmem:[#allocation2 + $0x3c8] sm:$0xf] }
 0x1fe   :  { %v6224_v19 = vld [vmem:[#allocation2 + $0x3bc] sm:$0xf]  ;;  %3207 = vmatpush.bf16.msrb.mxu2 %v6408_v15 }
 0x1ff   :  { %2963 = vmatmul.bf16.gmra.mxu3 %v5191_v45  ;;  %2884 = vmatmul.bf16.gmra.mxu2 %v5343_v47 }
 0x201   :  { %v2447_v36 = vpop.f32.mrf.mxu1  ;;  %v2729_v0 = vpop.f32.mrf.mxu0 }
 0x202   :  { %v2633_v51 = vpop.f32.mrf.mxu3  ;;  %v2448_v8 = vadd.f32 %v2447_v36, %v6728_v32  ;;  %v6930_v60 = vpop.f32.mrf.mxu2  ;;  %v5243_v32 = vor.u32 %v6212_v3, %v5240_v5  ;;  %v6232_v3 = vld [vmem:[#allocation2 + $0x3f8] sm:$0xf0]  ;;  %v6225_v5 = vld [vmem:[#allocation2 + $0x3c4] sm:$0xf] }
 0x203   :  { %v2634_v29 = vadd.f32 %v2633_v51, %v2540_v40 }
 0x204   :  { %v2542_v41 = vadd.f32 %v6900_v30, %v2448_v8  ;;  %v5395_v8 = vor.u32 %v6257_v11, %v5394_v12 }
 0x205   :  { %v6927_v13 = vadd.f32 %v2727_v26, %v2634_v29 }
 0x209   :  { %v2741_v45 = vpop.f32.mrf.mxu1  ;;  %v3023_v38 = vpop.f32.mrf.mxu0 }
 0x20a   :  { %v2635_v20 = vpop.f32.mrf.mxu3  ;;  %v2742_v26 = vadd.f32 %v2741_v45, %v6735_v17  ;;  %v6936_v31 = vpop.f32.mrf.mxu2  ;;  %v6416_v17 = vld [vmem:[#allocation5 + $0x2d0] sm:$0xff] }
 0x20b   :  { %v2636_v1 = vadd.f32 %v2635_v20, %v2542_v41  ;;  %3301 = vmatpush.bf16.msrb.mxu3 %v6416_v17  ;;  %v5292_v20 = vld [vmem:[#allocation2 + $0x3f4] sm:$0xf0] }
 0x20c   :  { %2780 = vmatmul.bf16.gmra.mxu1 %v5235_v34  ;;  %3062 = vmatmul.bf16.gmra.mxu0 %v5247_v24  ;;  %v2836_v30 = vadd.f32 %v6906_v16, %v2742_v26  ;;  %v5284_v16 = vld [vmem:[#allocation2 + $0x3ec] sm:$0xf0]  ;;  %v5295_v26 = vor.u32 %v6225_v5, %v5292_v20  ;;  %v6238_v5 = vld [vmem:[#allocation2 + $0x42c] sm:$0xf]  ;;  %v5344_v20 = vld [vmem:[#allocation2 + $0x45c] sm:$0xf0] }
 0x20d   :  { %v6933_v40 = vadd.f32 %v2729_v0, %v2636_v1  ;;  %v5287_v1 = vor.u32 %v6224_v19, %v5284_v16  ;;  %v6237_v16 = vld [vmem:[#allocation2 + $0x424] sm:$0xf] }
 0x20f   :  { %2968 = vmatmul.bf16.gmra.mxu3 %v5243_v32  ;;  %2889 = vmatmul.bf16.gmra.mxu2 %v5395_v8  ;;  %v6270_v8 = vld [vmem:[#allocation2 + $0x528] sm:$0xf0] }
 0x211   :  { %v2743_v36 = vpop.f32.mrf.mxu1  ;;  %v3025_v47 = vpop.f32.mrf.mxu0 }
 0x212   :  { %v2929_v51 = vpop.f32.mrf.mxu3  ;;  %v2744_v41 = vadd.f32 %v2743_v36, %v6741_v53  ;;  %v6942_v34 = vpop.f32.mrf.mxu2  ;;  %v5299_v53 = vor.u32 %v6232_v3, %v5298_v50  ;;  %v5446_v36 = vld [vmem:[#allocation2 + $0x4f8] sm:$0xf]  ;;  %v6245_v3 = vld [vmem:[#allocation2 + $0x460] sm:$0xf0] }
 0x213   :  { %v2930_v29 = vadd.f32 %v2929_v51, %v2836_v30  ;;  %v6400_v30 = vld [vmem:[#allocation5 + $0x250] sm:$0xff] }
 0x214   :  { %v2838_v10 = vadd.f32 %v6912_v33, %v2744_v41  ;;  %3113 = vmatpush.bf16.msrb.mxu1 %v6400_v30  ;;  %v5336_v50 = vld [vmem:[#allocation2 + $0x454] sm:$0xf0] }
 0x215   :  { %v6939_v0 = vadd.f32 %v3023_v38, %v2930_v29 }
 0x219   :  { %v2746_v32 = vpop.f32.mrf.mxu1  ;;  %v3028_v38 = vpop.f32.mrf.mxu0 }
 0x21a   :  { %v2931_v24 = vpop.f32.mrf.mxu3  ;;  %v2747_v33 = vadd.f32 %v2746_v32, %v6747_v62  ;;  %v6948_v11 = vpop.f32.mrf.mxu2 }
 0x21b   :  { %v2932_v45 = vadd.f32 %v2931_v24, %v2838_v10  ;;  %v5447_v10 = vor.u32 %v6270_v8, %v5446_v36  ;;  %v5498_v8 = vld [vmem:[#allocation2 + $0x560] sm:$0xf] }
 0x21c   :  { %2785 = vmatmul.bf16.gmra.mxu1 %v5287_v1  ;;  %3067 = vmatmul.bf16.gmra.mxu0 %v5299_v53  ;;  %v2841_v12 = vadd.f32 %v6918_v44, %v2747_v33  ;;  %v5350_v44 = vld [vmem:[#allocation2 + $0x430] sm:$0xf]  ;;  %v5339_v53 = vor.u32 %v6237_v16, %v5336_v50 }
 0x21d   :  { %v6945_v51 = vadd.f32 %v3025_v47, %v2932_v45  ;;  %v5351_v45 = vor.u32 %v6245_v3, %v5350_v44  ;;  %v6423_v33 = vld [vmem:[#allocation5 + $0x308] sm:$0xff]  ;;  %v6250_v44 = vld [vmem:[#allocation2 + $0x48c] sm:$0xf]  ;;  %v5402_v3 = vld [vmem:[#allocation2 + $0x498] sm:$0xf] }
 0x21e   :  { %3396 = vmatpush.bf16.msrb.mxu0 %v6423_v33  ;;  %v6407_v16 = vld [vmem:[#allocation5 + $0x288] sm:$0xff] }
 0x21f   :  { %2973 = vmatmul.bf16.gmra.mxu3 %v5295_v26  ;;  %2894 = vmatmul.bf16.gmra.mxu2 %v5447_v10  ;;  %v6415_v33 = vld [vmem:[#allocation5 + $0x2c8] sm:$0xff] }
 0x220   :  { %3208 = vmatpush.bf16.msrb.mxu2 %v6407_v16  ;;  %3302 = vmatpush.bf16.msrb.mxu3 %v6415_v33 }
 0x221   :  { %v2748_v15 = vpop.f32.mrf.mxu1  ;;  %v3030_v17 = vpop.f32.mrf.mxu0 }
 0x222   :  { %v2934_v29 = vpop.f32.mrf.mxu3  ;;  %v2749_v19 = vadd.f32 %v2748_v15, %v6753_v54  ;;  %v6954_v24 = vpop.f32.mrf.mxu2  ;;  %v5347_v54 = vor.u32 %v6238_v5, %v5344_v20  ;;  %v6258_v5 = vld [vmem:[#allocation2 + $0x4c8] sm:$0xf0]  ;;  %v6251_v20 = vld [vmem:[#allocation2 + $0x494] sm:$0xf] }
 0x223   :  { %v2935_v41 = vadd.f32 %v2934_v29, %v2841_v12 }
 0x224   :  { %v2843_v47 = vadd.f32 %v6924_v43, %v2749_v19 }
 0x225   :  { %v6951_v62 = vadd.f32 %v3028_v38, %v2935_v41  ;;  %v6283_v41 = vld [vmem:[#allocation2 + $0x590] sm:$0xf0] }
 0x229   :  { %v2751_v26 = vpop.f32.mrf.mxu1  ;;  %v3033_v30 = vpop.f32.mrf.mxu0 }
 0x22a   :  { %v2936_v1 = vpop.f32.mrf.mxu3  ;;  %v2752_v38 = vadd.f32 %v2751_v26, %v6759_v6  ;;  %v6960_v29 = vpop.f32.mrf.mxu2  ;;  %v5403_v26 = vor.u32 %v6258_v5, %v5402_v3  ;;  %v6263_v3 = vld [vmem:[#allocation2 + $0x4f4] sm:$0xf]  ;;  %v5454_v5 = vld [vmem:[#allocation2 + $0x500] sm:$0xf] }
 0x22b   :  { %v2937_v32 = vadd.f32 %v2936_v1, %v2843_v47  ;;  %v5499_v47 = vor.u32 %v6283_v41, %v5498_v8  ;;  %v5396_v1 = vld [vmem:[#allocation2 + $0x4c4] sm:$0xf0] }
 0x22c   :  { %2790 = vmatmul.bf16.gmra.mxu1 %v5339_v53  ;;  %3072 = vmatmul.bf16.gmra.mxu0 %v5351_v45  ;;  %v2846_v12 = vadd.f32 %v6930_v60, %v2752_v38  ;;  %v5388_v60 = vld [vmem:[#allocation2 + $0x4bc] sm:$0xf0] }
 0x22d   :  { %v6957_v43 = vadd.f32 %v3030_v17, %v2937_v32  ;;  %v5391_v32 = vor.u32 %v6250_v44, %v5388_v60 }
 0x22f   :  { %2978 = vmatmul.bf16.gmra.mxu3 %v5347_v54  ;;  %2899 = vmatmul.bf16.gmra.mxu2 %v5499_v47  ;;  %v6296_v47 = vld [vmem:[#allocation2 + $0x5f8] sm:$0xf0] }
 0x231   :  { %v2753_v10 = vpop.f32.mrf.mxu1  ;;  %v3035_v19 = vpop.f32.mrf.mxu0 }
 0x232   :  { %v2939_v36 = vpop.f32.mrf.mxu3  ;;  %v2754_v6 = vadd.f32 %v2753_v10, %v6765_v61  ;;  %v6966_v53 = vpop.f32.mrf.mxu2  ;;  %v5550_v10 = vld [vmem:[#allocation2 + $0x5c8] sm:$0xf] }
 0x233   :  { %v2940_v15 = vadd.f32 %v2939_v36, %v2846_v12  ;;  %v6399_v12 = vld [vmem:[#allocation5 + $0x248] sm:$0xff]  ;;  %v5551_v44 = vor.u32 %v6296_v47, %v5550_v10  ;;  %v6309_v47 = vld [vmem:[#allocation2 + $0x660] sm:$0xf0] }
 0x234   :  { %v2848_v50 = vadd.f32 %v6936_v31, %v2754_v6  ;;  %3114 = vmatpush.bf16.msrb.mxu1 %v6399_v12  ;;  %v5602_v10 = vld [vmem:[#allocation2 + $0x630] sm:$0xf] }
 0x235   :  { %v6963_v17 = vadd.f32 %v3033_v30, %v2940_v15  ;;  %v5399_v30 = vor.u32 %v6251_v20, %v5396_v1  ;;  %v6271_v20 = vld [vmem:[#allocation2 + $0x530] sm:$0xf0]  ;;  %v6264_v1 = vld [vmem:[#allocation2 + $0x4fc] sm:$0xf] }
 0x239   :  { %v2756_v61 = vpop.f32.mrf.mxu1  ;;  %v3038_v38 = vpop.f32.mrf.mxu0 }
 0x23a   :  { %v2941_v45 = vpop.f32.mrf.mxu3  ;;  %v2757_v31 = vadd.f32 %v2756_v61, %v6771_v18  ;;  %v6972_v41 = vpop.f32.mrf.mxu2  ;;  %v5455_v61 = vor.u32 %v6271_v20, %v5454_v5  ;;  %v6284_v5 = vld [vmem:[#allocation2 + $0x598] sm:$0xf0]  ;;  %v6277_v20 = vld [vmem:[#allocation2 + $0x564] sm:$0xf] }
 0x23b   :  { %v2942_v54 = vadd.f32 %v2941_v45, %v2848_v50  ;;  %v5448_v45 = vld [vmem:[#allocation2 + $0x52c] sm:$0xf0] }
 0x23c   :  { %2795 = vmatmul.bf16.gmra.mxu1 %v5391_v32  ;;  %3077 = vmatmul.bf16.gmra.mxu0 %v5403_v26  ;;  %v2851_v8 = vadd.f32 %v6942_v34, %v2757_v31  ;;  %v5440_v34 = vld [vmem:[#allocation2 + $0x524] sm:$0xf0] }
 0x23d   :  { %v6969_v36 = vadd.f32 %v3035_v19, %v2942_v54  ;;  %v5443_v54 = vor.u32 %v6263_v3, %v5440_v34  ;;  %v5492_v34 = vld [vmem:[#allocation2 + $0x58c] sm:$0xf0] }
 0x23f   :  { %2983 = vmatmul.bf16.gmra.mxu3 %v5399_v30  ;;  %2904 = vmatmul.bf16.gmra.mxu2 %v5551_v44 }
 0x241   :  { %v2758_v16 = vpop.f32.mrf.mxu1  ;;  %v3040_v50 = vpop.f32.mrf.mxu0 }
 0x242   :  { %v2944_v15 = vpop.f32.mrf.mxu3  ;;  %v2759_v18 = vadd.f32 %v2758_v16, %v6777_v2  ;;  %v6978_v32 = vpop.f32.mrf.mxu2  ;;  %v5451_v2 = vor.u32 %v6264_v1, %v5448_v45  ;;  %v5500_v1 = vld [vmem:[#allocation2 + $0x594] sm:$0xf0] }
 0x243   :  { %v2945_v6 = vadd.f32 %v2944_v15, %v2851_v8 }
 0x244   :  { %v2853_v19 = vadd.f32 %v6948_v11, %v2759_v18  ;;  %v5603_v18 = vor.u32 %v6309_v47, %v5602_v10  ;;  %v6398_v47 = vld [vmem:[#allocation5 + $0x240] sm:$0xff] }
 0x245   :  { %v6975_v60 = vadd.f32 %v3038_v38, %v2945_v6  ;;  %3115 = vmatpush.bf16.msrb.mxu1 %v6398_v47 }
 0x249   :  { %v2761_v33 = vpop.f32.mrf.mxu1  ;;  %v3043_v31 = vpop.f32.mrf.mxu0 }
 0x24a   :  { %v2946_v26 = vpop.f32.mrf.mxu3  ;;  %v2762_v38 = vadd.f32 %v2761_v33, %v6783_v25  ;;  %v6984_v8 = vpop.f32.mrf.mxu2 }
 0x24b   :  { %v2947_v30 = vadd.f32 %v2946_v26, %v2853_v19 }
 0x24c   :  { %2800 = vmatmul.bf16.gmra.mxu1 %v5443_v54  ;;  %3082 = vmatmul.bf16.gmra.mxu0 %v5455_v61  ;;  %v2856_v11 = vadd.f32 %v6954_v24, %v2762_v38  ;;  %v5506_v24 = vld [vmem:[#allocation2 + $0x568] sm:$0xf] }
 0x24d   :  { %v6981_v12 = vadd.f32 %v3040_v50, %v2947_v30  ;;  %v6276_v50 = vld [vmem:[#allocation2 + $0x55c] sm:$0xf]  ;;  %v5507_v61 = vor.u32 %v6284_v5, %v5506_v24  ;;  %v6406_v38 = vld [vmem:[#allocation5 + $0x280] sm:$0xff] }
 0x24e   :  { %v5495_v54 = vor.u32 %v6276_v50, %v5492_v34  ;;  %3209 = vmatpush.bf16.msrb.mxu2 %v6406_v38 }
 0x24f   :  { %2988 = vmatmul.bf16.gmra.mxu3 %v5451_v2  ;;  %2909 = vmatmul.bf16.gmra.mxu2 %v5603_v18  ;;  %v5654_v18 = vld [vmem:[#allocation2 + $0x698] sm:$0xf] }
 0x251   :  { %v2763_v16 = vpop.f32.mrf.mxu1  ;;  %v3045_v44 = vpop.f32.mrf.mxu0 }
 0x252   :  { %v2949_v15 = vpop.f32.mrf.mxu3  ;;  %v2764_v19 = vadd.f32 %v2763_v16, %v6789_v58  ;;  %v6990_v45 = vpop.f32.mrf.mxu2  ;;  %v5503_v58 = vor.u32 %v6277_v20, %v5500_v1  ;;  %v5544_v20 = vld [vmem:[#allocation2 + $0x5f4] sm:$0xf0]  ;;  %v5558_v1 = vld [vmem:[#allocation2 + $0x5d0] sm:$0xf] }
 0x253   :  { %v2950_v6 = vadd.f32 %v2949_v15, %v2856_v11  ;;  %v6414_v11 = vld [vmem:[#allocation5 + $0x2c0] sm:$0xff] }
 0x254   :  { %v2858_v25 = vadd.f32 %v6960_v29, %v2764_v19  ;;  %3303 = vmatpush.bf16.msrb.mxu3 %v6414_v11  ;;  %v6322_v19 = vld [vmem:[#allocation2 + $0x6c8] sm:$0xf0] }
 0x255   :  { %v6987_v3 = vadd.f32 %v3043_v31, %v2950_v6  ;;  %v6422_v31 = vld [vmem:[#allocation5 + $0x300] sm:$0xff]  ;;  %v5655_v34 = vor.u32 %v6322_v19, %v5654_v18  ;;  %v6116_v19 = vld [vmem:[#allocation2 + $0x58] sm:$0xf0] }
 0x256   :  { %3397 = vmatpush.bf16.msrb.mxu0 %v6422_v31  ;;  %v4838_v18 = vld [vmem:[#allocation2 + $0x28] sm:$0xf] }
 0x259   :  { %v2766_v33 = vpop.f32.mrf.mxu1  ;;  %v3048_v2 = vpop.f32.mrf.mxu0 }
 0x25a   :  { %v2951_v26 = vpop.f32.mrf.mxu3  ;;  %v2767_v29 = vadd.f32 %v2766_v33, %v6795_v39  ;;  %v6996_v6 = vpop.f32.mrf.mxu2 }
 0x25b   :  { %v2952_v30 = vadd.f32 %v2951_v26, %v2858_v25  ;;  %v6297_v26 = vld [vmem:[#allocation2 + $0x600] sm:$0xf0] }
 0x25c   :  { %2805 = vmatmul.bf16.gmra.mxu1 %v5495_v54  ;;  %3087 = vmatmul.bf16.gmra.mxu0 %v5507_v61  ;;  %v2861_v10 = vadd.f32 %v6966_v53, %v2767_v29  ;;  %v6289_v53 = vld [vmem:[#allocation2 + $0x5c4] sm:$0xf]  ;;  %v6290_v54 = vld [vmem:[#allocation2 + $0x5cc] sm:$0xf]  ;;  %v5552_v61 = vld [vmem:[#allocation2 + $0x5fc] sm:$0xf0]  ;;  %v5559_v31 = vor.u32 %v6297_v26, %v5558_v1 }
 0x25d   :  { %v6993_v15 = vadd.f32 %v3045_v44, %v2952_v30  ;;  %v6310_v1 = vld [vmem:[#allocation2 + $0x668] sm:$0xf0]  ;;  %v6303_v26 = vld [vmem:[#allocation2 + $0x634] sm:$0xf] }
 0x25f   :  { %2993 = vmatmul.bf16.gmra.mxu3 %v5503_v58  ;;  %2914 = vmatmul.bf16.gmra.mxu2 %v5655_v34  ;;  %v5547_v58 = vor.u32 %v6289_v53, %v5544_v20  ;;  %v5596_v20 = vld [vmem:[#allocation2 + $0x65c] sm:$0xf0] }
 0x261   :  { %v2768_v39 = vpop.f32.mrf.mxu1  ;;  %v3050_v50 = vpop.f32.mrf.mxu0 }
 0x262   :  { %v2954_v16 = vpop.f32.mrf.mxu3  ;;  %v2769_v44 = vadd.f32 %v2768_v39, %v6801_v4  ;;  %v7002_v30 = vpop.f32.mrf.mxu2  ;;  %v5555_v4 = vor.u32 %v6290_v54, %v5552_v61  ;;  %v5604_v54 = vld [vmem:[#allocation2 + $0x664] sm:$0xf0] }
 0x263   :  { %v2955_v25 = vadd.f32 %v2954_v16, %v2861_v10 }
 0x264   :  { %v2863_v5 = vadd.f32 %v6972_v41, %v2769_v44  ;;  %v4839_v44 = vor.u32 %v6116_v19, %v4838_v18  ;;  %v4890_v18 = vld [vmem:[#allocation2 + $0x90] sm:$0xf]  ;;  %v6129_v19 = vld [vmem:[#allocation2 + $0xc0] sm:$0xf0] }
 0x265   :  { %v6999_v24 = vadd.f32 %v3048_v2, %v2955_v25 }
 0x269   :  { %v2771_v29 = vpop.f32.mrf.mxu1  ;;  %v3053_v11 = vpop.f32.mrf.mxu0 }
 0x26a   :  { %v2956_v33 = vpop.f32.mrf.mxu3  ;;  %v2772_v2 = vadd.f32 %v2771_v29, %v6807_v22  ;;  %v7008_v47 = vpop.f32.mrf.mxu2 }
 0x26b   :  { %v2957_v38 = vadd.f32 %v2956_v33, %v2863_v5 }
 0x26c   :  { %2810 = vmatmul.bf16.gmra.mxu1 %v5547_v58  ;;  %3092 = vmatmul.bf16.gmra.mxu0 %v5559_v31  ;;  %v2866_v41 = vadd.f32 %v6978_v32, %v2772_v2  ;;  %v5610_v32 = vld [vmem:[#allocation2 + $0x638] sm:$0xf] }
 0x26d   :  { %v7005_v10 = vadd.f32 %v3050_v50, %v2957_v38  ;;  %v6302_v50 = vld [vmem:[#allocation2 + $0x62c] sm:$0xf]  ;;  %v5611_v31 = vor.u32 %v6310_v1, %v5610_v32  ;;  %v6323_v32 = vld [vmem:[#allocation2 + $0x6d0] sm:$0xf0]  ;;  %v6316_v1 = vld [vmem:[#allocation2 + $0x69c] sm:$0xf] }
 0x26e   :  { %v5599_v58 = vor.u32 %v6302_v50, %v5596_v20  ;;  %v5648_v20 = vld [vmem:[#allocation2 + $0x6c4] sm:$0xf0] }
 0x26f   :  { %2998 = vmatmul.bf16.gmra.mxu3 %v5555_v4  ;;  %3210 = vmatmul.bf16.vlgmr.msrb.gmra.mxu2 %v4839_v44 }
 0x271   :  { %v2773_v39 = vpop.f32.mrf.mxu1  ;;  %v3055_v34 = vpop.f32.mrf.mxu0 }
 0x272   :  { %v2959_v16 = vpop.f32.mrf.mxu3  ;;  %v2774_v5 = vadd.f32 %v2773_v39, %v6813_v9  ;;  %v7014_v61 = vpop.f32.mrf.mxu2  ;;  %v5607_v9 = vor.u32 %v6303_v26, %v5604_v54  ;;  %v5656_v26 = vld [vmem:[#allocation2 + $0x6cc] sm:$0xf0] }
 0x273   :  { %v2960_v25 = vadd.f32 %v2959_v16, %v2866_v41 }
 0x274   :  { %v2868_v22 = vadd.f32 %v6984_v8, %v2774_v5  ;;  %v4891_v5 = vor.u32 %v6129_v19, %v4890_v18  ;;  %v4942_v18 = vld [vmem:[#allocation2 + $0xf8] sm:$0xf]  ;;  %v6142_v19 = vld [vmem:[#allocation2 + $0x128] sm:$0xf0] }
 0x275   :  { %v7011_v53 = vadd.f32 %v3053_v11, %v2960_v25 }
 0x279   :  { %v2776_v29 = vpop.f32.mrf.mxu1  ;;  %v3058_v4 = vpop.f32.mrf.mxu0 }
 0x27a   :  { %v2961_v33 = vpop.f32.mrf.mxu3  ;;  %v2777_v11 = vadd.f32 %v2776_v29, %v6819_v46  ;;  %v7020_v41 = vpop.f32.mrf.mxu2 }
 0x27b   :  { %v2962_v38 = vadd.f32 %v2961_v33, %v2868_v22 }
 0x27c   :  { %2815 = vmatmul.bf16.gmra.mxu1 %v5599_v58  ;;  %3097 = vmatmul.bf16.gmra.mxu0 %v5611_v31  ;;  %v2871_v8 = vadd.f32 %v6990_v45, %v2777_v11  ;;  %v5662_v45 = vld [vmem:[#allocation2 + $0x6a0] sm:$0xf] }
 0x27d   :  { %v7017_v2 = vadd.f32 %v3055_v34, %v2962_v38  ;;  %v6315_v34 = vld [vmem:[#allocation2 + $0x694] sm:$0xf]  ;;  %v5663_v31 = vor.u32 %v6323_v32, %v5662_v45  ;;  %v6117_v45 = vld [vmem:[#allocation2 + $0x60] sm:$0xf0]  ;;  %v6110_v32 = vld [vmem:[#allocation2 + $0x2c] sm:$0xf] }
 0x27e   :  { %v5651_v58 = vor.u32 %v6315_v34, %v5648_v20  ;;  %v4832_v20 = vld [vmem:[#allocation2 + $0x54] sm:$0xf0] }
 0x27f   :  { %3003 = vmatmul.bf16.gmra.mxu3 %v5607_v9  ;;  %3215 = vmatmul.bf16.gmra.mxu2 %v4891_v5 }
 0x281   :  { %v2778_v39 = vpop.f32.mrf.mxu1  ;;  %v3060_v44 = vpop.f32.mrf.mxu0 }
 0x282   :  { %v2964_v16 = vpop.f32.mrf.mxu3  ;;  %v2779_v22 = vadd.f32 %v2778_v39, %v6825_v23  ;;  %v7026_v54 = vpop.f32.mrf.mxu2  ;;  %v5659_v23 = vor.u32 %v6316_v1, %v5656_v26  ;;  %v4840_v1 = vld [vmem:[#allocation2 + $0x5c] sm:$0xf0] }
 0x283   :  { %v2965_v25 = vadd.f32 %v2964_v16, %v2871_v8 }
 0x284   :  { %v2873_v46 = vadd.f32 %v6996_v6, %v2779_v22  ;;  %v4943_v22 = vor.u32 %v6142_v19, %v4942_v18  ;;  %v4994_v18 = vld [vmem:[#allocation2 + $0x160] sm:$0xf]  ;;  %v6155_v19 = vld [vmem:[#allocation2 + $0x190] sm:$0xf0] }
 0x285   :  { %v7023_v50 = vadd.f32 %v3058_v4, %v2965_v25 }
 0x289   :  { %v2781_v29 = vpop.f32.mrf.mxu1  ;;  %v3063_v9 = vpop.f32.mrf.mxu0 }
 0x28a   :  { %v2966_v33 = vpop.f32.mrf.mxu3  ;;  %v2782_v4 = vadd.f32 %v2781_v29, %v6831_v42  ;;  %v7032_v8 = vpop.f32.mrf.mxu2 }
 0x28b   :  { %v2967_v38 = vadd.f32 %v2966_v33, %v2873_v46 }
 0x28c   :  { %2820 = vmatmul.bf16.gmra.mxu1 %v5651_v58  ;;  %3102 = vmatmul.bf16.gmra.mxu0 %v5663_v31  ;;  %v2876_v6 = vadd.f32 %v7002_v30, %v2782_v4  ;;  %v4846_v30 = vld [vmem:[#allocation2 + $0x30] sm:$0xf] }
 0x28d   :  { %v7029_v11 = vadd.f32 %v3060_v44, %v2967_v38  ;;  %v6109_v44 = vld [vmem:[#allocation2 + $0x24] sm:$0xf]  ;;  %v4847_v31 = vor.u32 %v6117_v45, %v4846_v30  ;;  %v6130_v30 = vld [vmem:[#allocation2 + $0xc8] sm:$0xf0]  ;;  %v6123_v45 = vld [vmem:[#allocation2 + $0x94] sm:$0xf] }
 0x28e   :  { %v4835_v58 = vor.u32 %v6109_v44, %v4832_v20  ;;  %v6122_v44 = vld [vmem:[#allocation2 + $0x8c] sm:$0xf]  ;;  %v4884_v20 = vld [vmem:[#allocation2 + $0xbc] sm:$0xf0] }
 0x28f   :  { %3008 = vmatmul.bf16.gmra.mxu3 %v5659_v23  ;;  %3220 = vmatmul.bf16.gmra.mxu2 %v4943_v22 }
 0x291   :  { %v2783_v39 = vpop.f32.mrf.mxu1  ;;  %v3065_v5 = vpop.f32.mrf.mxu0 }
 0x292   :  { %v2969_v16 = vpop.f32.mrf.mxu3  ;;  %v2784_v46 = vadd.f32 %v2783_v39, %v6837_v59  ;;  %v7038_v26 = vpop.f32.mrf.mxu2  ;;  %v4843_v59 = vor.u32 %v6110_v32, %v4840_v1  ;;  %v4892_v32 = vld [vmem:[#allocation2 + $0xc4] sm:$0xf0] }
 0x293   :  { %v2970_v25 = vadd.f32 %v2969_v16, %v2876_v6 }
 0x294   :  { %v2878_v42 = vadd.f32 %v7008_v47, %v2784_v46  ;;  %v4995_v46 = vor.u32 %v6155_v19, %v4994_v18  ;;  %v5046_v18 = vld [vmem:[#allocation2 + $0x1c8] sm:$0xf]  ;;  %v6168_v19 = vld [vmem:[#allocation2 + $0x1f8] sm:$0xf0] }
 0x295   :  { %v7035_v34 = vadd.f32 %v3063_v9, %v2970_v25 }
 0x299   :  { %v2786_v29 = vpop.f32.mrf.mxu1  ;;  %v3068_v23 = vpop.f32.mrf.mxu0 }
 0x29a   :  { %v2971_v33 = vpop.f32.mrf.mxu3  ;;  %v2787_v9 = vadd.f32 %v2786_v29, %v6843_v49  ;;  %v7045_v6 = vpop.f32.mrf.mxu2 }
 0x29b   :  { %v2972_v38 = vadd.f32 %v2971_v33, %v2878_v42 }
 0x29c   :  { %3116 = vmatmul.bf16.vlgmr.msrb.gmra.mxu1 %v4835_v58  ;;  %6088 = vmatmul.msk.bf16.vlgmr.msrb.gmra.mxu0 %vm2210_vm0, %v4847_v31  ;;  %v2881_v4 = vadd.f32 %v7014_v61, %v2787_v9  ;;  %v4898_v61 = vld [vmem:[#allocation2 + $0x98] sm:$0xf]  ;;  %v4887_v58 = vor.u32 %v6122_v44, %v4884_v20  ;;  %v6135_v44 = vld [vmem:[#allocation2 + $0xf4] sm:$0xf]  ;;  %v4936_v20 = vld [vmem:[#allocation2 + $0x124] sm:$0xf0] }
 0x29d   :  { %v7041_v47 = vadd.f32 %v3065_v5, %v2972_v38  ;;  %v4899_v31 = vor.u32 %v6130_v30, %v4898_v61  ;;  %v6143_v61 = vld [vmem:[#allocation2 + $0x130] sm:$0xf0]  ;;  %v6136_v30 = vld [vmem:[#allocation2 + $0xfc] sm:$0xf] }
 0x29f   :  { %3304 = vmatmul.bf16.vlgmr.msrb.gmra.mxu3 %v4843_v59  ;;  %3225 = vmatmul.bf16.gmra.mxu2 %v4995_v46 }
 0x2a1   :  { %v2788_v39 = vpop.f32.mrf.mxu1  ;;  %v3070_v22 = vpop.f32.mrf.mxu0 }
 0x2a2   :  { %v2974_v16 = vpop.f32.mrf.mxu3  ;;  %v2789_v42 = vadd.f32 %v2788_v39, %v6849_v28  ;;  %v7051_v1 = vpop.f32.mrf.mxu2  ;;  %v4895_v28 = vor.u32 %v6123_v45, %v4892_v32  ;;  %v4944_v45 = vld [vmem:[#allocation2 + $0x12c] sm:$0xf0] }
 0x2a3   :  { %v2975_v25 = vadd.f32 %v2974_v16, %v2881_v4 }
 0x2a4   :  { %v2883_v5 = vadd.f32 %v7020_v41, %v2789_v42  ;;  %v5047_v42 = vor.u32 %v6168_v19, %v5046_v18  ;;  %v5098_v18 = vld [vmem:[#allocation2 + $0x230] sm:$0xf]  ;;  %v6181_v19 = vld [vmem:[#allocation2 + $0x260] sm:$0xf0] }
 0x2a5   :  { %v7048_v49 = vadd.f32 %v3068_v23, %v2975_v25 }
 0x2a9   :  { %v2791_v29 = vpop.f32.mrf.mxu1  ;;  %v3073_v59 = vpop.f32.mrf.mxu0 }
 0x2aa   :  { %v2976_v33 = vpop.f32.mrf.mxu3  ;;  %v2792_v23 = vadd.f32 %v2791_v29, %v6855_v37  ;;  %v7058_v4 = vpop.f32.mrf.mxu2 }
 0x2ab   :  { %v2977_v38 = vadd.f32 %v2976_v33, %v2883_v5 }
 0x2ac   :  { %3121 = vmatmul.bf16.gmra.mxu1 %v4887_v58  ;;  %6089 = vmatmul.msk.bf16.gmra.mxu0 %vm2210_vm0, %v4899_v31  ;;  %v2886_v41 = vadd.f32 %v7026_v54, %v2792_v23  ;;  %v4950_v54 = vld [vmem:[#allocation2 + $0x100] sm:$0xf]  ;;  %v4939_v58 = vor.u32 %v6135_v44, %v4936_v20  ;;  %v6148_v44 = vld [vmem:[#allocation2 + $0x15c] sm:$0xf]  ;;  %v4988_v20 = vld [vmem:[#allocation2 + $0x18c] sm:$0xf0] }
 0x2ad   :  { %v7054_v9 = vadd.f32 %v3070_v22, %v2977_v38  ;;  %v4951_v31 = vor.u32 %v6143_v61, %v4950_v54  ;;  %v6156_v54 = vld [vmem:[#allocation2 + $0x198] sm:$0xf0]  ;;  %v6149_v61 = vld [vmem:[#allocation2 + $0x164] sm:$0xf] }
 0x2af   :  { %3309 = vmatmul.bf16.gmra.mxu3 %v4895_v28  ;;  %3230 = vmatmul.bf16.gmra.mxu2 %v5047_v42 }
 0x2b1   :  { %v2793_v39 = vpop.f32.mrf.mxu1  ;;  %v3075_v46 = vpop.f32.mrf.mxu0 }
 0x2b2   :  { %v2979_v16 = vpop.f32.mrf.mxu3  ;;  %v2794_v5 = vadd.f32 %v2793_v39, %v6861_v63  ;;  %v7064_v32 = vpop.f32.mrf.mxu2  ;;  %v4947_v63 = vor.u32 %v6136_v30, %v4944_v45  ;;  %v4996_v30 = vld [vmem:[#allocation2 + $0x194] sm:$0xf0] }
 0x2b3   :  { %v2980_v25 = vadd.f32 %v2979_v16, %v2886_v41 }
 0x2b4   :  { %v2888_v22 = vadd.f32 %v7032_v8, %v2794_v5  ;;  %v5099_v5 = vor.u32 %v6181_v19, %v5098_v18  ;;  %v5150_v18 = vld [vmem:[#allocation2 + $0x298] sm:$0xf]  ;;  %v6194_v19 = vld [vmem:[#allocation2 + $0x2c8] sm:$0xf0] }
 0x2b5   :  { %v7061_v37 = vadd.f32 %v3073_v59, %v2980_v25 }
 0x2b9   :  { %v2796_v29 = vpop.f32.mrf.mxu1  ;;  %v3078_v28 = vpop.f32.mrf.mxu0 }
 0x2ba   :  { %v2981_v33 = vpop.f32.mrf.mxu3  ;;  %v2797_v59 = vadd.f32 %v2796_v29, %v6867_v55  ;;  %v7071_v41 = vpop.f32.mrf.mxu2 }
 0x2bb   :  { %v2982_v38 = vadd.f32 %v2981_v33, %v2888_v22 }
 0x2bc   :  { %3126 = vmatmul.bf16.gmra.mxu1 %v4939_v58  ;;  %6090 = vmatmul.msk.bf16.gmra.mxu0 %vm2210_vm0, %v4951_v31  ;;  %v2891_v8 = vadd.f32 %v7038_v26, %v2797_v59  ;;  %v5002_v26 = vld [vmem:[#allocation2 + $0x168] sm:$0xf]  ;;  %v4991_v58 = vor.u32 %v6148_v44, %v4988_v20  ;;  %v6161_v44 = vld [vmem:[#allocation2 + $0x1c4] sm:$0xf]  ;;  %v5040_v20 = vld [vmem:[#allocation2 + $0x1f4] sm:$0xf0] }
 0x2bd   :  { %v7067_v23 = vadd.f32 %v3075_v46, %v2982_v38  ;;  %v5003_v31 = vor.u32 %v6156_v54, %v5002_v26  ;;  %v6169_v26 = vld [vmem:[#allocation2 + $0x200] sm:$0xf0]  ;;  %v6162_v54 = vld [vmem:[#allocation2 + $0x1cc] sm:$0xf] }
 0x2bf   :  { %3314 = vmatmul.bf16.gmra.mxu3 %v4947_v63  ;;  %3235 = vmatmul.bf16.gmra.mxu2 %v5099_v5 }
 0x2c1   :  { %v2798_v39 = vpop.f32.mrf.mxu1  ;;  %v3080_v42 = vpop.f32.mrf.mxu0 }
 0x2c2   :  { %v2984_v16 = vpop.f32.mrf.mxu3  ;;  %v2799_v22 = vadd.f32 %v2798_v39, %v6873_v21  ;;  %v7077_v45 = vpop.f32.mrf.mxu2  ;;  %v4999_v21 = vor.u32 %v6149_v61, %v4996_v30  ;;  %v5048_v61 = vld [vmem:[#allocation2 + $0x1fc] sm:$0xf0] }
 0x2c3   :  { %v2985_v25 = vadd.f32 %v2984_v16, %v2891_v8 }
 0x2c4   :  { %v2893_v46 = vadd.f32 %v7045_v6, %v2799_v22  ;;  %v5151_v22 = vor.u32 %v6194_v19, %v5150_v18  ;;  %v5202_v18 = vld [vmem:[#allocation2 + $0x300] sm:$0xf]  ;;  %v6207_v19 = vld [vmem:[#allocation2 + $0x330] sm:$0xf0] }
 0x2c5   :  { %v7074_v55 = vadd.f32 %v3078_v28, %v2985_v25 }
 0x2c9   :  { %v2801_v29 = vpop.f32.mrf.mxu1  ;;  %v3083_v63 = vpop.f32.mrf.mxu0 }
 0x2ca   :  { %v2986_v33 = vpop.f32.mrf.mxu3  ;;  %v2802_v28 = vadd.f32 %v2801_v29, %v6879_v52  ;;  %v7084_v8 = vpop.f32.mrf.mxu2 }
 0x2cb   :  { %v2987_v38 = vadd.f32 %v2986_v33, %v2893_v46 }
 0x2cc   :  { %3131 = vmatmul.bf16.gmra.mxu1 %v4991_v58  ;;  %6091 = vmatmul.msk.bf16.gmra.mxu0 %vm2210_vm0, %v5003_v31  ;;  %v2896_v6 = vadd.f32 %v7051_v1, %v2802_v28  ;;  %v5054_v1 = vld [vmem:[#allocation2 + $0x1d0] sm:$0xf]  ;;  %v5043_v58 = vor.u32 %v6161_v44, %v5040_v20  ;;  %v6174_v44 = vld [vmem:[#allocation2 + $0x22c] sm:$0xf]  ;;  %v5092_v20 = vld [vmem:[#allocation2 + $0x25c] sm:$0xf0] }
 0x2cd   :  { %v7080_v59 = vadd.f32 %v3080_v42, %v2987_v38  ;;  %v5055_v31 = vor.u32 %v6169_v26, %v5054_v1  ;;  %v6182_v1 = vld [vmem:[#allocation2 + $0x268] sm:$0xf0]  ;;  %v6175_v26 = vld [vmem:[#allocation2 + $0x234] sm:$0xf] }
 0x2cf   :  { %3319 = vmatmul.bf16.gmra.mxu3 %v4999_v21  ;;  %3240 = vmatmul.bf16.gmra.mxu2 %v5151_v22 }
 0x2d1   :  { %v2803_v39 = vpop.f32.mrf.mxu1  ;;  %v3085_v5 = vpop.f32.mrf.mxu0 }
 0x2d2   :  { %v2989_v16 = vpop.f32.mrf.mxu3  ;;  %v2804_v46 = vadd.f32 %v2803_v39, %v6885_v7  ;;  %v7090_v30 = vpop.f32.mrf.mxu2  ;;  %v5051_v7 = vor.u32 %v6162_v54, %v5048_v61  ;;  %v5100_v54 = vld [vmem:[#allocation2 + $0x264] sm:$0xf0] }
 0x2d3   :  { %v2990_v25 = vadd.f32 %v2989_v16, %v2896_v6 }
 0x2d4   :  { %v2898_v42 = vadd.f32 %v7058_v4, %v2804_v46  ;;  %v5203_v46 = vor.u32 %v6207_v19, %v5202_v18  ;;  %v5254_v18 = vld [vmem:[#allocation2 + $0x368] sm:$0xf]  ;;  %v6220_v19 = vld [vmem:[#allocation2 + $0x398] sm:$0xf0] }
 0x2d5   :  { %v7087_v52 = vadd.f32 %v3083_v63, %v2990_v25 }
 0x2d9   :  { %v2806_v29 = vpop.f32.mrf.mxu1  ;;  %v3088_v21 = vpop.f32.mrf.mxu0 }
 0x2da   :  { %v2991_v33 = vpop.f32.mrf.mxu3  ;;  %v2807_v63 = vadd.f32 %v2806_v29, %v6891_v57  ;;  %v7097_v6 = vpop.f32.mrf.mxu2 }
 0x2db   :  { %v2992_v38 = vadd.f32 %v2991_v33, %v2898_v42 }
 0x2dc   :  { %3136 = vmatmul.bf16.gmra.mxu1 %v5043_v58  ;;  %6092 = vmatmul.msk.bf16.gmra.mxu0 %vm2210_vm0, %v5055_v31  ;;  %v2901_v4 = vadd.f32 %v7064_v32, %v2807_v63  ;;  %v5106_v32 = vld [vmem:[#allocation2 + $0x238] sm:$0xf]  ;;  %v5095_v58 = vor.u32 %v6174_v44, %v5092_v20  ;;  %v6187_v44 = vld [vmem:[#allocation2 + $0x294] sm:$0xf]  ;;  %v5144_v20 = vld [vmem:[#allocation2 + $0x2c4] sm:$0xf0] }
 0x2dd   :  { %v7093_v28 = vadd.f32 %v3085_v5, %v2992_v38  ;;  %v5107_v31 = vor.u32 %v6182_v1, %v5106_v32  ;;  %v6195_v32 = vld [vmem:[#allocation2 + $0x2d0] sm:$0xf0]  ;;  %v6188_v1 = vld [vmem:[#allocation2 + $0x29c] sm:$0xf] }
 0x2df   :  { %3324 = vmatmul.bf16.gmra.mxu3 %v5051_v7  ;;  %3245 = vmatmul.bf16.gmra.mxu2 %v5203_v46 }
 0x2e1   :  { %v2808_v39 = vpop.f32.mrf.mxu1  ;;  %v3090_v22 = vpop.f32.mrf.mxu0 }
 0x2e2   :  { %v2994_v16 = vpop.f32.mrf.mxu3  ;;  %v2809_v42 = vadd.f32 %v2808_v39, %v6897_v48  ;;  %v7103_v61 = vpop.f32.mrf.mxu2  ;;  %v5103_v48 = vor.u32 %v6175_v26, %v5100_v54  ;;  %v5152_v26 = vld [vmem:[#allocation2 + $0x2cc] sm:$0xf0] }
 0x2e3   :  { %v2995_v25 = vadd.f32 %v2994_v16, %v2901_v4 }
 0x2e4   :  { %v2903_v5 = vadd.f32 %v7071_v41, %v2809_v42  ;;  %v5255_v42 = vor.u32 %v6220_v19, %v5254_v18  ;;  %v6233_v18 = vld [vmem:[#allocation2 + $0x400] sm:$0xf0] }
 0x2e5   :  { %v7100_v57 = vadd.f32 %v3088_v21, %v2995_v25 }
 0x2e9   :  { %v2811_v29 = vpop.f32.mrf.mxu1  ;;  %v3093_v7 = vpop.f32.mrf.mxu0 }
 0x2ea   :  { %v2996_v33 = vpop.f32.mrf.mxu3  ;;  %v2812_v21 = vadd.f32 %v2811_v29, %v6903_v35  ;;  %v7110_v16 = vpop.f32.mrf.mxu2 }
 0x2eb   :  { %v2997_v38 = vadd.f32 %v2996_v33, %v2903_v5  ;;  %v5147_v33 = vor.u32 %v6187_v44, %v5144_v20  ;;  %v5196_v20 = vld [vmem:[#allocation2 + $0x32c] sm:$0xf0] }
 0x2ec   :  { %3141 = vmatmul.bf16.gmra.mxu1 %v5095_v58  ;;  %6093 = vmatmul.msk.bf16.gmra.mxu0 %vm2210_vm0, %v5107_v31  ;;  %v2906_v41 = vadd.f32 %v7077_v45, %v2812_v21  ;;  %v5158_v45 = vld [vmem:[#allocation2 + $0x2a0] sm:$0xf] }
 0x2ed   :  { %v7106_v63 = vadd.f32 %v3090_v22, %v2997_v38  ;;  %v5159_v58 = vor.u32 %v6195_v32, %v5158_v45  ;;  %v6208_v45 = vld [vmem:[#allocation2 + $0x338] sm:$0xf0]  ;;  %v6201_v32 = vld [vmem:[#allocation2 + $0x304] sm:$0xf] }
 0x2ef   :  { %3329 = vmatmul.bf16.gmra.mxu3 %v5103_v48  ;;  %3250 = vmatmul.bf16.gmra.mxu2 %v5255_v42  ;;  %v5155_v48 = vor.u32 %v6188_v1, %v5152_v26  ;;  %v5204_v1 = vld [vmem:[#allocation2 + $0x334] sm:$0xf0] }
 0x2f1   :  { %v2813_v39 = vpop.f32.mrf.mxu1  ;;  %v3095_v46 = vpop.f32.mrf.mxu0 }
 0x2f2   :  { %v2999_v4 = vpop.f32.mrf.mxu3  ;;  %v2814_v5 = vadd.f32 %v2813_v39, %v6909_v27 }
 0x2f3   :  { %v3000_v25 = vadd.f32 %v2999_v4, %v2906_v41  ;;  %v5306_v4 = vld [vmem:[#allocation2 + $0x3d0] sm:$0xf] }
 0x2f4   :  { %v2908_v22 = vadd.f32 %v7084_v8, %v2814_v5  ;;  %v5307_v42 = vor.u32 %v6233_v18, %v5306_v4 }
 0x2f5   :  { %v7113_v35 = vadd.f32 %v3093_v7, %v3000_v25  ;;  %v7117_v7 = vpop.f32.mrf.mxu2 }
 0x2f9   :  { %v2816_v38 = vpop.f32.mrf.mxu1  ;;  %v3098_v29 = vpop.f32.mrf.mxu0 }
 0x2fa   :  { %v3001_v54 = vpop.f32.mrf.mxu3  ;;  %v2817_v27 = vadd.f32 %v2816_v38, %v6915_v56 }
 0x2fb   :  { %v3002_v31 = vadd.f32 %v3001_v54, %v2908_v22  ;;  %v6200_v22 = vld [vmem:[#allocation2 + $0x2fc] sm:$0xf] }
 0x2fc   :  { %3146 = vmatmul.bf16.gmra.mxu1 %v5147_v33  ;;  %6094 = vmatmul.msk.bf16.gmra.mxu0 %vm2210_vm0, %v5159_v58  ;;  %v2911_v8 = vadd.f32 %v7090_v30, %v2817_v27  ;;  %v5210_v30 = vld [vmem:[#allocation2 + $0x308] sm:$0xf]  ;;  %v5199_v54 = vor.u32 %v6200_v22, %v5196_v20  ;;  %v6221_v22 = vld [vmem:[#allocation2 + $0x3a0] sm:$0xf0]  ;;  %v5256_v20 = vld [vmem:[#allocation2 + $0x39c] sm:$0xf0] }
 0x2fd   :  { %v7119_v21 = vadd.f32 %v3095_v46, %v3002_v31  ;;  %v7127_v44 = vpop.f32.mrf.mxu2  ;;  %v5211_v33 = vor.u32 %v6208_v45, %v5210_v30  ;;  %v6246_v30 = vld [vmem:[#allocation2 + $0x468] sm:$0xf0] }
 0x2ff   :  { %3334 = vmatmul.bf16.gmra.mxu3 %v5155_v48  ;;  %3255 = vmatmul.bf16.gmra.mxu2 %v5307_v42  ;;  %v5248_v42 = vld [vmem:[#allocation2 + $0x394] sm:$0xf0] }
 0x301   :  { %v2818_v25 = vpop.f32.mrf.mxu1  ;;  %v3100_v39 = vpop.f32.mrf.mxu0 }
 0x302   :  { %v3004_v41 = vpop.f32.mrf.mxu3  ;;  %v2819_v5 = vadd.f32 %v2818_v25, %v6921_v14  ;;  %v5207_v14 = vor.u32 %v6201_v32, %v5204_v1 }
 0x303   :  { %v3005_v19 = vadd.f32 %v3004_v41, %v2911_v8 }
 0x304   :  { %v2913_v46 = vadd.f32 %v7097_v6, %v2819_v5  ;;  %v6214_v5 = vld [vmem:[#allocation2 + $0x36c] sm:$0xf] }
 0x305   :  { %v7124_v56 = vadd.f32 %v3098_v29, %v3005_v19  ;;  %v7134_v27 = vpop.f32.mrf.mxu2 }
 0x309   :  { %v2821_v31 = vpop.f32.mrf.mxu1  ;;  %v3103_v38 = vpop.f32.mrf.mxu0 }
 0x30a   :  { %v3006_v26 = vpop.f32.mrf.mxu3  ;;  %v2822_v29 = vadd.f32 %v2821_v31, %v6927_v13  ;;  %v5259_v31 = vor.u32 %v6214_v5, %v5256_v20  ;;  %v5314_v5 = vld [vmem:[#allocation2 + $0x3d8] sm:$0xf]  ;;  %v6259_v20 = vld [vmem:[#allocation2 + $0x4d0] sm:$0xf0] }
 0x30b   :  { %v3007_v58 = vadd.f32 %v3006_v26, %v2913_v46  ;;  %v5262_v46 = vld [vmem:[#allocation2 + $0x370] sm:$0xf] }
 0x30c   :  { %3151 = vmatmul.bf16.gmra.mxu1 %v5199_v54  ;;  %6095 = vmatmul.msk.bf16.gmra.mxu0 %vm2210_vm0, %v5211_v33  ;;  %v2916_v6 = vadd.f32 %v7103_v61, %v2822_v29  ;;  %v5358_v61 = vld [vmem:[#allocation2 + $0x438] sm:$0xf]  ;;  %v5263_v26 = vor.u32 %v6221_v22, %v5262_v46  ;;  %v5308_v46 = vld [vmem:[#allocation2 + $0x404] sm:$0xf0]  ;;  %v5410_v22 = vld [vmem:[#allocation2 + $0x4a0] sm:$0xf] }
 0x30d   :  { %v7130_v48 = vadd.f32 %v3100_v39, %v3007_v58  ;;  %v6213_v39 = vld [vmem:[#allocation2 + $0x364] sm:$0xf]  ;;  %v5359_v45 = vor.u32 %v6246_v30, %v5358_v61  ;;  %v7140_v54 = vpop.f32.mrf.mxu2  ;;  %v5411_v30 = vor.u32 %v6259_v20, %v5410_v22  ;;  %v5462_v22 = vld [vmem:[#allocation2 + $0x508] sm:$0xf]  ;;  %v6272_v20 = vld [vmem:[#allocation2 + $0x538] sm:$0xf0] }
 0x30e   :  { %v5251_v1 = vor.u32 %v6213_v39, %v5248_v42  ;;  %v6226_v39 = vld [vmem:[#allocation2 + $0x3cc] sm:$0xf]  ;;  %v6227_v42 = vld [vmem:[#allocation2 + $0x3d4] sm:$0xf] }
 0x30f   :  { %8189 = vst [vmem:[#allocation11_spill] sm:$0xff] %v7130_v48  ;;  %3339 = vmatmul.bf16.gmra.mxu3 %v5207_v14  ;;  %3260 = vmatmul.bf16.gmra.mxu2 %v5359_v45 }
 0x311   :  { %v2823_v4 = vpop.f32.mrf.mxu1  ;;  %v3105_v18 = vpop.f32.mrf.mxu0 }
 0x312   :  { %v3009_v8 = vpop.f32.mrf.mxu3  ;;  %v2824_v19 = vadd.f32 %v2823_v4, %v6933_v40 }
 0x313   :  { %v3010_v41 = vadd.f32 %v3009_v8, %v2916_v6 }
 0x314   :  { %v2918_v13 = vadd.f32 %v7110_v16, %v2824_v19 }
 0x315   :  { %v7137_v25 = vadd.f32 %v3103_v38, %v3010_v41  ;;  %v7147_v4 = vpop.f32.mrf.mxu2 }
 0x317   :  { %8190 = vst [vmem:[#allocation12_spill] sm:$0xff] %v7137_v25 }
 0x319   :  { %v3117_v40 = vpop.f32.mrf.mxu1  ;;  %v3399_v58 = vpop.f32.mrf.mxu0 }
 0x31a   :  { %v3011_v32 = vpop.f32.mrf.mxu3  ;;  %v3118_v16 = vadd.f32 %v3117_v40, %v6939_v0  ;;  %v5300_v0 = vld [vmem:[#allocation2 + $0x3fc] sm:$0xf0]  ;;  %v5311_v40 = vor.u32 %v6227_v42, %v5308_v46  ;;  %v6240_v42 = vld [vmem:[#allocation2 + $0x43c] sm:$0xf]  ;;  %v5360_v46 = vld [vmem:[#allocation2 + $0x46c] sm:$0xf0] }
 0x31b   :  { %v3012_v33 = vadd.f32 %v3011_v32, %v2918_v13  ;;  %v5303_v32 = vor.u32 %v6226_v39, %v5300_v0  ;;  %v6239_v39 = vld [vmem:[#allocation2 + $0x434] sm:$0xf]  ;;  %v5352_v0 = vld [vmem:[#allocation2 + $0x464] sm:$0xf0] }
 0x31c   :  { %3156 = vmatmul.bf16.gmra.mxu1 %v5251_v1  ;;  %6096 = vmatmul.msk.bf16.gmra.mxu0 %vm2210_vm0, %v5263_v26  ;;  %v3212_v14 = vadd.f32 %v7117_v7, %v3118_v16  ;;  %v6234_v7 = vld [vmem:[#allocation2 + $0x408] sm:$0xf0] }
 0x31d   :  { %v7143_v38 = vadd.f32 %v3105_v18, %v3012_v33  ;;  %v3223_v16 = vpop.f32.mrf.mxu2 }
 0x31f   :  { %8191 = vst [vmem:[#allocation13_spill] sm:$0xff] %v7143_v38  ;;  %3344 = vmatmul.bf16.gmra.mxu3 %v5259_v31  ;;  %3265 = vmatmul.bf16.gmra.mxu2 %v5411_v30  ;;  %v5463_v30 = vor.u32 %v6272_v20, %v5462_v22 }
 0x321   :  { %v3119_v8 = vpop.f32.mrf.mxu1  ;;  %v3401_v41 = vpop.f32.mrf.mxu0 }
 0x322   :  { %v3305_v29 = vpop.f32.mrf.mxu3  ;;  %v3120_v13 = vadd.f32 %v3119_v8, %v6945_v51  ;;  %v5315_v51 = vor.u32 %v6234_v7, %v5314_v5  ;;  %v5366_v5 = vld [vmem:[#allocation2 + $0x440] sm:$0xf]  ;;  %v6247_v7 = vld [vmem:[#allocation2 + $0x470] sm:$0xf0] }
 0x323   :  { %v3306_v6 = vadd.f32 %v3305_v29, %v3212_v14 }
 0x324   :  { %v3214_v61 = vadd.f32 %v7127_v44, %v3120_v13 }
 0x325   :  { %v7149_v19 = vadd.f32 %v3399_v58, %v3306_v6 }
 0x327   :  { %3484 = vadd.xlane.f32.xlu0 %v7149_v19  ;;  %v3552_v18 = vmul.f32 %v7149_v19, %v7149_v19 }
 0x329   :  { %3586 = vadd.xlane.f32.xlu1 %v3552_v18  ;;  %v3122_v26 = vpop.f32.mrf.mxu1  ;;  %v3404_v33 = vpop.f32.mrf.mxu0 }
 0x32a   :  { %v3307_v45 = vpop.f32.mrf.mxu3  ;;  %v3123_v31 = vadd.f32 %v3122_v26, %v6951_v62 }
 0x32b   :  { %v3308_v1 = vadd.f32 %v3307_v45, %v3214_v61 }
 0x32c   :  { %3161 = vmatmul.bf16.gmra.mxu1 %v5303_v32  ;;  %6097 = vmatmul.msk.bf16.gmra.mxu0 %vm2210_vm0, %v5315_v51  ;;  %v3217_v14 = vadd.f32 %v7134_v27, %v3123_v31  ;;  %v3226_v27 = vpop.f32.mrf.mxu2  ;;  %v5367_v32 = vor.u32 %v6247_v7, %v5366_v5  ;;  %v5412_v5 = vld [vmem:[#allocation2 + $0x4d4] sm:$0xf0]  ;;  %v5514_v7 = vld [vmem:[#allocation2 + $0x570] sm:$0xf] }
 0x32d   :  { %v7156_v58 = vadd.f32 %v3401_v41, %v3308_v1 }
 0x32f   :  { %3349 = vmatmul.bf16.gmra.mxu3 %v5311_v40  ;;  %3486 = vadd.xlane.f32.xlu0 %v7156_v58  ;;  %v3553_v44 = vmul.f32 %v7156_v58, %v7156_v58 }
 0x330   :  { %3270 = vmatmul.bf16.gmra.mxu2 %v5463_v30 }
 0x331   :  { %3588 = vadd.xlane.f32.xlu2 %v3553_v44  ;;  %v3124_v8 = vpop.f32.mrf.mxu1  ;;  %v3406_v41 = vpop.f32.mrf.mxu0 }
 0x332   :  { %v3310_v29 = vpop.f32.mrf.mxu3  ;;  %v3125_v62 = vadd.f32 %v3124_v8, %v6957_v43  ;;  %v5355_v43 = vor.u32 %v6239_v39, %v5352_v0  ;;  %v6252_v39 = vld [vmem:[#allocation2 + $0x49c] sm:$0xf]  ;;  %v5404_v0 = vld [vmem:[#allocation2 + $0x4cc] sm:$0xf0] }
 0x333   :  { %v3311_v6 = vadd.f32 %v3310_v29, %v3217_v14  ;;  %v5407_v30 = vor.u32 %v6252_v39, %v5404_v0  ;;  %v5456_v39 = vld [vmem:[#allocation2 + $0x534] sm:$0xf0] }
 0x334   :  { %v3219_v61 = vadd.f32 %v7140_v54, %v3125_v62  ;;  %v3228_v14 = vpop.f32.mrf.mxu2 }
 0x335   :  { %v7164_v13 = vadd.f32 %v3404_v33, %v3311_v6  ;;  %v5363_v33 = vor.u32 %v6240_v42, %v5360_v46  ;;  %v5418_v42 = vld [vmem:[#allocation2 + $0x4a8] sm:$0xf]  ;;  %v6285_v46 = vld [vmem:[#allocation2 + $0x5a0] sm:$0xf0] }
 0x336   :  { %v5515_v20 = vor.u32 %v6285_v46, %v5514_v7  ;;  %v5566_v7 = vld [vmem:[#allocation2 + $0x5d8] sm:$0xf]  ;;  %v6298_v46 = vld [vmem:[#allocation2 + $0x608] sm:$0xf0] }
 0x337   :  { %3488 = vadd.xlane.f32.xlu1 %v7164_v13  ;;  %v3554_v18 = vmul.f32 %v7164_v13, %v7164_v13 }
 0x339   :  { %3590 = vadd.xlane.f32.xlu0 %v3554_v18  ;;  %v3127_v1 = vpop.f32.mrf.mxu1  ;;  %v3409_v26 = vpop.f32.mrf.mxu0  ;;  %v6253_v18 = vld [vmem:[#allocation2 + $0x4a4] sm:$0xf] }
 0x33a   :  { %v3312_v45 = vpop.f32.mrf.mxu3  ;;  %v3128_v31 = vadd.f32 %v3127_v1, %v6963_v17 }
 0x33b   :  { %v3313_v51 = vadd.f32 %v3312_v45, %v3219_v61 }
 0x33c   :  { %3166 = vmatmul.bf16.gmra.mxu1 %v5355_v43  ;;  %6098 = vmatmul.msk.bf16.gmra.mxu0 %vm2210_vm0, %v5367_v32  ;;  %v3222_v54 = vadd.f32 %v7147_v4, %v3128_v31  ;;  %v6260_v4 = vld [vmem:[#allocation2 + $0x4d8] sm:$0xf0]  ;;  %v3231_v1 = vpop.f32.mrf.mxu2 }
 0x33d   :  { %v7171_v40 = vadd.f32 %v3406_v41, %v3313_v51  ;;  %v5419_v45 = vor.u32 %v6260_v4, %v5418_v42  ;;  %v5415_v51 = vor.u32 %v6253_v18, %v5412_v5  ;;  %v6266_v42 = vld [vmem:[#allocation2 + $0x50c] sm:$0xf]  ;;  %v5470_v4 = vld [vmem:[#allocation2 + $0x510] sm:$0xf]  ;;  %v6273_v5 = vld [vmem:[#allocation2 + $0x540] sm:$0xf0] }
 0x33f   :  { %3354 = vmatmul.bf16.gmra.mxu3 %v5363_v33  ;;  %3490 = vadd.xlane.f32.xlu1 %v7171_v40  ;;  %v3555_v17 = vmul.f32 %v7171_v40, %v7171_v40 }
 0x340   :  { %3275 = vmatmul.bf16.gmra.mxu2 %v5515_v20  ;;  %v5567_v20 = vor.u32 %v6298_v46, %v5566_v7  ;;  %v6311_v7 = vld [vmem:[#allocation2 + $0x670] sm:$0xf0] }
 0x341   :  { %v3129_v6 = vpop.f32.mrf.mxu1  ;;  %v3411_v8 = vpop.f32.mrf.mxu0 }
 0x342   :  { %v3315_v44 = vpop.f32.mrf.mxu3  ;;  %v3130_v41 = vadd.f32 %v3129_v6, %v6969_v36 }
 0x343   :  { %v3316_v29 = vadd.f32 %v3315_v44, %v3222_v54 }
 0x344   :  { %v3224_v22 = vadd.f32 %v3223_v16, %v3130_v41  ;;  %v3233_v0 = vpop.f32.mrf.mxu2 }
 0x345   :  { %v7177_v62 = vadd.f32 %v3409_v26, %v3316_v29 }
 0x347   :  { %3492 = vadd.xlane.f32.xlu2 %v7177_v62  ;;  %3592 = vadd.xlane.f32.xlu1 %v3555_v17  ;;  %v3556_v31 = vmul.f32 %v7177_v62, %v7177_v62  ;;  %v6265_v17 = vld [vmem:[#allocation2 + $0x504] sm:$0xf] }
 0x349   :  { %v3132_v43 = vpop.f32.mrf.mxu1  ;;  %v3414_v32 = vpop.f32.mrf.mxu0 }
 0x34a   :  { %v3317_v61 = vpop.f32.mrf.mxu3  ;;  %v3133_v33 = vadd.f32 %v3132_v43, %v6975_v60 }
 0x34b   :  { %v3318_v36 = vadd.f32 %v3317_v61, %v3224_v22  ;;  %v5459_v61 = vor.u32 %v6265_v17, %v5456_v39  ;;  %v5508_v17 = vld [vmem:[#allocation2 + $0x59c] sm:$0xf0] }
 0x34c   :  { %3171 = vmatmul.bf16.gmra.mxu1 %v5407_v30  ;;  %6099 = vmatmul.msk.bf16.gmra.mxu0 %vm2210_vm0, %v5419_v45  ;;  %v3227_v54 = vadd.f32 %v3226_v27, %v3133_v33  ;;  %v5464_v27 = vld [vmem:[#allocation2 + $0x53c] sm:$0xf0]  ;;  %v5471_v30 = vor.u32 %v6273_v5, %v5470_v4  ;;  %v6286_v4 = vld [vmem:[#allocation2 + $0x5a8] sm:$0xf0]  ;;  %v5516_v5 = vld [vmem:[#allocation2 + $0x5a4] sm:$0xf0] }
 0x34d   :  { %v7183_v26 = vadd.f32 %v3411_v8, %v3318_v36 }
 0x34f   :  { %8192 = vst [vmem:[#allocation14_spill] sm:$0xff] %v7183_v26  ;;  %3359 = vmatmul.bf16.gmra.mxu3 %v5415_v51  ;;  %3594 = vadd.xlane.f32.xlu2 %v3556_v31  ;;  %v3557_v16 = vmul.f32 %v7183_v26, %v7183_v26  ;;  %v3236_v31 = vpop.f32.mrf.mxu2 }
 0x350   :  { %3280 = vmatmul.bf16.gmra.mxu2 %v5567_v20 }
 0x351   :  { %3596 = vadd.xlane.f32.xlu0 %v3557_v16  ;;  %v3134_v6 = vpop.f32.mrf.mxu1  ;;  %v3416_v8 = vpop.f32.mrf.mxu0 }
 0x352   :  { %v3320_v44 = vpop.f32.mrf.mxu3  ;;  %v3135_v60 = vadd.f32 %v3134_v6, %v6981_v12 }
 0x353   :  { %v3321_v29 = vadd.f32 %v3320_v44, %v3227_v54 }
 0x354   :  { %v3229_v22 = vadd.f32 %v3228_v14, %v3135_v60  ;;  %v6278_v60 = vld [vmem:[#allocation2 + $0x56c] sm:$0xf] }
 0x355   :  { %v7191_v41 = vadd.f32 %v3414_v32, %v3321_v29  ;;  %v5467_v32 = vor.u32 %v6266_v42, %v5464_v27  ;;  %v5522_v42 = vld [vmem:[#allocation2 + $0x578] sm:$0xf]  ;;  %v5618_v27 = vld [vmem:[#allocation2 + $0x640] sm:$0xf]  ;;  %v5511_v20 = vor.u32 %v6278_v60, %v5508_v17  ;;  %v5560_v60 = vld [vmem:[#allocation2 + $0x604] sm:$0xf0] }
 0x356   :  { %v5619_v46 = vor.u32 %v6311_v7, %v5618_v27 }
 0x357   :  { %8193 = vst [vmem:[#allocation15_spill] sm:$0xff] %v7191_v41  ;;  %3494 = vadd.xlane.f32.xlu2 %v7183_v26  ;;  %v3558_v18 = vmul.f32 %v7191_v41, %v7191_v41 }
 0x359   :  { %3496 = vadd.xlane.f32.xlu0 %v7191_v41  ;;  %3598 = vadd.xlane.f32.xlu1 %v3558_v18  ;;  %v3137_v36 = vpop.f32.mrf.mxu1  ;;  %v3419_v43 = vpop.f32.mrf.mxu0  ;;  %v6279_v18 = vld [vmem:[#allocation2 + $0x574] sm:$0xf] }
 0x35a   :  { %v3322_v12 = vpop.f32.mrf.mxu3  ;;  %v3138_v33 = vadd.f32 %v3137_v36, %v6987_v3  ;;  %v5519_v36 = vor.u32 %v6279_v18, %v5516_v5  ;;  %v5574_v18 = vld [vmem:[#allocation2 + $0x5e0] sm:$0xf]  ;;  %v5670_v5 = vld [vmem:[#allocation2 + $0x6a8] sm:$0xf] }
 0x35b   :  { %v3323_v45 = vadd.f32 %v3322_v12, %v3229_v22  ;;  %v3238_v12 = vpop.f32.mrf.mxu2 }
 0x35c   :  { %3176 = vmatmul.bf16.gmra.mxu1 %v5459_v61  ;;  %6100 = vmatmul.msk.bf16.gmra.mxu0 %vm2210_vm0, %v5471_v30  ;;  %v3232_v16 = vadd.f32 %v3231_v1, %v3138_v33 }
 0x35d   :  { %v7198_v51 = vadd.f32 %v3416_v8, %v3323_v45 }
 0x35f   :  { %8194 = vst [vmem:[#allocation16_spill] sm:$0xff] %v7198_v51  ;;  %3364 = vmatmul.bf16.gmra.mxu3 %v5467_v32  ;;  %v3559_v14 = vmul.f32 %v7198_v51, %v7198_v51 }
 0x360   :  { %3285 = vmatmul.bf16.gmra.mxu2 %v5619_v46 }
 0x361   :  { %3600 = vadd.xlane.f32.xlu2 %v3559_v14  ;;  %3498 = vadd.xlane.f32.xlu1 %v7198_v51  ;;  %v3139_v29 = vpop.f32.mrf.mxu1  ;;  %v3421_v6 = vpop.f32.mrf.mxu0 }
 0x362   :  { %v3325_v54 = vpop.f32.mrf.mxu3  ;;  %v3140_v3 = vadd.f32 %v3139_v29, %v6993_v15  ;;  %v5523_v15 = vor.u32 %v6286_v4, %v5522_v42  ;;  %v6299_v42 = vld [vmem:[#allocation2 + $0x610] sm:$0xf0]  ;;  %v5568_v4 = vld [vmem:[#allocation2 + $0x60c] sm:$0xf0] }
 0x363   :  { %v3326_v44 = vadd.f32 %v3325_v54, %v3232_v16  ;;  %v3241_v29 = vpop.f32.mrf.mxu2 }
 0x364   :  { %v3234_v1 = vadd.f32 %v3233_v0, %v3140_v3  ;;  %v6291_v3 = vld [vmem:[#allocation2 + $0x5d4] sm:$0xf] }
 0x365   :  { %v7205_v8 = vadd.f32 %v3419_v43, %v3326_v44  ;;  %v5563_v46 = vor.u32 %v6291_v3, %v5560_v60  ;;  %v5612_v3 = vld [vmem:[#allocation2 + $0x66c] sm:$0xf0]  ;;  %v5626_v60 = vld [vmem:[#allocation2 + $0x648] sm:$0xf] }
 0x367   :  { %8195 = vst [vmem:[#allocation17_spill] sm:$0xff] %v7205_v8  ;;  %v3560_v39 = vmul.f32 %v7205_v8, %v7205_v8 }
 0x369   :  { %3500 = vadd.xlane.f32.xlu2 %v7205_v8  ;;  %3602 = vadd.xlane.f32.xlu0 %v3560_v39  ;;  %v3142_v30 = vpop.f32.mrf.mxu1  ;;  %v3424_v45 = vpop.f32.mrf.mxu0  ;;  %v6292_v39 = vld [vmem:[#allocation2 + $0x5dc] sm:$0xf] }
 0x36a   :  { %v3327_v22 = vpop.f32.mrf.mxu3  ;;  %v3143_v32 = vadd.f32 %v3142_v30, %v6999_v24 }
 0x36b   :  { %v3328_v61 = vadd.f32 %v3327_v22, %v3234_v1  ;;  %v5575_v22 = vor.u32 %v6299_v42, %v5574_v18  ;;  %v6305_v18 = vld [vmem:[#allocation2 + $0x644] sm:$0xf]  ;;  %v5620_v42 = vld [vmem:[#allocation2 + $0x674] sm:$0xf0] }
 0x36c   :  { %3181 = vmatmul.bf16.gmra.mxu1 %v5511_v20  ;;  %6101 = vmatmul.msk.bf16.gmra.mxu0 %vm2210_vm0, %v5523_v15  ;;  %v3237_v33 = vadd.f32 %v3236_v31, %v3143_v32  ;;  %v6324_v31 = vld [vmem:[#allocation2 + $0x6d8] sm:$0xf0] }
 0x36d   :  { %v7211_v43 = vadd.f32 %v3421_v6, %v3328_v61  ;;  %v5671_v7 = vor.u32 %v6324_v31, %v5670_v5  ;;  %v5571_v61 = vor.u32 %v6292_v39, %v5568_v4 }
 0x36f   :  { %8196 = vst [vmem:[#allocation18_spill] sm:$0xff] %v7211_v43  ;;  %3369 = vmatmul.bf16.gmra.mxu3 %v5519_v36  ;;  %v3561_v0 = vmul.f32 %v7211_v43, %v7211_v43  ;;  %v3243_v36 = vpop.f32.mrf.mxu2 }
 0x370   :  { %3290 = vmatmul.bf16.gmra.mxu2 %v5671_v7 }
 0x371   :  { %3502 = vadd.xlane.f32.xlu0 %v7211_v43  ;;  %3604 = vadd.xlane.f32.xlu1 %v3561_v0  ;;  %v3144_v54 = vpop.f32.mrf.mxu1  ;;  %v3426_v44 = vpop.f32.mrf.mxu0 }
 0x372   :  { %v3330_v14 = vpop.f32.mrf.mxu3  ;;  %v3145_v24 = vadd.f32 %v3144_v54, %v7005_v10 }
 0x373   :  { %v3331_v16 = vadd.f32 %v3330_v14, %v3237_v33 }
 0x374   :  { %v3239_v27 = vadd.f32 %v3238_v12, %v3145_v24 }
 0x375   :  { %v7218_v6 = vadd.f32 %v3424_v45, %v3331_v16 }
 0x377   :  { %8197 = vst [vmem:[#allocation19_spill] sm:$0xff] %v7218_v6  ;;  %v3562_v17 = vmul.f32 %v7218_v6, %v7218_v6  ;;  %v3246_v39 = vpop.f32.mrf.mxu2 }
 0x379   :  { %3606 = vadd.xlane.f32.xlu2 %v3562_v17  ;;  %3504 = vadd.xlane.f32.xlu1 %v7218_v6  ;;  %v3147_v20 = vpop.f32.mrf.mxu1  ;;  %v3429_v15 = vpop.f32.mrf.mxu0  ;;  %v6312_v17 = vld [vmem:[#allocation2 + $0x678] sm:$0xf0] }
 0x37a   :  { %v3332_v1 = vpop.f32.mrf.mxu3  ;;  %v3148_v45 = vadd.f32 %v3147_v20, %v7011_v53  ;;  %v5627_v31 = vor.u32 %v6312_v17, %v5626_v60 }
 0x37b   :  { %v3333_v10 = vadd.f32 %v3332_v1, %v3239_v27 }
 0x37c   :  { %3186 = vmatmul.bf16.gmra.mxu1 %v5563_v46  ;;  %6102 = vmatmul.msk.bf16.gmra.mxu0 %vm2210_vm0, %v5575_v22  ;;  %v3242_v32 = vadd.f32 %v3241_v29, %v3148_v45 }
 0x37d   :  { %v7224_v30 = vadd.f32 %v3426_v44, %v3333_v10  ;;  %v6304_v44 = vld [vmem:[#allocation2 + $0x63c] sm:$0xf] }
 0x37e   :  { %v5615_v5 = vor.u32 %v6304_v44, %v5612_v3  ;;  %v6318_v44 = vld [vmem:[#allocation2 + $0x6ac] sm:$0xf] }
 0x37f   :  { %8198 = vst [vmem:[#allocation20_spill] sm:$0xff] %v7224_v30  ;;  %3374 = vmatmul.bf16.gmra.mxu3 %v5571_v61  ;;  %v3563_v12 = vmul.f32 %v7224_v30, %v7224_v30 }
 0x381   :  { %3506 = vadd.xlane.f32.xlu2 %v7224_v30  ;;  %3608 = vadd.xlane.f32.xlu0 %v3563_v12  ;;  %v3149_v14 = vpop.f32.mrf.mxu1  ;;  %v3431_v16 = vpop.f32.mrf.mxu0 }
 0x382   :  { %v3335_v0 = vpop.f32.mrf.mxu3  ;;  %v3150_v53 = vadd.f32 %v3149_v14, %v7017_v2  ;;  %v5623_v2 = vor.u32 %v6305_v18, %v5620_v42  ;;  %v5664_v14 = vld [vmem:[#allocation2 + $0x6d4] sm:$0xf0] }
 0x383   :  { %v3336_v33 = vadd.f32 %v3335_v0, %v3242_v32  ;;  %v6317_v0 = vld [vmem:[#allocation2 + $0x6a4] sm:$0xf] }
 0x384   :  { %v3244_v29 = vadd.f32 %v3243_v36, %v3150_v53  ;;  %v6325_v53 = vld [vmem:[#allocation2 + $0x6e0] sm:$0xf0] }
 0x385   :  { %v7231_v54 = vadd.f32 %v3429_v15, %v3336_v33  ;;  %v3248_v15 = vpop.f32.mrf.mxu2 }
 0x387   :  { %8199 = vst [vmem:[#allocation21_spill] sm:$0xff] %v7231_v54  ;;  %v3564_v24 = vmul.f32 %v7231_v54, %v7231_v54 }
 0x389   :  { %3508 = vadd.xlane.f32.xlu0 %v7231_v54  ;;  %3610 = vadd.xlane.f32.xlu1 %v3564_v24  ;;  %v3152_v7 = vpop.f32.mrf.mxu1  ;;  %v3434_v1 = vpop.f32.mrf.mxu0  ;;  %v5672_v24 = vld [vmem:[#allocation2 + $0x6dc] sm:$0xf0] }
 0x38a   :  { %v3337_v4 = vpop.f32.mrf.mxu3  ;;  %v3153_v22 = vadd.f32 %v3152_v7, %v7023_v50 }
 0x38b   :  { %v3338_v27 = vadd.f32 %v3337_v4, %v3244_v29  ;;  %v5675_v4 = vor.u32 %v6318_v44, %v5672_v24 }
 0x38c   :  { %3191 = vmatmul.bf16.gmra.mxu1 %v5615_v5  ;;  %6103 = vmatmul.msk.bf16.gmra.mxu0 %vm2210_vm0, %v5627_v31  ;;  %v3247_v20 = vadd.f32 %v3246_v39, %v3153_v22  ;;  %v5667_v39 = vor.u32 %v6317_v0, %v5664_v14 }
 0x38d   :  { %v7237_v46 = vadd.f32 %v3431_v16, %v3338_v27  ;;  %v5678_v16 = vld [vmem:[#allocation2 + $0x6b0] sm:$0xf]  ;;  %v3251_v5 = vpop.f32.mrf.mxu2 }
 0x38e   :  { %v5679_v18 = vor.u32 %v6325_v53, %v5678_v16 }
 0x38f   :  { %8200 = vst [vmem:[#allocation22_spill] sm:$0xff] %v7237_v46  ;;  %3379 = vmatmul.bf16.gmra.mxu3 %v5623_v2  ;;  %v3565_v10 = vmul.f32 %v7237_v46, %v7237_v46 }
 0x391   :  { %3612 = vadd.xlane.f32.xlu2 %v3565_v10  ;;  %3510 = vadd.xlane.f32.xlu1 %v7237_v46  ;;  %v3154_v36 = vpop.f32.mrf.mxu1  ;;  %v3436_v50 = vpop.f32.mrf.mxu0 }
 0x392   :  { %v3340_v61 = vpop.f32.mrf.mxu3  ;;  %v3155_v32 = vadd.f32 %v3154_v36, %v7029_v11 }
 0x393   :  { %v3341_v45 = vadd.f32 %v3340_v61, %v3247_v20 }
 0x394   :  { %v3249_v3 = vadd.f32 %v3248_v15, %v3155_v32 }
 0x395   :  { %v7244_v12 = vadd.f32 %v3434_v1, %v3341_v45  ;;  %v3253_v44 = vpop.f32.mrf.mxu2 }
 0x397   :  { %8201 = vst [vmem:[#allocation23_spill] sm:$0xff] %v7244_v12  ;;  %v3566_v33 = vmul.f32 %v7244_v12, %v7244_v12 }
 0x399   :  { %3512 = vadd.xlane.f32.xlu2 %v7244_v12  ;;  %3614 = vadd.xlane.f32.xlu0 %v3566_v33  ;;  %v3157_v29 = vpop.f32.mrf.mxu1  ;;  %v3439_v20 = vpop.f32.mrf.mxu0 }
 0x39a   :  { %v3342_v60 = vpop.f32.mrf.mxu3  ;;  %v3485_v17 = vpop.xlane.xlu0 %3484  ;;  %v3158_v2 = vadd.f32 %v3157_v29, %v7035_v34 }
 0x39b   :  { %v3343_v42 = vadd.f32 %v3342_v60, %v3249_v3  ;;  %v7250_v11 = vmul.f32 0.020408163, %v3485_v17 }
 0x39c   :  { %v3587_v31 = vpop.xlane.xlu1 %3586  ;;  %3196 = vmatmul.bf16.gmra.mxu1 %v5667_v39  ;;  %6104 = vmatmul.msk.bf16.gmra.mxu0 %vm2210_vm0, %v5679_v18  ;;  %v3252_v15 = vadd.f32 %v3251_v5, %v3158_v2 }
 0x39d   :  { %v7252_v27 = vadd.f32 %v3436_v50, %v3343_v42  ;;  %v3722_v7 = vmul.f32 %v7250_v11, %v7250_v11  ;;  %v3688_v1 = vmul.f32 0.020408163, %v3587_v31  ;;  %v6617_v42 = vmov 0  }
 0x39e   :  { %6462 = vset.pattern.permute.xlu2 %v6617_v42  ;;  %6464 = vset.pattern.permute.xlu0 %v6617_v42 }
 0x39f   :  { %8202 = vst [vmem:[#allocation24_spill] sm:$0xff] %v7252_v27  ;;  %v3756_v22 = vsub.f32 %v3688_v1, %v3722_v7  ;;  %3384 = vmatmul.bf16.gmra.mxu3 %v5675_v4  ;;  %v3567_v10 = vmul.f32 %v7252_v27, %v7252_v27  ;;  %6463 = vset.pattern.permute.xlu1 %v6617_v42  ;;  %v3256_v1 = vpop.f32.mrf.mxu2 }
 0x3a1   :  { %3514 = vadd.xlane.f32.xlu0 %v7252_v27  ;;  %3616 = vadd.xlane.f32.xlu1 %v3567_v10  ;;  %v3824_v36 = vadd.f32 1e-05, %v3756_v22  ;;  %v3159_v34 = vpop.f32.mrf.mxu1  ;;  %v3441_v39 = vpop.f32.mrf.mxu0 }
 0x3a2   :  { %v3345_v61 = vpop.f32.mrf.mxu3  ;;  %v3487_v45 = vpop.xlane.xlu0 %3486  ;;  %v3160_v16 = vadd.f32 %v3159_v34, %v7041_v47 }
 0x3a3   :  { %v3346_v32 = vadd.f32 %v3345_v61, %v3252_v15  ;;  %v7261_v50 = vmul.f32 0.020408163, %v3487_v45  ;;  %6465 = vrsqrt.f32 %v3824_v36  ;;  %vm3864_vm2 = vweird.f32 %v3824_v36 }
 0x3a4   :  { %v3589_v0 = vpop.xlane.xlu2 %3588  ;;  %v3254_v17 = vadd.f32 %v3253_v44, %v3160_v16 }
 0x3a5   :  { %v7263_v33 = vadd.f32 %v3439_v20, %v3346_v32  ;;  %v3723_v14 = vmul.f32 %v7261_v50, %v7261_v50  ;;  %v3689_v53 = vmul.f32 0.020408163, %v3589_v0 }
 0x3a7   :  { %8203 = vst [vmem:[#allocation25_spill] sm:$0xff] %v7263_v33  ;;  %v3757_v24 = vsub.f32 %v3689_v53, %v3723_v14  ;;  %v3568_v3 = vmul.f32 %v7263_v33, %v7263_v33 }
 0x3a9   :  { %v3825_v60 = vadd.f32 1e-05, %v3757_v24  ;;  %3618 = vadd.xlane.f32.xlu2 %v3568_v3  ;;  %3516 = vadd.xlane.f32.xlu1 %v7263_v33  ;;  %v3162_v47 = vpop.f32.mrf.mxu1  ;;  %v6466_v4 = vpop.eup %6465 }
 0x3aa   :  { %v3347_v18 = vpop.f32.mrf.mxu3  ;;  %v3163_v31 = vadd.f32 %v3162_v47, %v7048_v49  ;;  %v3859_v2 = vmul.f32 %v6466_v4, %v3824_v36  ;;  %v3489_v22 = vpop.xlane.xlu1 %3488  ;;  %vm3865_vm1 = vweird.f32 %v6466_v4  ;;  %v3791_v36 = vld [vmem:[%s8157_s2 + $0x8] sm:$0xff] }
 0x3ab   :  { %6467 = vrsqrt.f32 %v3825_v60  ;;  %v3348_v29 = vadd.f32 %v3347_v18, %v3254_v17  ;;  %v3444_v34 = vpop.f32.mrf.mxu0  ;;  %vm3866_vm3 = vmor %vm3864_vm2, %vm3865_vm1  ;;  %vm3874_vm5 = vweird.f32 %v3825_v60 }
 0x3ac   :  { %v3257_v20 = vadd.f32 %v3256_v1, %v3163_v31  ;;  %v3860_v45 = vmul.f32 %v6466_v4, %v3859_v2  ;;  %v3591_v17 = vpop.xlane.xlu0 %3590  ;;  %v3790_v31 = vld [vmem:[%s8157_s2] sm:$0xff] }
 0x3ad   :  { %v7271_v5 = vadd.f32 %v3441_v39, %v3348_v29 }
 0x3ae   :  { %v3861_v14 = vmul.f32 0.5, %v3860_v45 }
 0x3af   :  { %8204 = vst [vmem:[#allocation26_spill] sm:$0xff] %v7271_v5  ;;  %v3569_v7 = vmul.f32 %v7271_v5, %v7271_v5 }
 0x3b0   :  { %v3862_v24 = vsub.f32 1.5, %v3861_v14 }
 0x3b1   :  { %v6468_v10 = vpop.eup %6467  ;;  %3518 = vadd.xlane.f32.xlu2 %v7271_v5  ;;  %3620 = vadd.xlane.f32.xlu0 %v3569_v7 }
 0x3b2   :  { %v3350_v15 = vpop.f32.mrf.mxu3  ;;  %v3869_v32 = vmul.f32 %v6468_v10, %v3825_v60  ;;  %v7282_v53 = vpop.xlane.xlu1 %3490  ;;  %v3863_v18 = vmul.f32 %v6466_v4, %v3862_v24  ;;  %vm3875_vm4 = vweird.f32 %v6468_v10  ;;  %v4232_v60 = vld [vmem:[%s8158_s3] sm:$0xff] }
 0x3b3   :  { %v3351_v61 = vadd.f32 %v3350_v15, %v3257_v20  ;;  %vm3876_vm6 = vmor %vm3874_vm5, %vm3875_vm4 }
 0x3b4   :  { %v3870_v16 = vmul.f32 %v6468_v10, %v3869_v32  ;;  %v3867_v7 = vsel %vm3866_vm3, %v6466_v4, %v3863_v18 }
 0x3b5   :  { %v7277_v0 = vadd.f32 %v3444_v34, %v3351_v61  ;;  %v4198_v1 = vmul.f32 %v3867_v7, %v3790_v31 }
 0x3b6   :  { %v3871_v3 = vmul.f32 0.5, %v3870_v16 }
 0x3b7   :  { %8205 = vst [vmem:[#allocation27_spill] sm:$0xff] %v7277_v0  ;;  %v3570_v49 = vmul.f32 %v7277_v0, %v7277_v0 }
 0x3b8   :  { %v3872_v39 = vsub.f32 1.5, %v3871_v3 }
 0x3b9   :  { %3520 = vadd.xlane.f32.xlu0 %v7277_v0  ;;  %3622 = vadd.xlane.f32.xlu1 %v3570_v49  ;;  %v4266_v49 = vmul.f32 %v4198_v1, %v7250_v11  ;;  %v4233_v11 = vld [vmem:[%s8158_s3 + $0x8] sm:$0xff] }
 0x3ba   :  { %v7284_v44 = vpop.xlane.xlu2 %3492  ;;  %v7288_v29 = vpop.xlane.xlu1 %3592  ;;  %v3873_v2 = vmul.f32 %v6468_v10, %v3872_v39 }
 0x3bb   :  { %v4300_v18 = vsub.f32 %v4232_v60, %v4266_v49  ;;  %v3164_v60 = vpop.f32.mrf.mxu1  ;;  %v3352_v31 = vpop.f32.mrf.mxu3 }
 0x3bc   :  { %v3877_v20 = vsel %vm3876_vm6, %v6468_v10, %v3873_v2 }
 0x3bd   :  { %v4199_v45 = vmul.f32 %v3877_v20, %v3791_v36 }
 0x3bf   :  { %v4267_v39 = vmul.f32 %v4199_v45, %v7261_v50 }
 0x3c1   :  { %v4301_v7 = vsub.f32 %v4233_v11, %v4267_v39 }
 0x3c2   :  { %v7286_v42 = vpop.xlane.xlu2 %3594 }
 0x3c3   :  { %v3692_v11 = vmul.f32 0.020408163, %v7286_v42 }
 0x3c4   :  { %v3597_v47 = vpop.xlane.xlu0 %3596 }
 0x3c5   :  { %v3693_v14 = vmul.f32 0.020408163, %v3597_v47 }
 0x3c9   :  { %4336 = vperm.xlu2 %6462, %v4198_v1   ;;  %v7316_v1 = vmul.f32 0.020408163, %v3489_v22 }
 0x3ca   :  { %v3495_v15 = vpop.xlane.xlu2 %3494 }
 0x3cb   :  { %v3659_v61 = vmul.f32 0.020408163, %v3495_v15  ;;  %v3724_v15 = vmul.f32 %v7316_v1, %v7316_v1 }
 0x3cc   :  { %v3497_v32 = vpop.xlane.xlu0 %3496  ;;  %v3599_v34 = vpop.xlane.xlu1 %3598 }
 0x3cd   :  { %v3727_v4 = vmul.f32 %v3659_v61, %v3659_v61  ;;  %v7297_v16 = vmul.f32 0.020408163, %v3497_v32  ;;  %4341 = vperm.xlu0 %6464, %v4199_v45   ;;  %v7306_v3 = vmul.f32 0.020408163, %v3599_v34  ;;  %v3690_v45 = vmul.f32 0.020408163, %v3591_v17 }
 0x3ce   :  { %v3165_v17 = vadd.f32 %v3164_v60, %v7054_v9 }
 0x3cf   :  { %v3761_v24 = vsub.f32 %v3693_v14, %v3727_v4  ;;  %v7304_v10 = vmul.f32 %v7297_v16, %v7297_v16  ;;  %v3758_v39 = vsub.f32 %v3690_v45, %v3724_v15 }
 0x3d1   :  { %v3829_v47 = vadd.f32 1e-05, %v3761_v24 }
 0x3d2   :  { %4540 = vperm.xlu1 %6463, %v4300_v18  }
 0x3d3   :  { %6469 = vrsqrt.f32 %v3829_v47  ;;  %vm3914_vm8 = vweird.f32 %v3829_v47 }
 0x3d4   :  { %v7314_v2 = vpop.xlane.xlu2 %3600  ;;  %v7318_v50 = vpop.xlane.xlu1 %3498 }
 0x3d5   :  { %4545 = vperm.xlu0 %6464, %v4301_v7   ;;  %v3795_v7 = vld [vmem:[%s8157_s2 + $0x28] sm:$0xff] }
 0x3d9   :  { %v6470_v36 = vpop.eup %6469 }
 0x3da   :  { %v3909_v20 = vmul.f32 %v6470_v36, %v3829_v47  ;;  %vm3915_vm7 = vweird.f32 %v6470_v36 }
 0x3db   :  { %vm3916_vm9 = vmor %vm3914_vm8, %vm3915_vm7 }
 0x3dc   :  { %v3910_v32 = vmul.f32 %v6470_v36, %v3909_v20  ;;  %v3501_v34 = vpop.xlane.xlu2 %3500  ;;  %v3603_v49 = vpop.xlane.xlu0 %3602 }
 0x3dd   :  { %v7322_v14 = vmul.f32 0.020408163, %v3501_v34  ;;  %v7328_v22 = vmul.f32 0.020408163, %v3603_v49  ;;  %v7339_v34 = vadd.f32 1e-05, %v3758_v39 }
 0x3de   :  { %v3911_v4 = vmul.f32 0.5, %v3910_v32  ;;  %v7337_v32 = vmul.f32 0.020408163, %v7284_v44 }
 0x3df   :  { %v7326_v24 = vmul.f32 %v7322_v14, %v7322_v14  ;;  %6471 = vrsqrt.f32 %v7339_v34  ;;  %vm3884_vm11 = vweird.f32 %v7339_v34 }
 0x3e0   :  { %v3912_v18 = vsub.f32 1.5, %v3911_v4  ;;  %v3258_v4 = vpop.f32.mrf.mxu2  ;;  %v3726_v47 = vmul.f32 %v7337_v32, %v7337_v32 }
 0x3e1   :  { %v3259_v60 = vadd.f32 %v3258_v4, %v3165_v17  ;;  %v7359_v17 = vmul.f32 0.020408163, %v7282_v53 }
 0x3e2   :  { %v3913_v20 = vmul.f32 %v6470_v36, %v3912_v18  ;;  %v3760_v42 = vsub.f32 %v3692_v11, %v3726_v47 }
 0x3e3   :  { %v3725_v53 = vmul.f32 %v7359_v17, %v7359_v17 }
 0x3e4   :  { %v3917_v15 = vsel %vm3916_vm9, %v6470_v36, %v3913_v20  ;;  %v3503_v45 = vpop.xlane.xlu0 %3502  ;;  %v3605_v49 = vpop.xlane.xlu1 %3604  ;;  %v3353_v36 = vadd.f32 %v3352_v31, %v3259_v60  ;;  %v7366_v60 = vadd.f32 1e-05, %v3760_v42 }
 0x3e5   :  { %v7342_v9 = vmul.f32 %v3917_v15, %v3795_v7  ;;  %v7344_v0 = vmul.f32 0.020408163, %v3503_v45  ;;  %v7356_v18 = vmul.f32 0.020408163, %v3605_v49  ;;  %v3446_v20 = vpop.f32.mrf.mxu0  ;;  %v3167_v15 = vpop.f32.mrf.mxu1  ;;  %v3691_v45 = vmul.f32 0.020408163, %v7288_v29 }
 0x3e6   :  { %v7370_v49 = vpop.eup %6471  ;;  %v3168_v11 = vadd.f32 %v3167_v15, %v7061_v37  ;;  %6473 = vrsqrt.f32 %v7366_v60  ;;  %vm3904_vm14 = vweird.f32 %v7366_v60 }
 0x3e7   :  { %8206 = vst [vmem:[#allocation28_spill] sm:$0xff] %v7344_v0  ;;  %v7349_v44 = vmul.f32 %v7342_v9, %v3659_v61  ;;  %v7354_v39 = vmul.f32 %v7344_v0, %v7344_v0  ;;  %v7363_v61 = vadd.f32 %v3446_v20, %v3353_v36  ;;  %v3759_v29 = vsub.f32 %v3691_v45, %v3725_v53 }
 0x3e8   :  { %v3261_v47 = vpop.f32.mrf.mxu2  ;;  %v3879_v20 = vmul.f32 %v7370_v49, %v7339_v34  ;;  %vm3885_vm10 = vweird.f32 %v7370_v49 }
 0x3e9   :  { %8207 = vst [vmem:[#allocation29_spill] sm:$0xff] %v7363_v61  ;;  %v3571_v42 = vmul.f32 %v7363_v61, %v7363_v61  ;;  %v3262_v15 = vadd.f32 %v3261_v47, %v3168_v11  ;;  %vm3886_vm12 = vmor %vm3884_vm11, %vm3885_vm10 }
 0x3ea   :  { %v3880_v45 = vmul.f32 %v7370_v49, %v3879_v20 }
 0x3ec   :  { %v3607_v31 = vpop.xlane.xlu2 %3606  ;;  %v3505_v4 = vpop.xlane.xlu1 %3504 }
 0x3ed   :  { %v7368_v33 = vmul.f32 0.020408163, %v3505_v4  ;;  %v7375_v7 = vmul.f32 0.020408163, %v3607_v31  ;;  %v3355_v4 = vpop.f32.mrf.mxu3  ;;  %v7388_v31 = vadd.f32 1e-05, %v3759_v29  ;;  %v3449_v53 = vpop.f32.mrf.mxu0 }
 0x3ee   :  { %v3356_v27 = vadd.f32 %v3355_v4, %v3262_v15  ;;  %v7393_v43 = vpop.eup %6473  ;;  %v3169_v5 = vpop.f32.mrf.mxu1  ;;  %v3881_v29 = vmul.f32 0.5, %v3880_v45 }
 0x3ef   :  { %v7379_v36 = vmul.f32 %v7368_v33, %v7368_v33  ;;  %6475 = vrsqrt.f32 %v7388_v31  ;;  %v3170_v20 = vadd.f32 %v3169_v5, %v7067_v23  ;;  %vm3905_vm13 = vweird.f32 %v7393_v43 }
 0x3f0   :  { %v7396_v12 = vadd.f32 %v3449_v53, %v3356_v27  ;;  %v3263_v4 = vpop.f32.mrf.mxu2  ;;  %v3882_v53 = vsub.f32 1.5, %v3881_v29  ;;  %vm3906_vm15 = vmor %vm3904_vm14, %vm3905_vm13  ;;  %vm3894_vm1 = vweird.f32 %v7388_v31 }
 0x3f1   :  { %v3264_v30 = vadd.f32 %v3263_v4, %v3170_v20 }
 0x3f2   :  { %3624 = vadd.xlane.f32.xlu2 %v3571_v42  ;;  %8208 = vst [vmem:[#allocation30_spill] sm:$0xff] %v7396_v12  ;;  %v3899_v42 = vmul.f32 %v7393_v43, %v7366_v60  ;;  %v3883_v29 = vmul.f32 %v7370_v49, %v3882_v53  ;;  %v3792_v53 = vld [vmem:[%s8157_s2 + $0x10] sm:$0xff] }
 0x3f4   :  { %v3507_v46 = vpop.xlane.xlu2 %3506  ;;  %v3609_v54 = vpop.xlane.xlu0 %3608  ;;  %v3900_v51 = vmul.f32 %v7393_v43, %v3899_v42 }
 0x3f5   :  { %v7391_v6 = vmul.f32 0.020408163, %v3507_v46  ;;  %v7402_v47 = vmul.f32 0.020408163, %v3609_v54  ;;  %v3572_v54 = vmul.f32 %v7396_v12, %v7396_v12  ;;  %v7415_v45 = vpop.eup %6475  ;;  %v3357_v46 = vpop.f32.mrf.mxu3 }
 0x3f6   :  { %v3451_v20 = vpop.f32.mrf.mxu0  ;;  %vm3895_vm0 = vweird.f32 %v7415_v45 }
 0x3f7   :  { %v7400_v11 = vmul.f32 %v7391_v6, %v7391_v6  ;;  %vm3896_vm2 = vmor %vm3894_vm1, %vm3895_vm0 }
 0x3fa   :  { %3524 = vadd.xlane.f32.xlu2 %v7396_v12  ;;  %v3901_v12 = vmul.f32 0.5, %v3900_v51 }
 0x3fc   :  { %v3509_v27 = vpop.xlane.xlu0 %3508  ;;  %3522 = vadd.xlane.f32.xlu1 %v7363_v61  ;;  %v3611_v15 = vpop.xlane.xlu1 %3610  ;;  %v3358_v61 = vadd.f32 %v3357_v46, %v3264_v30  ;;  %v3887_v30 = vsel %vm3886_vm12, %v7370_v49, %v3883_v29  ;;  %v3902_v46 = vsub.f32 1.5, %v3901_v12 }
 0x3fd   :  { %v7411_v37 = vmul.f32 0.020408163, %v3509_v27  ;;  %v7422_v5 = vmul.f32 0.020408163, %v3611_v15  ;;  %v3889_v27 = vmul.f32 %v7415_v45, %v7388_v31  ;;  %v3360_v48 = vpop.f32.mrf.mxu3 }
 0x3ff   :  { %8209 = vst [vmem:[#allocation31_spill] sm:$0xff] %v7411_v37  ;;  %v7420_v23 = vmul.f32 %v7411_v37, %v7411_v37  ;;  %3626 = vadd.xlane.f32.xlu0 %v3572_v54  ;;  %v3890_v54 = vmul.f32 %v7415_v45, %v3889_v27  ;;  %v7432_v37 = vadd.f32 %v3451_v20, %v3358_v61 }
 0x400   :  { %v4200_v27 = vmul.f32 %v3887_v30, %v3792_v53  ;;  %v3903_v20 = vmul.f32 %v7393_v43, %v3902_v46  ;;  %v3794_v53 = vld [vmem:[%s8157_s2 + $0x20] sm:$0xff] }
 0x401   :  { %8210 = vst [vmem:[#allocation32_spill] sm:$0xff] %v7432_v37  ;;  %v3891_v61 = vmul.f32 0.5, %v3890_v54  ;;  %v4234_v54 = vld [vmem:[%s8158_s3 + $0x10] sm:$0xff] }
 0x402   :  { %v3907_v30 = vsel %vm3906_vm15, %v7393_v43, %v3903_v20  ;;  %v3793_v20 = vld [vmem:[%s8157_s2 + $0x18] sm:$0xff] }
 0x403   :  { %v4202_v49 = vmul.f32 %v3907_v30, %v3794_v53 }
 0x404   :  { %v3613_v4 = vpop.xlane.xlu2 %3612  ;;  %v3511_v15 = vpop.xlane.xlu1 %3510 }
 0x405   :  { %v7438_v0 = vmul.f32 0.020408163, %v3511_v15  ;;  %v7441_v51 = vmul.f32 0.020408163, %v3613_v4  ;;  %v4268_v4 = vmul.f32 %v4200_v27, %v7316_v1  ;;  %v3892_v15 = vsub.f32 1.5, %v3891_v61 }
 0x407   :  { %3526 = vadd.xlane.f32.xlu0 %v7432_v37  ;;  %v7445_v34 = vmul.f32 %v7438_v0, %v7438_v0  ;;  %v4302_v1 = vsub.f32 %v4234_v54, %v4268_v4  ;;  %v4270_v4 = vmul.f32 %v4202_v49, %v7337_v32 }
 0x40c   :  { %v3513_v12 = vpop.xlane.xlu2 %3512  ;;  %v3615_v29 = vpop.xlane.xlu0 %3614 }
 0x40d   :  { %v7453_v42 = vmul.f32 0.020408163, %v3513_v12  ;;  %v7466_v46 = vmul.f32 0.020408163, %v3615_v29  ;;  %v3893_v12 = vmul.f32 %v7415_v45, %v3892_v15  ;;  %v4236_v15 = vld [vmem:[%s8158_s3 + $0x20] sm:$0xff] }
 0x40e   :  { %v4304_v30 = vsub.f32 %v4236_v15, %v4270_v4  ;;  %v7505_v15 = vmul.f32 0.020408163, %v7318_v50 }
 0x40f   :  { %8211 = vst [vmem:[#allocation33_spill] sm:$0xff] %v7453_v42  ;;  %v7464_v60 = vmul.f32 %v7453_v42, %v7453_v42  ;;  %v3897_v29 = vsel %vm3896_vm2, %v7415_v45, %v3893_v12  ;;  %v3266_v42 = vpop.f32.mrf.mxu2 }
 0x412   :  { %4550 = vperm.xlu2 %6462, %v4302_v1  }
 0x414   :  { %v3515_v41 = vpop.xlane.xlu0 %3514  ;;  %v3617_v43 = vpop.xlane.xlu1 %3616 }
 0x415   :  { %4346 = vperm.xlu1 %6463, %v4200_v27   ;;  %v7478_v54 = vmul.f32 0.020408163, %v3515_v41  ;;  %v7487_v53 = vmul.f32 0.020408163, %v3617_v43  ;;  %v7489_v27 = vmul.f32 %v3897_v29, %v3793_v20 }
 0x417   :  { %8212 = vst [vmem:[#allocation34_spill] sm:$0xff] %v7478_v54  ;;  %v7485_v31 = vmul.f32 %v7478_v54, %v7478_v54  ;;  %v3268_v8 = vpop.f32.mrf.mxu2 }
 0x418   :  { %8214 = vst [vmem:[#allocation36_spill] sm:$0xff] %v7487_v53  ;;  %v3695_v53 = vmul.f32 0.020408163, %v7314_v2 }
 0x419   :  { %8213 = vst [vmem:[#allocation35_spill] sm:$0xff] %v7485_v31 }
 0x41a   :  { %4351 = vperm.xlu2 %6462, %v7489_v27  }
 0x41b   :  { %4560 = vperm.xlu0 %6464, %v4304_v30   ;;  %v3172_v30 = vpop.f32.mrf.mxu1 }
 0x41c   :  { %v3619_v41 = vpop.xlane.xlu2 %3618  ;;  %v3517_v32 = vpop.xlane.xlu1 %3516 }
 0x41d   :  { %v7494_v1 = vmul.f32 0.020408163, %v3517_v32  ;;  %v7496_v12 = vmul.f32 0.020408163, %v3619_v41  ;;  %v3729_v41 = vmul.f32 %v7505_v15, %v7505_v15 }
 0x41f   :  { %8215 = vst [vmem:[#allocation37_spill] sm:$0xff] %v7494_v1  ;;  %v7500_v61 = vmul.f32 %v7494_v1, %v7494_v1 }
 0x420   :  { %8216 = vst [vmem:[#allocation38_spill] sm:$0xff] %v7496_v12 }
 0x421   :  { %8217 = vst [vmem:[#allocation39_spill] sm:$0xff] %v7500_v61 }
 0x422   :  { %4356 = vperm.xlu2 %6462, %v4202_v49  }
 0x424   :  { %v3519_v20 = vpop.xlane.xlu2 %3518  ;;  %v3621_v29 = vpop.xlane.xlu0 %3620 }
 0x425   :  { %v3671_v4 = vmul.f32 0.020408163, %v3519_v20  ;;  %v3705_v32 = vmul.f32 0.020408163, %v3621_v29  ;;  %v3763_v20 = vsub.f32 %v3695_v53, %v3729_v41  ;;  %v3362_v41 = vpop.f32.mrf.mxu3 }
 0x427   :  { %v3739_v45 = vmul.f32 %v3671_v4, %v3671_v4  ;;  %v7520_v38 = vadd.f32 1e-05, %v3763_v20  ;;  %v3573_v20 = vmul.f32 %v7432_v37, %v7432_v37  ;;  %v3271_v37 = vpop.f32.mrf.mxu2 }
 0x429   :  { %v3773_v54 = vsub.f32 %v3705_v32, %v3739_v45  ;;  %v3174_v32 = vpop.f32.mrf.mxu1  ;;  %vm3934_vm7 = vweird.f32 %v7520_v38 }
 0x42b   :  { %v3841_v1 = vadd.f32 1e-05, %v3773_v54  ;;  %v3454_v54 = vpop.f32.mrf.mxu0 }
 0x42c   :  { %v3521_v31 = vpop.xlane.xlu0 %3520  ;;  %v3623_v49 = vpop.xlane.xlu1 %3622 }
 0x42d   :  { %v7510_v43 = vmul.f32 0.020408163, %v3521_v31  ;;  %6477 = vrsqrt.f32 %v3841_v1  ;;  %v7516_v29 = vmul.f32 0.020408163, %v3623_v49  ;;  %v3175_v31 = vadd.f32 %v3174_v32, %v7080_v59  ;;  %v3807_v59 = vld [vmem:[%s8157_s2 + $0x88] sm:$0xff] }
 0x42e   :  { %6479 = vrsqrt.f32 %v7520_v38  ;;  %v3173_v49 = vadd.f32 %v3172_v30, %v7074_v55  ;;  %vm4034_vm4 = vweird.f32 %v3841_v1  ;;  %v4337_v30 = vpop.permute.xlu2 %4336 }
 0x42f   :  { %8218 = vst [vmem:[#allocation40_spill] sm:$0xff] %v7510_v43  ;;  %v7514_v50 = vmul.f32 %v7510_v43, %v7510_v43  ;;  %v3269_v43 = vadd.f32 %v3268_v8, %v3175_v31 }
 0x430   :  { %8220 = vst [vmem:[#allocation42_spill] sm:$0xff] %v7516_v29  ;;  %v3267_v8 = vadd.f32 %v3266_v42, %v3173_v49  ;;  %v3365_v49 = vpop.f32.mrf.mxu3 }
 0x431   :  { %8219 = vst [vmem:[#allocation41_spill] sm:$0xff] %v7514_v50  ;;  %v3363_v12 = vadd.f32 %v3362_v41, %v3269_v43 }
 0x433   :  { %v6478_v2 = vpop.eup %6477  ;;  %v3456_v45 = vpop.f32.mrf.mxu0 }
 0x434   :  { %v4029_v25 = vmul.f32 %v6478_v2, %v3841_v1  ;;  %vm4035_vm3 = vweird.f32 %v6478_v2  ;;  %v6480_v50 = vpop.eup %6479  ;;  %v7530_v31 = vadd.f32 %v3456_v45, %v3363_v12  ;;  %v4504_v12 = vmul.f32 %v4337_v30, %v7149_v19 }
 0x435   :  { %vm4036_vm5 = vmor %vm4034_vm4, %vm4035_vm3  ;;  %v3929_v43 = vmul.f32 %v6480_v50, %v7520_v38  ;;  %vm3935_vm6 = vweird.f32 %v6480_v50 }
 0x436   :  { %v4030_v53 = vmul.f32 %v6478_v2, %v4029_v25  ;;  %v3177_v25 = vpop.f32.mrf.mxu1  ;;  %v3575_v45 = vmul.f32 %v7530_v31, %v7530_v31  ;;  %vm3936_vm8 = vmor %vm3934_vm7, %vm3935_vm6 }
 0x437   :  { %v3178_v41 = vadd.f32 %v3177_v25, %v7087_v52 }
 0x438   :  { %v4031_v61 = vmul.f32 0.5, %v4030_v53  ;;  %v3361_v53 = vadd.f32 %v3360_v48, %v3267_v8 }
 0x439   :  { %v3272_v48 = vadd.f32 %v3271_v37, %v3178_v41  ;;  %v4235_v41 = vld [vmem:[%s8158_s3 + $0x18] sm:$0xff] }
 0x43a   :  { %v4032_v26 = vsub.f32 1.5, %v4031_v61 }
 0x43b   :  { %v3459_v25 = vpop.f32.mrf.mxu0 }
 0x43c   :  { %v4033_v32 = vmul.f32 %v6478_v2, %v4032_v26  ;;  %v8221_v26 = vsub.f32 %v7328_v22, %v7326_v24 }
 0x43e   :  { %v4037_v61 = vsel %vm4036_vm5, %v6478_v2, %v4033_v32  ;;  %v3832_v42 = vadd.f32 1e-05, %v8221_v26  ;;  %v3930_v2 = vmul.f32 %v6480_v50, %v3929_v43  ;;  %v3366_v32 = vadd.f32 %v3365_v49, %v3272_v48 }
 0x43f   :  { %v4342_v55 = vpop.permute.xlu0 %4341  ;;  %3628 = vadd.xlane.f32.xlu1 %v3573_v20  ;;  %v7533_v1 = vmul.f32 %v4037_v61, %v3807_v59  ;;  %v7545_v59 = vadd.f32 %v3454_v54, %v3361_v53  ;;  %v8222_v43 = vsub.f32 %v7306_v3, %v7304_v10  ;;  %v4269_v53 = vmul.f32 %v7489_v27, %v7359_v17  ;;  %v3797_v10 = vld [vmem:[%s8157_s2 + $0x38] sm:$0xff] }
 0x440   :  { %6481 = vrsqrt.f32 %v3832_v42  ;;  %v3931_v22 = vmul.f32 0.5, %v3930_v2  ;;  %v7550_v61 = vadd.f32 %v3459_v25, %v3366_v32  ;;  %vm3944_vm10 = vweird.f32 %v3832_v42  ;;  %v3798_v32 = vld [vmem:[%s8157_s2 + $0x40] sm:$0xff]  ;;  %v4237_v25 = vld [vmem:[%s8158_s3 + $0x28] sm:$0xff] }
 0x441   :  { %v7537_v29 = vmul.f32 %v7533_v1, %v3671_v4  ;;  %v4505_v4 = vmul.f32 %v4342_v55, %v7156_v58  ;;  %v3574_v8 = vmul.f32 %v7545_v59, %v7545_v59  ;;  %v3830_v58 = vadd.f32 1e-05, %v8222_v43 }
 0x442   :  { %v3932_v54 = vsub.f32 1.5, %v3931_v22 }
 0x443   :  { %6483 = vrsqrt.f32 %v3830_v58  ;;  %vm3924_vm13 = vweird.f32 %v3830_v58 }
 0x444   :  { %v4541_v20 = vpop.permute.xlu1 %4540  ;;  %v3933_v55 = vmul.f32 %v6480_v50, %v3932_v54 }
 0x445   :  { %v4708_v52 = vadd.f32 %v4541_v20, %v4504_v12  ;;  %3632 = vadd.xlane.f32.xlu0 %v3575_v45  ;;  %v4303_v12 = vsub.f32 %v4235_v41, %v4269_v53  ;;  %v4239_v20 = vld [vmem:[%s8158_s3 + $0x38] sm:$0xff] }
 0x446   :  { %v6482_v37 = vpop.eup %6481  ;;  %v3937_v3 = vsel %vm3936_vm8, %v6480_v50, %v3933_v55 }
 0x447   :  { %4742 = vst [vmem:[#allocation7] sm:$0xff] %v4708_v52  ;;  %v4546_v24 = vpop.permute.xlu0 %4545  ;;  %v3939_v30 = vmul.f32 %v6482_v37, %v3832_v42  ;;  %v7566_v2 = vmul.f32 %v3937_v3, %v3797_v10  ;;  %vm3945_vm9 = vweird.f32 %v6482_v37 }
 0x448   :  { %v4709_v19 = vadd.f32 %v4546_v24, %v4505_v4  ;;  %vm3946_vm11 = vmor %vm3944_vm10, %vm3945_vm9 }
 0x449   :  { %v3940_v26 = vmul.f32 %v6482_v37, %v3939_v30  ;;  %v6484_v45 = vpop.eup %6483  ;;  %v4273_v27 = vmul.f32 %v7566_v2, %v7505_v15 }
 0x44a   :  { %4743 = vst [vmem:[#allocation7 + $0x8] sm:$0xff] %v4709_v19  ;;  %v3919_v17 = vmul.f32 %v6484_v45, %v3830_v58  ;;  %vm3925_vm12 = vweird.f32 %v6484_v45 }
 0x44b   :  { %3630 = vadd.xlane.f32.xlu2 %v3574_v8  ;;  %v3941_v38 = vmul.f32 0.5, %v3940_v26  ;;  %v4307_v52 = vsub.f32 %v4239_v20, %v4273_v27  ;;  %v4305_v8 = vsub.f32 %v4237_v25, %v7349_v44  ;;  %vm3926_vm14 = vmor %vm3924_vm13, %vm3925_vm12  ;;  %v3367_v20 = vpop.f32.mrf.mxu3 }
 0x44c   :  { %v3920_v48 = vmul.f32 %v6484_v45, %v3919_v17  ;;  %v3179_v17 = vpop.f32.mrf.mxu1 }
 0x44d   :  { %3532 = vadd.xlane.f32.xlu0 %v7550_v61  ;;  %v3942_v49 = vsub.f32 1.5, %v3941_v38 }
 0x44e   :  { %v3921_v50 = vmul.f32 0.5, %v3920_v48 }
 0x44f   :  { %v3943_v4 = vmul.f32 %v6482_v37, %v3942_v49  ;;  %v3273_v49 = vpop.f32.mrf.mxu2 }
 0x450   :  { %v3922_v15 = vsub.f32 1.5, %v3921_v50  ;;  %v3461_v50 = vpop.f32.mrf.mxu0 }
 0x451   :  { %v3947_v24 = vsel %vm3946_vm11, %v6482_v37, %v3943_v4  ;;  %v3796_v37 = vld [vmem:[%s8157_s2 + $0x30] sm:$0xff] }
 0x452   :  { %v7579_v19 = vmul.f32 %v3947_v24, %v3798_v32  ;;  %v3923_v54 = vmul.f32 %v6484_v45, %v3922_v15  ;;  %v8223_v24 = vsub.f32 %v7375_v7, %v7379_v36  ;;  %v3810_v7 = vld [vmem:[%s8157_s2 + $0xa0] sm:$0xff] }
 0x453   :  { %3530 = vadd.xlane.f32.xlu2 %v7530_v31 }
 0x454   :  { %v3927_v43 = vsel %vm3926_vm14, %v6484_v45, %v3923_v54  ;;  %v3182_v4 = vpop.f32.mrf.mxu1 }
 0x455   :  { %v7588_v41 = vmul.f32 %v3927_v43, %v3796_v37  ;;  %v3183_v25 = vadd.f32 %v3182_v4, %v7100_v57  ;;  %v3370_v37 = vpop.f32.mrf.mxu3 }
 0x458   :  { %4555 = vperm.xlu1 %6463, %v4303_v12  }
 0x461   :  { %4575 = vperm.xlu0 %6464, %v4307_v52  }
 0x465   :  { %v3625_v22 = vpop.xlane.xlu2 %3624 }
 0x466   :  { %v7590_v10 = vmul.f32 0.020408163, %v3625_v22  ;;  %v3834_v22 = vadd.f32 1e-05, %v8223_v24 }
 0x468   :  { %vm3964_vm3 = vweird.f32 %v3834_v22 }
 0x469   :  { %4376 = vperm.xlu0 %6464, %v7579_v19  }
 0x46b   :  { %4565 = vperm.xlu2 %6462, %v4305_v8   ;;  %v3276_v8 = vpop.f32.mrf.mxu2 }
 0x46d   :  { %v3525_v42 = vpop.xlane.xlu2 %3524 }
 0x46e   :  { %v3674_v55 = vmul.f32 0.020408163, %v3525_v42 }
 0x46f   :  { %v3523_v30 = vpop.xlane.xlu1 %3522 }
 0x470   :  { %v7586_v53 = vmul.f32 0.020408163, %v3523_v30  ;;  %v3742_v3 = vmul.f32 %v3674_v55, %v3674_v55  ;;  %v3277_v30 = vadd.f32 %v3276_v8, %v3183_v25  ;;  %v3180_v25 = vadd.f32 %v3179_v17, %v7093_v28  ;;  %v3184_v8 = vpop.f32.mrf.mxu1 }
 0x471   :  { %v8224_v28 = vsub.f32 %v7402_v47, %v7400_v11 }
 0x472   :  { %v7594_v44 = vmul.f32 %v7586_v53, %v7586_v53  ;;  %v3627_v58 = vpop.xlane.xlu0 %3626 }
 0x473   :  { %v3708_v26 = vmul.f32 0.020408163, %v3627_v58  ;;  %4366 = vperm.xlu2 %6462, %v7588_v41   ;;  %v3835_v17 = vadd.f32 1e-05, %v8224_v28  ;;  %v3801_v28 = vld [vmem:[%s8157_s2 + $0x58] sm:$0xff] }
 0x474   :  { %v3775_v12 = vsub.f32 %v7590_v10, %v7594_v44 }
 0x475   :  { %v3776_v45 = vsub.f32 %v3708_v26, %v3742_v3  ;;  %v4551_v38 = vpop.permute.xlu2 %4550  ;;  %v3371_v26 = vadd.f32 %v3370_v37, %v3277_v30  ;;  %vm3974_vm6 = vweird.f32 %v3835_v17 }
 0x477   :  { %v3844_v27 = vadd.f32 1e-05, %v3776_v45  ;;  %v3464_v45 = vpop.f32.mrf.mxu0 }
 0x479   :  { %6485 = vrsqrt.f32 %v3844_v27  ;;  %vm4064_vm0 = vweird.f32 %v3844_v27 }
 0x47a   :  { %6487 = vrsqrt.f32 %v3834_v22  ;;  %v7606_v42 = vpop.xlane.xlu0 %3526 }
 0x47b   :  { %6489 = vrsqrt.f32 %v3835_v17 }
 0x47d   :  { %v7599_v52 = vpop.permute.xlu2 %4351 }
 0x47f   :  { %v6486_v48 = vpop.eup %6485 }
 0x480   :  { %v4059_v32 = vmul.f32 %v6486_v48, %v3844_v27  ;;  %vm4065_vm15 = vweird.f32 %v6486_v48  ;;  %v6488_v24 = vpop.eup %6487 }
 0x481   :  { %vm4066_vm1 = vmor %vm4064_vm0, %vm4065_vm15  ;;  %v3959_v37 = vmul.f32 %v6488_v24, %v3834_v22  ;;  %v6490_v47 = vpop.eup %6489  ;;  %vm3965_vm2 = vweird.f32 %v6488_v24  ;;  %v4242_v22 = vld [vmem:[%s8158_s3 + $0x50] sm:$0xff] }
 0x482   :  { %v4060_v15 = vmul.f32 %v6486_v48, %v4059_v32  ;;  %3528 = vadd.xlane.f32.xlu1 %v7545_v59  ;;  %vm3966_vm4 = vmor %vm3964_vm3, %vm3965_vm2  ;;  %vm3975_vm5 = vweird.f32 %v6490_v47 }
 0x483   :  { %vm3976_vm7 = vmor %vm3974_vm6, %vm3975_vm5 }
 0x484   :  { %v4061_v54 = vmul.f32 0.5, %v4060_v15 }
 0x485   :  { %v4357_v57 = vpop.permute.xlu2 %4356 }
 0x486   :  { %v4062_v43 = vsub.f32 1.5, %v4061_v54  ;;  %v4508_v27 = vmul.f32 %v4357_v57, %v7177_v62 }
 0x487   :  { %v4347_v58 = vpop.permute.xlu1 %4346 }
 0x488   :  { %v4506_v3 = vmul.f32 %v4347_v58, %v7164_v13  ;;  %v4063_v36 = vmul.f32 %v6486_v48, %v4062_v43  ;;  %v7616_v13 = vadd.f32 %v3464_v45, %v3371_v26  ;;  %v3278_v58 = vpop.f32.mrf.mxu2 }
 0x48a   :  { %v4710_v4 = vadd.f32 %v4551_v38, %v4506_v3  ;;  %v4067_v32 = vsel %vm4066_vm1, %v6486_v48, %v4063_v36  ;;  %v3185_v38 = vadd.f32 %v3184_v8, %v7106_v63  ;;  %v3274_v48 = vadd.f32 %v3273_v49, %v3180_v25  ;;  %v3372_v36 = vpop.f32.mrf.mxu3  ;;  %v3466_v49 = vpop.f32.mrf.mxu0  ;;  %v3800_v8 = vld [vmem:[%s8157_s2 + $0x50] sm:$0xff] }
 0x48b   :  { %v7612_v15 = vmul.f32 %v4067_v32, %v3810_v7  ;;  %v3578_v62 = vmul.f32 %v7616_v13, %v7616_v13  ;;  %v3960_v7 = vmul.f32 %v6488_v24, %v3959_v37  ;;  %v3969_v25 = vmul.f32 %v6490_v47, %v3835_v17 }
 0x48c   :  { %4744 = vst [vmem:[#allocation7 + $0x10] sm:$0xff] %v4710_v4  ;;  %v3368_v3 = vadd.f32 %v3367_v20, %v3274_v48  ;;  %v3279_v26 = vadd.f32 %v3278_v58, %v3185_v38  ;;  %v8225_v20 = vsub.f32 %v7356_v18, %v7354_v39 }
 0x48d   :  { %v4561_v54 = vpop.permute.xlu0 %4560  ;;  %v7619_v43 = vmul.f32 %v7612_v15, %v3674_v55  ;;  %v3961_v63 = vmul.f32 0.5, %v3960_v7  ;;  %v4274_v7 = vmul.f32 %v7579_v19, %v7322_v14 }
 0x48e   :  { %v4712_v30 = vadd.f32 %v4561_v54, %v4508_v27  ;;  %v3373_v55 = vadd.f32 %v3372_v36, %v3279_v26  ;;  %v7627_v57 = vadd.f32 %v3461_v50, %v3368_v3  ;;  %v3833_v32 = vadd.f32 1e-05, %v8225_v20  ;;  %v4240_v26 = vld [vmem:[%s8158_s3 + $0x40] sm:$0xff] }
 0x48f   :  { %v3962_v4 = vsub.f32 1.5, %v3961_v63  ;;  %v3970_v54 = vmul.f32 %v6490_v47, %v3969_v25  ;;  %v4308_v17 = vsub.f32 %v4240_v26, %v4274_v7 }
 0x490   :  { %4746 = vst [vmem:[#allocation7 + $0x20] sm:$0xff] %v4712_v30  ;;  %v7629_v45 = vadd.f32 %v3466_v49, %v3373_v55  ;;  %v3577_v11 = vmul.f32 %v7627_v57, %v7627_v57  ;;  %6491 = vrsqrt.f32 %v3833_v32  ;;  %vm3954_vm9 = vweird.f32 %v3833_v32  ;;  %v3799_v49 = vld [vmem:[%s8157_s2 + $0x48] sm:$0xff]  ;;  %v3281_v25 = vpop.f32.mrf.mxu2 }
 0x491   :  { %v3963_v50 = vmul.f32 %v6488_v24, %v3962_v4  ;;  %v3971_v37 = vmul.f32 0.5, %v3970_v54 }
 0x493   :  { %3638 = vadd.xlane.f32.xlu0 %v3578_v62  ;;  %v3967_v27 = vsel %vm3966_vm4, %v6488_v24, %v3963_v50  ;;  %v3972_v18 = vsub.f32 1.5, %v3971_v37  ;;  %v3375_v37 = vpop.f32.mrf.mxu3 }
 0x495   :  { %v3973_v58 = vmul.f32 %v6490_v47, %v3972_v18 }
 0x496   :  { %v6492_v30 = vpop.eup %6491 }
 0x497   :  { %v3949_v38 = vmul.f32 %v6492_v30, %v3833_v32  ;;  %v3977_v62 = vsel %vm3976_vm7, %v6490_v47, %v3973_v58  ;;  %vm3955_vm8 = vweird.f32 %v6492_v30  ;;  %v3187_v47 = vpop.f32.mrf.mxu1  ;;  %v8226_v58 = vsub.f32 %v7441_v51, %v7445_v34  ;;  %v4238_v51 = vld [vmem:[%s8158_s3 + $0x30] sm:$0xff] }
 0x498   :  { %vm3956_vm10 = vmor %vm3954_vm9, %vm3955_vm8 }
 0x499   :  { %v3950_v24 = vmul.f32 %v6492_v30, %v3949_v38 }
 0x49b   :  { %4361 = vperm.xlu1 %6463, %v7342_v9   ;;  %3538 = vadd.xlane.f32.xlu0 %v7629_v45  ;;  %v7642_v9 = vmul.f32 %v3967_v27, %v3800_v8  ;;  %v3951_v3 = vmul.f32 0.5, %v3950_v24  ;;  %v4507_v8 = vmul.f32 %v7599_v52, %v7171_v40  ;;  %v3837_v24 = vadd.f32 1e-05, %v8226_v58  ;;  %v3377_v40 = vpop.f32.mrf.mxu3 }
 0x49c   :  { %3636 = vadd.xlane.f32.xlu2 %v3577_v11  ;;  %v3576_v11 = vmul.f32 %v7550_v61, %v7550_v61 }
 0x49d   :  { %v4276_v39 = vmul.f32 %v7642_v9, %v7368_v33  ;;  %v7652_v33 = vmul.f32 %v3977_v62, %v3801_v28  ;;  %v3952_v36 = vsub.f32 1.5, %v3951_v3  ;;  %v3283_v62 = vpop.f32.mrf.mxu2  ;;  %vm3994_vm15 = vweird.f32 %v3837_v24 }
 0x49f   :  { %v4310_v48 = vsub.f32 %v4242_v22, %v4276_v39  ;;  %v3953_v55 = vmul.f32 %v6492_v30, %v3952_v36  ;;  %v3189_v38 = vpop.f32.mrf.mxu1 }
 0x4a0   :  { %v3190_v28 = vadd.f32 %v3189_v38, %v7119_v21 }
 0x4a1   :  { %v3957_v14 = vsel %vm3956_vm10, %v6492_v30, %v3953_v55  ;;  %v4272_v55 = vmul.f32 %v7588_v41, %v7297_v16  ;;  %v3813_v16 = vld [vmem:[%s8157_s2 + $0xb8] sm:$0xff] }
 0x4a2   :  { %v7667_v4 = vmul.f32 %v3957_v14, %v3799_v49  ;;  %v3284_v3 = vadd.f32 %v3283_v62, %v3190_v28 }
 0x4a4   :  { %3536 = vadd.xlane.f32.xlu2 %v7616_v13  ;;  %v3378_v36 = vadd.f32 %v3377_v40, %v3284_v3 }
 0x4a7   :  { %v3192_v34 = vpop.f32.mrf.mxu1 }
 0x4af   :  { %4590 = vperm.xlu0 %6464, %v4310_v48   ;;  %v3469_v48 = vpop.f32.mrf.mxu0 }
 0x4b2   :  { %v7665_v19 = vpop.xlane.xlu1 %3628 }
 0x4b7   :  { %4391 = vperm.xlu0 %6464, %v7652_v33   ;;  %v3471_v26 = vpop.f32.mrf.mxu0 }
 0x4b8   :  { %v3633_v20 = vpop.xlane.xlu0 %3632  ;;  %v7683_v21 = vadd.f32 %v3471_v26, %v3378_v36 }
 0x4b9   :  { %v3711_v27 = vmul.f32 0.020408163, %v3633_v20 }
 0x4bc   :  { %4580 = vperm.xlu2 %6462, %v4308_v17  }
 0x4be   :  { %v7660_v63 = vpop.xlane.xlu2 %3630 }
 0x4c4   :  { %4381 = vperm.xlu2 %6462, %v7667_v4  }
 0x4c5   :  { %3634 = vadd.xlane.f32.xlu1 %v3576_v11 }
 0x4c6   :  { %v3531_v32 = vpop.xlane.xlu2 %3530 }
 0x4c7   :  { %v3677_v50 = vmul.f32 0.020408163, %v3531_v32  ;;  %v4306_v32 = vsub.f32 %v4238_v51, %v4272_v55 }
 0x4c9   :  { %v3745_v54 = vmul.f32 %v3677_v50, %v3677_v50 }
 0x4ca   :  { %v4556_v30 = vpop.permute.xlu1 %4555 }
 0x4cb   :  { %v3779_v39 = vsub.f32 %v3711_v27, %v3745_v54  ;;  %v4711_v18 = vadd.f32 %v4556_v30, %v4507_v8  ;;  %v3188_v8 = vadd.f32 %v3187_v47, %v7113_v35  ;;  %v3193_v27 = vadd.f32 %v3192_v34, %v7124_v56  ;;  %v3286_v54 = vpop.f32.mrf.mxu2  ;;  %v3380_v35 = vpop.f32.mrf.mxu3 }
 0x4cc   :  { %v8227_v30 = vsub.f32 %v7466_v46, %v7464_v60  ;;  %v3474_v46 = vpop.f32.mrf.mxu0 }
 0x4cd   :  { %v3847_v22 = vadd.f32 1e-05, %v3779_v39  ;;  %4745 = vst [vmem:[#allocation7 + $0x18] sm:$0xff] %v4711_v18  ;;  %v3581_v18 = vmul.f32 %v7683_v21, %v7683_v21  ;;  %v3282_v56 = vadd.f32 %v3281_v25, %v3188_v8  ;;  %v3287_v58 = vadd.f32 %v3286_v54, %v3193_v27 }
 0x4ce   :  { %v3838_v39 = vadd.f32 1e-05, %v8227_v30  ;;  %v3804_v30 = vld [vmem:[%s8157_s2 + $0x70] sm:$0xff] }
 0x4cf   :  { %6493 = vrsqrt.f32 %v3847_v22  ;;  %vm4094_vm12 = vweird.f32 %v3847_v22  ;;  %v3376_v62 = vadd.f32 %v3375_v37, %v3282_v56  ;;  %v4277_v56 = vmul.f32 %v7652_v33, %v7391_v6  ;;  %v3802_v33 = vld [vmem:[%s8157_s2 + $0x60] sm:$0xff] }
 0x4d0   :  { %6495 = vrsqrt.f32 %v3837_v24  ;;  %vm4004_vm2 = vweird.f32 %v3838_v39 }
 0x4d1   :  { %6497 = vrsqrt.f32 %v3838_v39  ;;  %v7700_v3 = vadd.f32 %v3469_v48, %v3376_v62  ;;  %v3803_v48 = vld [vmem:[%s8157_s2 + $0x68] sm:$0xff]  ;;  %v7746_v62 = vpop.xlane.xlu0 %3532 }
 0x4d3   :  { %v3580_v25 = vmul.f32 %v7700_v3, %v7700_v3 }
 0x4d5   :  { %v6494_v52 = vpop.eup %6493 }
 0x4d6   :  { %v4089_v7 = vmul.f32 %v6494_v52, %v3847_v22  ;;  %v6496_v49 = vpop.eup %6495  ;;  %vm4095_vm11 = vweird.f32 %v6494_v52  ;;  %v3381_v22 = vadd.f32 %v3380_v35, %v3287_v58 }
 0x4d7   :  { %v3989_v11 = vmul.f32 %v6496_v49, %v3837_v24  ;;  %vm4096_vm13 = vmor %vm4094_vm12, %vm4095_vm11  ;;  %v6498_v26 = vpop.eup %6497  ;;  %vm3995_vm14 = vweird.f32 %v6496_v49  ;;  %v7721_v24 = vmul.f32 0.020408163, %v7660_v63 }
 0x4d8   :  { %v4090_v17 = vmul.f32 %v6494_v52, %v4089_v7  ;;  %v7702_v7 = vadd.f32 %v3474_v46, %v3381_v22  ;;  %v3999_v37 = vmul.f32 %v6498_v26, %v3838_v39  ;;  %vm3996_vm0 = vmor %vm3994_vm15, %vm3995_vm14  ;;  %vm4005_vm1 = vweird.f32 %v6498_v26  ;;  %v4243_v39 = vld [vmem:[%s8158_s3 + $0x58] sm:$0xff] }
 0x4d9   :  { %v3990_v38 = vmul.f32 %v6496_v49, %v3989_v11  ;;  %vm4006_vm3 = vmor %vm4004_vm2, %vm4005_vm1  ;;  %v4311_v22 = vsub.f32 %v4243_v39, %v4277_v56 }
 0x4da   :  { %v4091_v14 = vmul.f32 0.5, %v4090_v17  ;;  %v4000_v51 = vmul.f32 %v6498_v26, %v3999_v37  ;;  %v7754_v37 = vpop.permute.xlu0 %4575 }
 0x4db   :  { %v3991_v60 = vmul.f32 0.5, %v3990_v38 }
 0x4dc   :  { %v4092_v20 = vsub.f32 1.5, %v4091_v14  ;;  %v4001_v14 = vmul.f32 0.5, %v4000_v51  ;;  %v3382_v51 = vpop.f32.mrf.mxu3 }
 0x4dd   :  { %v3992_v36 = vsub.f32 1.5, %v3991_v60 }
 0x4de   :  { %v4093_v41 = vmul.f32 %v6494_v52, %v4092_v20  ;;  %4570 = vperm.xlu1 %6463, %v4306_v32   ;;  %v4245_v32 = vld [vmem:[%s8158_s3 + $0x68] sm:$0xff] }
 0x4e0   :  { %v4097_v47 = vsel %vm4096_vm13, %v6494_v52, %v4093_v41  ;;  %v3993_v52 = vmul.f32 %v6496_v49, %v3992_v36  ;;  %v8229_v36 = vld [vmem:[#allocation14_spill] sm:$0xff] }
 0x4e1   :  { %v7695_v28 = vmul.f32 %v4097_v47, %v3813_v16  ;;  %3644 = vadd.xlane.f32.xlu0 %v3581_v18 }
 0x4e2   :  { %v3997_v55 = vsel %vm3996_vm0, %v6496_v49, %v3993_v52 }
 0x4e3   :  { %v7698_v40 = vmul.f32 %v7695_v28, %v3677_v50  ;;  %v8228_v50 = vsub.f32 %v7422_v5, %v7420_v23  ;;  %v7713_v34 = vmul.f32 %v3997_v55, %v3803_v48  ;;  %v4002_v5 = vsub.f32 1.5, %v4001_v14  ;;  %v4377_v14 = vpop.permute.xlu0 %4376 }
 0x4e4   :  { %v3385_v56 = vpop.f32.mrf.mxu3 }
 0x4e5   :  { %v3836_v17 = vadd.f32 1e-05, %v8228_v50  ;;  %v4279_v23 = vmul.f32 %v7713_v34, %v7438_v0  ;;  %v4003_v41 = vmul.f32 %v6498_v26, %v4002_v5  ;;  %v4566_v0 = vpop.permute.xlu2 %4565  ;;  %v3194_v50 = vpop.f32.mrf.mxu1  ;;  %v8230_v5 = vld [vmem:[#allocation38_spill] sm:$0xff] }
 0x4e7   :  { %6499 = vrsqrt.f32 %v3836_v17  ;;  %v4313_v54 = vsub.f32 %v4245_v32, %v4279_v23  ;;  %v4007_v18 = vsel %vm4006_vm3, %v6498_v26, %v4003_v41  ;;  %vm3984_vm5 = vweird.f32 %v3836_v17  ;;  %v3476_v23 = vpop.f32.mrf.mxu0  ;;  %v8231_v32 = vld [vmem:[#allocation39_spill] sm:$0xff] }
 0x4e8   :  { %v7735_v38 = vmul.f32 %v4007_v18, %v3804_v30 }
 0x4e9   :  { %3544 = vadd.xlane.f32.xlu0 %v7702_v7 }
 0x4ed   :  { %3642 = vadd.xlane.f32.xlu2 %v3580_v25  ;;  %v6500_v8 = vpop.eup %6499  ;;  %v7738_v47 = vpop.permute.xlu2 %4366 }
 0x4ee   :  { %v3979_v16 = vmul.f32 %v6500_v8, %v3836_v17  ;;  %vm3985_vm4 = vweird.f32 %v6500_v8  ;;  %v3288_v17 = vpop.f32.mrf.mxu2 }
 0x4ef   :  { %vm3986_vm6 = vmor %vm3984_vm5, %vm3985_vm4 }
 0x4f0   :  { %v3980_v63 = vmul.f32 %v6500_v8, %v3979_v16 }
 0x4f2   :  { %v3981_v35 = vmul.f32 0.5, %v3980_v63 }
 0x4f4   :  { %v3982_v58 = vsub.f32 1.5, %v3981_v35 }
 0x4f5   :  { %3542 = vadd.xlane.f32.xlu2 %v7683_v21  ;;  %v3529_v11 = vpop.xlane.xlu1 %3528 }
 0x4f6   :  { %v7716_v20 = vmul.f32 0.020408163, %v3529_v11  ;;  %v3983_v60 = vmul.f32 %v6500_v8, %v3982_v58  ;;  %v3197_v11 = vpop.f32.mrf.mxu1  ;;  %v3291_v18 = vpop.f32.mrf.mxu2 }
 0x4f8   :  { %v7725_v49 = vmul.f32 %v7716_v20, %v7716_v20  ;;  %v3987_v52 = vsel %vm3986_vm6, %v6500_v8, %v3983_v60  ;;  %v8233_v8 = vld [vmem:[#allocation17_spill] sm:$0xff] }
 0x4f9   :  { %v7756_v48 = vmul.f32 %v3987_v52, %v3802_v33  ;;  %v4512_v41 = vmul.f32 %v4377_v14, %v8233_v8  ;;  %v3843_v14 = vadd.f32 1e-05, %v3775_v12 }
 0x4fa   :  { %v3778_v27 = vsub.f32 %v7721_v24, %v7725_v49  ;;  %v8240_v24 = vld [vmem:[#allocation37_spill] sm:$0xff] }
 0x4fb   :  { %vm4054_vm11 = vweird.f32 %v3843_v14 }
 0x4fd   :  { %4605 = vperm.xlu0 %6464, %v4313_v54   ;;  %v8232_v54 = vsub.f32 %v8230_v5, %v8231_v32 }
 0x4fe   :  { %v3293_v52 = vpop.f32.mrf.mxu2 }
 0x4ff   :  { %v3840_v16 = vadd.f32 1e-05, %v8232_v54  ;;  %v3387_v54 = vpop.f32.mrf.mxu3 }
 0x501   :  { %6501 = vrsqrt.f32 %v3840_v16  ;;  %vm4024_vm8 = vweird.f32 %v3840_v16 }
 0x502   :  { %6503 = vrsqrt.f32 %v3843_v14 }
 0x505   :  { %4406 = vperm.xlu0 %6464, %v7735_v38  }
 0x507   :  { %v6502_v60 = vpop.eup %6501 }
 0x508   :  { %3534 = vadd.xlane.f32.xlu1 %v7627_v57  ;;  %v6504_v10 = vpop.eup %6503  ;;  %vm4025_vm7 = vweird.f32 %v6502_v60 }
 0x509   :  { %vm4026_vm9 = vmor %vm4024_vm8, %vm4025_vm7  ;;  %vm4055_vm10 = vweird.f32 %v6504_v10 }
 0x50a   :  { %vm4056_vm12 = vmor %vm4054_vm11, %vm4055_vm10 }
 0x50d   :  { %4595 = vperm.xlu2 %6462, %v4311_v22   ;;  %v4362_v46 = vpop.permute.xlu1 %4361  ;;  %v3479_v22 = vpop.f32.mrf.mxu0 }
 0x50e   :  { %v4509_v26 = vmul.f32 %v4362_v46, %v8229_v36  ;;  %v3199_v46 = vpop.f32.mrf.mxu1 }
 0x50f   :  { %v7749_v25 = vpop.xlane.xlu2 %3636 }
 0x510   :  { %v4713_v6 = vadd.f32 %v4566_v0, %v4509_v26  ;;  %v8234_v0 = vld [vmem:[#allocation12_spill] sm:$0xff]  ;;  %v4019_v26 = vmul.f32 %v6502_v60, %v3840_v16 }
 0x511   :  { %v3198_v63 = vadd.f32 %v3197_v11, %v8234_v0  ;;  %v8236_v11 = vld [vmem:[#allocation11_spill] sm:$0xff] }
 0x512   :  { %4747 = vst [vmem:[#allocation7 + $0x28] sm:$0xff] %v4713_v6  ;;  %v8235_v6 = vld [vmem:[#allocation13_spill] sm:$0xff]  ;;  %v3195_v5 = vadd.f32 %v3194_v50, %v8236_v11  ;;  %v4020_v32 = vmul.f32 %v6502_v60, %v4019_v26  ;;  %v4049_v50 = vmul.f32 %v6504_v10, %v3843_v14  ;;  %v3579_v11 = vmul.f32 %v7629_v45, %v7629_v45 }
 0x513   :  { %v3292_v58 = vadd.f32 %v3291_v18, %v3198_v63  ;;  %v3200_v33 = vadd.f32 %v3199_v46, %v8235_v6  ;;  %v8238_v46 = vld [vmem:[#allocation35_spill] sm:$0xff] }
 0x514   :  { %v3289_v0 = vadd.f32 %v3288_v17, %v3195_v5  ;;  %v4021_v63 = vmul.f32 0.5, %v4020_v32  ;;  %v3846_v17 = vadd.f32 1e-05, %v3778_v27 }
 0x515   :  { %4396 = vperm.xlu2 %6462, %v7756_v48   ;;  %v3386_v39 = vadd.f32 %v3385_v56, %v3292_v58  ;;  %v3294_v8 = vadd.f32 %v3293_v52, %v3200_v33 }
 0x516   :  { %v3383_v18 = vadd.f32 %v3382_v51, %v3289_v0  ;;  %v4022_v56 = vsub.f32 1.5, %v4021_v63  ;;  %v3806_v51 = vld [vmem:[%s8157_s2 + $0x80] sm:$0xff]  ;;  %6505 = vrsqrt.f32 %v3846_v17  ;;  %v3809_v0 = vld [vmem:[%s8157_s2 + $0x98] sm:$0xff]  ;;  %vm4084_vm14 = vweird.f32 %v3846_v17 }
 0x517   :  { %v7759_v55 = vpop.xlane.xlu2 %3536  ;;  %v7767_v36 = vadd.f32 %v3479_v22, %v3386_v39  ;;  %v4050_v22 = vmul.f32 %v6504_v10, %v4049_v50  ;;  %v8243_v50 = vld [vmem:[#allocation41_spill] sm:$0xff] }
 0x518   :  { %v7779_v44 = vadd.f32 %v3476_v23, %v3383_v18  ;;  %v4023_v12 = vmul.f32 %v6502_v60, %v4022_v56  ;;  %v8237_v23 = vld [vmem:[#allocation36_spill] sm:$0xff]  ;;  %v8241_v18 = vld [vmem:[#allocation15_spill] sm:$0xff] }
 0x519   :  { %v8239_v26 = vsub.f32 %v8237_v23, %v8238_v46  ;;  %v4051_v33 = vmul.f32 0.5, %v4050_v22  ;;  %v4510_v56 = vmul.f32 %v7738_v47, %v8241_v18  ;;  %v3812_v18 = vld [vmem:[%s8157_s2 + $0xb0] sm:$0xff] }
 0x51a   :  { %v3583_v58 = vmul.f32 %v7779_v44, %v7779_v44  ;;  %v4027_v39 = vsel %vm4026_vm9, %v6502_v60, %v4023_v12  ;;  %v4248_v60 = vld [vmem:[%s8158_s3 + $0x80] sm:$0xff] }
 0x51b   :  { %v7792_v6 = vadd.f32 1e-05, %v8239_v26  ;;  %v7794_v16 = vmul.f32 %v4027_v39, %v3806_v51  ;;  %v4052_v27 = vsub.f32 1.5, %v4051_v33  ;;  %v8242_v12 = vld [vmem:[#allocation42_spill] sm:$0xff]  ;;  %v3639_v39 = vpop.xlane.xlu0 %3638  ;;  %v7829_v33 = vmul.f32 0.020408163, %v7606_v42 }
 0x51c   :  { %v6506_v52 = vpop.eup %6505 }
 0x51d   :  { %6507 = vrsqrt.f32 %v7792_v6  ;;  %v4282_v49 = vmul.f32 %v7794_v16, %v8240_v24  ;;  %vm4085_vm13 = vweird.f32 %v6506_v52  ;;  %vm4014_vm1 = vweird.f32 %v7792_v6 }
 0x51e   :  { %vm4086_vm15 = vmor %vm4084_vm14, %vm4085_vm13 }
 0x51f   :  { %v4581_v30 = vpop.permute.xlu2 %4580  ;;  %v4316_v5 = vsub.f32 %v4248_v60, %v4282_v49  ;;  %v4251_v49 = vld [vmem:[%s8158_s3 + $0x98] sm:$0xff] }
 0x520   :  { %v4716_v35 = vadd.f32 %v4581_v30, %v4512_v41  ;;  %v3388_v41 = vadd.f32 %v3387_v54, %v3294_v8  ;;  %v3481_v30 = vpop.f32.mrf.mxu0  ;;  %v4053_v54 = vmul.f32 %v6504_v10, %v4052_v27  ;;  %v4079_v8 = vmul.f32 %v6506_v52, %v3846_v17  ;;  %v4241_v17 = vld [vmem:[%s8158_s3 + $0x48] sm:$0xff] }
 0x521   :  { %4371 = vperm.xlu1 %6463, %v7566_v2   ;;  %v3584_v2 = vmul.f32 %v7767_v36, %v7767_v36  ;;  %v3709_v27 = vmul.f32 0.020408163, %v7665_v19 }
 0x522   :  { %4750 = vst [vmem:[#allocation7 + $0x40] sm:$0xff] %v4716_v35  ;;  %v7776_v35 = vadd.f32 %v3481_v30, %v3388_v41  ;;  %v4057_v63 = vsel %vm4056_vm12, %v6504_v10, %v4053_v54  ;;  %v4080_v30 = vmul.f32 %v6506_v52, %v4079_v8  ;;  %v3743_v8 = vmul.f32 %v7829_v33, %v7829_v33 }
 0x523   :  { %v7807_v32 = vpop.eup %6507  ;;  %v7822_v23 = vmul.f32 %v4057_v63, %v3809_v0  ;;  %v7846_v0 = vpop.xlane.xlu0 %3538 }
 0x524   :  { %v4009_v41 = vmul.f32 %v7807_v32, %v7792_v6  ;;  %v4081_v26 = vmul.f32 0.5, %v4080_v30  ;;  %v3777_v19 = vsub.f32 %v3709_v27, %v3743_v8  ;;  %vm4015_vm0 = vweird.f32 %v7807_v32 }
 0x525   :  { %v4285_v47 = vmul.f32 %v7822_v23, %v7586_v53  ;;  %v4246_v53 = vld [vmem:[%s8158_s3 + $0x70] sm:$0xff]  ;;  %vm4016_vm2 = vmor %vm4014_vm1, %vm4015_vm0  ;;  %v7884_v27 = vmul.f32 0.020408163, %v7746_v62 }
 0x526   :  { %v4010_v22 = vmul.f32 %v7807_v32, %v4009_v41  ;;  %v4082_v24 = vsub.f32 1.5, %v4081_v26 }
 0x527   :  { %v7835_v60 = vpop.permute.xlu2 %4381  ;;  %v4319_v54 = vsub.f32 %v4251_v49, %v4285_v47 }
 0x528   :  { %v4011_v10 = vmul.f32 0.5, %v4010_v22  ;;  %v4083_v41 = vmul.f32 %v6506_v52, %v4082_v24 }
 0x52b   :  { %v7872_v6 = vpop.permute.xlu0 %4590 }
 0x52f   :  { %3650 = vadd.xlane.f32.xlu0 %v3584_v2 }
 0x537   :  { %3550 = vadd.xlane.f32.xlu0 %v7776_v35 }
 0x538   :  { %v7803_v2 = vpop.xlane.xlu1 %3634 }
 0x53e   :  { %3648 = vadd.xlane.f32.xlu2 %v3583_v58  ;;  %v8244_v58 = vsub.f32 %v8242_v12, %v8243_v50  ;;  %v8246_v12 = vld [vmem:[#allocation28_spill] sm:$0xff] }
 0x53f   :  { %v4275_v50 = vmul.f32 %v7667_v4, %v8246_v12 }
 0x540   :  { %v7819_v51 = vadd.f32 1e-05, %v8244_v58  ;;  %v7861_v58 = vadd.f32 1e-05, %v3777_v19 }
 0x541   :  { %v4309_v26 = vsub.f32 %v4241_v17, %v4275_v50 }
 0x542   :  { %6509 = vrsqrt.f32 %v7819_v51  ;;  %vm4044_vm4 = vweird.f32 %v7819_v51  ;;  %vm4074_vm7 = vweird.f32 %v7861_v58 }
 0x543   :  { %6511 = vrsqrt.f32 %v7861_v58 }
 0x546   :  { %3548 = vadd.xlane.f32.xlu2 %v7767_v36 }
 0x548   :  { %v7842_v42 = vpop.eup %6509 }
 0x549   :  { %v6512_v62 = vpop.eup %6511  ;;  %vm4045_vm3 = vweird.f32 %v7842_v42 }
 0x54a   :  { %vm4046_vm5 = vmor %vm4044_vm4, %vm4045_vm3  ;;  %vm4075_vm6 = vweird.f32 %v6512_v62 }
 0x54b   :  { %3640 = vadd.xlane.f32.xlu1 %v3579_v11  ;;  %4620 = vperm.xlu0 %6464, %v4316_v5   ;;  %v8245_v11 = vld [vmem:[#allocation33_spill] sm:$0xff]  ;;  %v4012_v5 = vsub.f32 1.5, %v4011_v10  ;;  %v7875_v10 = vmul.f32 0.020408163, %v7759_v55  ;;  %v4254_v55 = vld [vmem:[%s8158_s3 + $0xb0] sm:$0xff]  ;;  %vm4076_vm8 = vmor %vm4074_vm7, %vm4075_vm6 }
 0x54d   :  { %v4013_v30 = vmul.f32 %v7807_v32, %v4012_v5  ;;  %v3714_v5 = vmul.f32 0.020408163, %v3639_v39 }
 0x54f   :  { %v4017_v4 = vsel %vm4016_vm2, %v7807_v32, %v4013_v30  ;;  %v3712_v32 = vmul.f32 0.020408163, %v7803_v2  ;;  %v4069_v2 = vmul.f32 %v6512_v62, %v7861_v58  ;;  %v8247_v30 = vld [vmem:[#allocation20_spill] sm:$0xff] }
 0x550   :  { %v4571_v14 = vpop.permute.xlu1 %4570 }
 0x551   :  { %v4714_v46 = vadd.f32 %v4571_v14, %v4510_v56  ;;  %v4087_v56 = vsel %vm4086_vm15, %v6506_v52, %v4083_v41  ;;  %v3805_v52 = vld [vmem:[%s8157_s2 + $0x78] sm:$0xff]  ;;  %v4392_v41 = vpop.permute.xlu0 %4391  ;;  %v4070_v50 = vmul.f32 %v6512_v62, %v4069_v2 }
 0x552   :  { %v7879_v47 = vmul.f32 %v4017_v4, %v3805_v52 }
 0x553   :  { %4748 = vst [vmem:[#allocation7 + $0x30] sm:$0xff] %v4714_v46  ;;  %4421 = vperm.xlu0 %6464, %v7533_v1   ;;  %v4280_v1 = vmul.f32 %v7735_v38, %v8245_v11  ;;  %v4039_v38 = vmul.f32 %v7842_v42, %v7819_v51  ;;  %v7866_v46 = vmul.f32 %v4087_v56, %v3812_v18  ;;  %v4071_v52 = vmul.f32 0.5, %v4070_v50 }
 0x554   :  { %v4515_v18 = vmul.f32 %v4392_v41, %v8247_v30  ;;  %v3811_v41 = vld [vmem:[%s8157_s2 + $0xa8] sm:$0xff] }
 0x555   :  { %v4314_v63 = vsub.f32 %v4246_v53, %v4280_v1  ;;  %v4040_v22 = vmul.f32 %v7842_v42, %v4039_v38  ;;  %v4288_v49 = vmul.f32 %v7866_v46, %v7716_v20  ;;  %v4249_v20 = vld [vmem:[%s8158_s3 + $0x88] sm:$0xff]  ;;  %v3746_v53 = vmul.f32 %v7884_v27, %v7884_v27 }
 0x557   :  { %v4041_v24 = vmul.f32 0.5, %v4040_v22  ;;  %v3780_v19 = vsub.f32 %v3712_v32, %v3746_v53 }
 0x559   :  { %v4042_v1 = vsub.f32 1.5, %v4041_v24  ;;  %v3848_v56 = vadd.f32 1e-05, %v3780_v19  ;;  %v4252_v24 = vld [vmem:[%s8158_s3 + $0xa0] sm:$0xff] }
 0x55b   :  { %4635 = vperm.xlu0 %6464, %v4319_v54   ;;  %v4322_v54 = vsub.f32 %v4254_v55, %v4288_v49  ;;  %v4043_v38 = vmul.f32 %v7842_v42, %v4042_v1  ;;  %vm4104_vm13 = vweird.f32 %v3848_v56 }
 0x55d   :  { %v4047_v22 = vsel %vm4046_vm5, %v7842_v42, %v4043_v38  ;;  %v4320_v42 = vsub.f32 %v4252_v24, %v7619_v43 }
 0x55e   :  { %4610 = vperm.xlu2 %6462, %v4314_v63   ;;  %v4317_v63 = vsub.f32 %v4249_v20, %v7537_v29  ;;  %v3808_v29 = vld [vmem:[%s8157_s2 + $0x90] sm:$0xff] }
 0x55f   :  { %v7911_v51 = vmul.f32 %v4047_v22, %v3808_v29 }
 0x560   :  { %v7863_v14 = vpop.xlane.xlu2 %3642 }
 0x563   :  { %4436 = vperm.xlu0 %6464, %v7612_v15   ;;  %v3748_v15 = vmul.f32 %v7875_v10, %v7875_v10 }
 0x564   :  { %4585 = vperm.xlu1 %6463, %v4309_v26   ;;  %v4072_v26 = vsub.f32 1.5, %v4071_v52 }
 0x565   :  { %v3782_v8 = vsub.f32 %v3714_v5, %v3748_v15  ;;  %v3713_v5 = vmul.f32 0.020408163, %v7749_v25  ;;  %v3645_v25 = vpop.xlane.xlu0 %3644 }
 0x566   :  { %4411 = vperm.xlu2 %6462, %v7879_v47  }
 0x567   :  { %v3850_v39 = vadd.f32 1e-05, %v3782_v8 }
 0x568   :  { %v7893_v11 = vpop.xlane.xlu2 %3542 }
 0x569   :  { %6513 = vrsqrt.f32 %v3850_v39  ;;  %vm4124_vm11 = vweird.f32 %v3850_v39 }
 0x56a   :  { %6515 = vrsqrt.f32 %v3848_v56 }
 0x56b   :  { %4650 = vperm.xlu0 %6464, %v4322_v54  }
 0x56e   :  { %4625 = vperm.xlu2 %6462, %v4317_v63  }
 0x56f   :  { %v6514_v4 = vpop.eup %6513 }
 0x570   :  { %v4596_v12 = vpop.permute.xlu2 %4595  ;;  %v6516_v49 = vpop.eup %6515  ;;  %v4119_v32 = vmul.f32 %v6514_v4, %v3850_v39  ;;  %vm4125_vm9 = vweird.f32 %v6514_v4  ;;  %v3814_v39 = vld [vmem:[%s8157_s2 + $0xc0] sm:$0xff] }
 0x571   :  { %v4719_v17 = vadd.f32 %v4596_v12, %v4515_v18  ;;  %v4099_v1 = vmul.f32 %v6516_v49, %v3848_v56  ;;  %v4255_v18 = vld [vmem:[%s8158_s3 + $0xb8] sm:$0xff]  ;;  %vm4105_vm10 = vweird.f32 %v6516_v49  ;;  %vm4126_vm12 = vmor %vm4124_vm11, %vm4125_vm9  ;;  %v3815_v56 = vld [vmem:[%s8157_s2 + $0xc8] sm:$0xff] }
 0x572   :  { %v4120_v53 = vmul.f32 %v6514_v4, %v4119_v32  ;;  %vm4106_vm14 = vmor %vm4104_vm13, %vm4105_vm10 }
 0x573   :  { %4753 = vst [vmem:[#allocation7 + $0x58] sm:$0xff] %v4719_v17  ;;  %4451 = vperm.xlu0 %6464, %v7695_v28   ;;  %v4073_v28 = vmul.f32 %v6512_v62, %v4072_v26  ;;  %v4100_v8 = vmul.f32 %v6516_v49, %v4099_v1  ;;  %v3816_v26 = vld [vmem:[%s8157_s2 + $0xd0] sm:$0xff] }
 0x574   :  { %v4121_v2 = vmul.f32 0.5, %v4120_v53 }
 0x575   :  { %v4077_v19 = vsel %vm4076_vm8, %v6512_v62, %v4073_v28  ;;  %v4101_v38 = vmul.f32 0.5, %v4100_v8  ;;  %v4323_v62 = vsub.f32 %v4255_v18, %v7698_v40 }
 0x576   :  { %4426 = vperm.xlu2 %6462, %v7911_v51   ;;  %v7923_v63 = vmul.f32 %v4077_v19, %v3811_v41  ;;  %v4122_v30 = vsub.f32 1.5, %v4121_v2  ;;  %v4258_v2 = vld [vmem:[%s8158_s3 + $0xd0] sm:$0xff] }
 0x577   :  { %v4102_v58 = vsub.f32 1.5, %v4101_v38 }
 0x578   :  { %v4123_v17 = vmul.f32 %v6514_v4, %v4122_v30 }
 0x579   :  { %v4103_v22 = vmul.f32 %v6516_v49, %v4102_v58  ;;  %v7960_v58 = vmul.f32 0.020408163, %v7893_v11  ;;  %v7974_v11 = vmul.f32 0.020408163, %v7846_v0  ;;  %v8249_v0 = vld [vmem:[#allocation23_spill] sm:$0xff] }
 0x57a   :  { %v4127_v24 = vsel %vm4126_vm12, %v6514_v4, %v4123_v17 }
 0x57b   :  { %v3535_v55 = vpop.xlane.xlu1 %3534  ;;  %v4224_v28 = vmul.f32 %v4127_v24, %v3816_v26 }
 0x57c   :  { %v3679_v15 = vmul.f32 0.020408163, %v3535_v55  ;;  %v7934_v55 = vpop.xlane.xlu0 %3544 }
 0x57d   :  { %v4292_v41 = vmul.f32 %v4224_v28, %v7875_v10  ;;  %v7963_v10 = vpop.permute.xlu2 %4396 }
 0x57e   :  { %v3747_v54 = vmul.f32 %v3679_v15, %v3679_v15  ;;  %4640 = vperm.xlu2 %6462, %v4320_v42   ;;  %v4107_v42 = vsel %vm4106_vm14, %v6516_v49, %v4103_v22  ;;  %v4257_v49 = vld [vmem:[%s8158_s3 + $0xc8] sm:$0xff] }
 0x580   :  { %v3781_v20 = vsub.f32 %v3713_v5, %v3747_v54  ;;  %v8248_v5 = vld [vmem:[#allocation16_spill] sm:$0xff]  ;;  %v7943_v54 = vmul.f32 %v4107_v42, %v3814_v39  ;;  %v3749_v42 = vmul.f32 %v7974_v11, %v7974_v11 }
 0x582   :  { %v3849_v43 = vadd.f32 1e-05, %v3781_v20 }
 0x584   :  { %6517 = vrsqrt.f32 %v3849_v43  ;;  %vm4114_vm0 = vweird.f32 %v3849_v43 }
 0x586   :  { %4441 = vperm.xlu2 %6462, %v7923_v63  }
 0x58a   :  { %v6518_v12 = vpop.eup %6517 }
 0x58b   :  { %v4109_v50 = vmul.f32 %v6518_v12, %v3849_v43  ;;  %vm4115_vm15 = vweird.f32 %v6518_v12  ;;  %v7954_v43 = vpop.permute.xlu0 %4605 }
 0x58c   :  { %vm4116_vm1 = vmor %vm4114_vm0, %vm4115_vm15 }
 0x58d   :  { %v4110_v29 = vmul.f32 %v6518_v12, %v4109_v50 }
 0x58e   :  { %3540 = vadd.xlane.f32.xlu1 %v7700_v3  ;;  %4655 = vperm.xlu2 %6462, %v4323_v62  }
 0x58f   :  { %v4111_v52 = vmul.f32 0.5, %v4110_v29 }
 0x591   :  { %v4112_v40 = vsub.f32 1.5, %v4111_v52 }
 0x593   :  { %v4113_v32 = vmul.f32 %v6518_v12, %v4112_v40  ;;  %v4372_v1 = vpop.permute.xlu1 %4371  ;;  %v4407_v30 = vpop.permute.xlu0 %4406 }
 0x594   :  { %v4511_v4 = vmul.f32 %v4372_v1, %v8248_v5  ;;  %v4518_v1 = vmul.f32 %v4407_v30, %v8249_v0  ;;  %v3582_v30 = vmul.f32 %v7702_v7, %v7702_v7  ;;  %v3819_v0 = vld [vmem:[%s8157_s2 + $0xe8] sm:$0xff] }
 0x595   :  { %v4117_v20 = vsel %vm4116_vm1, %v6518_v12, %v4113_v32  ;;  %v3717_v12 = vmul.f32 0.020408163, %v3645_v25 }
 0x596   :  { %v7945_v53 = vmul.f32 %v4117_v20, %v3815_v56  ;;  %v4715_v8 = vadd.f32 %v7754_v37, %v4511_v4  ;;  %4456 = vperm.xlu2 %6462, %v7943_v54   ;;  %v4326_v37 = vsub.f32 %v4258_v2, %v4292_v41 }
 0x598   :  { %v4291_v19 = vmul.f32 %v7945_v53, %v3679_v15  ;;  %4749 = vst [vmem:[#allocation7 + $0x38] sm:$0xff] %v4715_v8  ;;  %v3751_v15 = vmul.f32 %v7960_v58, %v7960_v58 }
 0x59a   :  { %v4325_v38 = vsub.f32 %v4257_v49, %v4291_v19  ;;  %v3785_v50 = vsub.f32 %v3717_v12, %v3751_v15 }
 0x59c   :  { %4665 = vperm.xlu0 %6464, %v4325_v38   ;;  %v3853_v17 = vadd.f32 1e-05, %v3785_v50 }
 0x59e   :  { %4670 = vperm.xlu2 %6462, %v4326_v37   ;;  %6519 = vrsqrt.f32 %v3853_v17  ;;  %vm4154_vm3 = vweird.f32 %v3853_v17 }
 0x5a2   :  { %v3651_v18 = vpop.xlane.xlu0 %3650 }
 0x5a4   :  { %4466 = vperm.xlu0 %6464, %v4224_v28   ;;  %v6520_v25 = vpop.eup %6519 }
 0x5a5   :  { %v4149_v32 = vmul.f32 %v6520_v25, %v3853_v17  ;;  %vm4155_vm2 = vweird.f32 %v6520_v25 }
 0x5a6   :  { %vm4156_vm5 = vmor %vm4154_vm3, %vm4155_vm2 }
 0x5a7   :  { %4386 = vperm.xlu1 %6463, %v7642_v9   ;;  %v7976_v9 = vmul.f32 0.020408163, %v3651_v18  ;;  %v4150_v8 = vmul.f32 %v6520_v25, %v4149_v32 }
 0x5a9   :  { %v4151_v41 = vmul.f32 0.5, %v4150_v8 }
 0x5aa   :  { %v7969_v29 = vpop.xlane.xlu0 %3550 }
 0x5ab   :  { %v4152_v38 = vsub.f32 1.5, %v4151_v41 }
 0x5ad   :  { %v4153_v12 = vmul.f32 %v6520_v25, %v4152_v38 }
 0x5b1   :  { %v7967_v62 = vpop.xlane.xlu2 %3648 }
 0x5b9   :  { %v3549_v22 = vpop.xlane.xlu2 %3548 }
 0x5ba   :  { %v7971_v52 = vmul.f32 0.020408163, %v3549_v22  ;;  %v8250_v22 = vld [vmem:[#allocation26_spill] sm:$0xff] }
 0x5bc   :  { %v7980_v26 = vmul.f32 %v7971_v52, %v7971_v52 }
 0x5bd   :  { %v7982_v24 = vpop.permute.xlu0 %4620 }
 0x5be   :  { %v3788_v40 = vsub.f32 %v7976_v9, %v7980_v26  ;;  %v3641_v39 = vpop.xlane.xlu1 %3640  ;;  %v3818_v26 = vld [vmem:[%s8157_s2 + $0xe0] sm:$0xff] }
 0x5bf   :  { %v3715_v56 = vmul.f32 0.020408163, %v3641_v39 }
 0x5c1   :  { %v3783_v28 = vsub.f32 %v3715_v56, %v3749_v42  ;;  %v4611_v5 = vpop.permute.xlu2 %4610 }
 0x5c2   :  { %v4722_v4 = vadd.f32 %v4611_v5, %v4518_v1  ;;  %v4157_v1 = vsel %vm4156_vm5, %v6520_v25, %v4153_v12 }
 0x5c3   :  { %v3851_v20 = vadd.f32 1e-05, %v3783_v28  ;;  %v3817_v28 = vld [vmem:[%s8157_s2 + $0xd8] sm:$0xff]  ;;  %v8004_v41 = vmul.f32 %v4157_v1, %v3819_v0 }
 0x5c4   :  { %4756 = vst [vmem:[#allocation7 + $0x70] sm:$0xff] %v4722_v4  ;;  %v8251_v4 = vld [vmem:[#allocation18_spill] sm:$0xff] }
 0x5c5   :  { %6521 = vrsqrt.f32 %v3851_v20  ;;  %v4422_v49 = vpop.permute.xlu0 %4421  ;;  %vm4134_vm6 = vweird.f32 %v3851_v20  ;;  %v4513_v8 = vmul.f32 %v7835_v60, %v8251_v4  ;;  %v4261_v60 = vld [vmem:[%s8158_s3 + $0xe8] sm:$0xff] }
 0x5c6   :  { %v4521_v39 = vmul.f32 %v4422_v49, %v8250_v22 }
 0x5c9   :  { %v7989_v19 = vpop.permute.xlu2 %4411 }
 0x5cb   :  { %v6522_v2 = vpop.eup %6521 }
 0x5cc   :  { %v4129_v37 = vmul.f32 %v6522_v2, %v3851_v20  ;;  %vm4135_vm4 = vweird.f32 %v6522_v2  ;;  %v4295_v20 = vmul.f32 %v8004_v41, %v7960_v58  ;;  %v4244_v58 = vld [vmem:[%s8158_s3 + $0x60] sm:$0xff] }
 0x5cd   :  { %v7991_v18 = vpop.permute.xlu0 %4635  ;;  %vm4136_vm7 = vmor %vm4134_vm6, %vm4135_vm4 }
 0x5ce   :  { %v4130_v15 = vmul.f32 %v6522_v2, %v4129_v37 }
 0x5d0   :  { %v4131_v50 = vmul.f32 0.5, %v4130_v15 }
 0x5d1   :  { %3646 = vadd.xlane.f32.xlu1 %v3582_v30  ;;  %v4626_v42 = vpop.permute.xlu2 %4625  ;;  %v4329_v30 = vsub.f32 %v4261_v60, %v4295_v20  ;;  %v3856_v20 = vadd.f32 1e-05, %v3788_v40 }
 0x5d2   :  { %v4132_v56 = vsub.f32 1.5, %v4131_v50  ;;  %v4725_v32 = vadd.f32 %v4626_v42, %v4521_v39  ;;  %v8253_v42 = vld [vmem:[#allocation31_spill] sm:$0xff] }
 0x5d3   :  { %vm4184_vm12 = vweird.f32 %v3856_v20 }
 0x5d4   :  { %4759 = vst [vmem:[#allocation7 + $0x88] sm:$0xff] %v4725_v32  ;;  %v4133_v5 = vmul.f32 %v6522_v2, %v4132_v56  ;;  %v4278_v56 = vmul.f32 %v7756_v48, %v8253_v42 }
 0x5d5   :  { %v4437_v15 = vpop.permute.xlu0 %4436 }
 0x5d6   :  { %v4586_v17 = vpop.permute.xlu1 %4585  ;;  %v4137_v49 = vsel %vm4136_vm7, %v6522_v2, %v4133_v5  ;;  %v8252_v2 = vld [vmem:[#allocation30_spill] sm:$0xff]  ;;  %v4312_v32 = vsub.f32 %v4244_v58, %v4278_v56 }
 0x5d7   :  { %v4717_v38 = vadd.f32 %v4586_v17, %v4513_v8  ;;  %v8006_v37 = vmul.f32 %v4137_v49, %v3817_v28  ;;  %v4524_v12 = vmul.f32 %v4437_v15, %v8252_v2  ;;  %v3716_v49 = vmul.f32 0.020408163, %v7863_v14 }
 0x5d9   :  { %4751 = vst [vmem:[#allocation7 + $0x48] sm:$0xff] %v4717_v38  ;;  %v8008_v25 = vpop.permute.xlu2 %4426  ;;  %4471 = vperm.xlu2 %6462, %v8006_v37  }
 0x5dd   :  { %v8017_v39 = vpop.permute.xlu0 %4650 }
 0x5e1   :  { %v4641_v50 = vpop.permute.xlu2 %4640  ;;  %4685 = vperm.xlu2 %6462, %v4329_v30  }
 0x5e2   :  { %v4728_v22 = vadd.f32 %v4641_v50, %v4524_v12 }
 0x5e4   :  { %4762 = vst [vmem:[#allocation7 + $0xa0] sm:$0xff] %v4728_v22 }
 0x5e5   :  { %v4452_v1 = vpop.permute.xlu0 %4451 }
 0x5e6   :  { %v4527_v28 = vmul.f32 %v4452_v1, %v7530_v31 }
 0x5e9   :  { %v8024_v0 = vpop.permute.xlu2 %4441 }
 0x5ea   :  { %4600 = vperm.xlu1 %6463, %v4312_v32  }
 0x5f1   :  { %v4656_v5 = vpop.permute.xlu2 %4655 }
 0x5f2   :  { %v4731_v4 = vadd.f32 %v4656_v5, %v4527_v28  ;;  %v8254_v28 = vld [vmem:[#allocation19_spill] sm:$0xff] }
 0x5f4   :  { %4765 = vst [vmem:[#allocation7 + $0xb8] sm:$0xff] %v4731_v4 }
 0x5f9   :  { %v8031_v60 = vpop.permute.xlu2 %4456 }
 0x601   :  { %v3541_v8 = vpop.xlane.xlu1 %3540  ;;  %v4671_v58 = vpop.permute.xlu2 %4670 }
 0x602   :  { %v3682_v17 = vmul.f32 0.020408163, %v3541_v8 }
 0x604   :  { %v3750_v38 = vmul.f32 %v3682_v17, %v3682_v17 }
 0x606   :  { %v3784_v48 = vsub.f32 %v3716_v49, %v3750_v38  ;;  %v4260_v38 = vld [vmem:[%s8158_s3 + $0xe0] sm:$0xff] }
 0x608   :  { %v3852_v15 = vadd.f32 1e-05, %v3784_v48 }
 0x60a   :  { %6523 = vrsqrt.f32 %v3852_v15  ;;  %vm4144_vm9 = vweird.f32 %v3852_v15 }
 0x60b   :  { %6525 = vrsqrt.f32 %v3856_v20 }
 0x60e   :  { %v8033_v30 = vpop.permute.xlu0 %4665 }
 0x610   :  { %v6524_v31 = vpop.eup %6523 }
 0x611   :  { %v4139_v2 = vmul.f32 %v6524_v31, %v3852_v15  ;;  %v6526_v14 = vpop.eup %6525  ;;  %vm4145_vm8 = vweird.f32 %v6524_v31 }
 0x612   :  { %v4179_v9 = vmul.f32 %v6526_v14, %v3856_v20  ;;  %vm4146_vm10 = vmor %vm4144_vm9, %vm4145_vm8  ;;  %vm4185_vm11 = vweird.f32 %v6526_v14 }
 0x613   :  { %v4140_v12 = vmul.f32 %v6524_v31, %v4139_v2  ;;  %vm4186_vm13 = vmor %vm4184_vm12, %vm4185_vm11 }
 0x614   :  { %3546 = vadd.xlane.f32.xlu1 %v7779_v44 }
 0x615   :  { %v4141_v50 = vmul.f32 0.5, %v4140_v12 }
 0x616   :  { %v4467_v22 = vpop.permute.xlu0 %4466 }
 0x617   :  { %v4142_v42 = vsub.f32 1.5, %v4141_v50  ;;  %v4530_v56 = vmul.f32 %v4467_v22, %v7616_v13  ;;  %v4180_v13 = vmul.f32 %v6526_v14, %v4179_v9 }
 0x619   :  { %v4143_v40 = vmul.f32 %v6524_v31, %v4142_v42  ;;  %v4734_v32 = vadd.f32 %v4671_v58, %v4530_v56  ;;  %v4387_v1 = vpop.permute.xlu1 %4386  ;;  %v4181_v2 = vmul.f32 0.5, %v4180_v13 }
 0x61a   :  { %v4514_v5 = vmul.f32 %v4387_v1, %v8254_v28  ;;  %v8255_v28 = vld [vmem:[#allocation21_spill] sm:$0xff] }
 0x61b   :  { %v4147_v4 = vsel %vm4146_vm10, %v6524_v31, %v4143_v40  ;;  %4768 = vst [vmem:[#allocation7 + $0xd0] sm:$0xff] %v4734_v32  ;;  %v4182_v12 = vsub.f32 1.5, %v4181_v2  ;;  %v4247_v2 = vld [vmem:[%s8158_s3 + $0x78] sm:$0xff] }
 0x61c   :  { %v8041_v8 = vmul.f32 %v4147_v4, %v3818_v26  ;;  %v4718_v49 = vadd.f32 %v7872_v6, %v4514_v5  ;;  %v3822_v6 = vld [vmem:[%s8157_s2 + $0x100] sm:$0xff]  ;;  %v4516_v5 = vmul.f32 %v7963_v10, %v8255_v28 }
 0x61d   :  { %v4183_v50 = vmul.f32 %v6526_v14, %v4182_v12 }
 0x61e   :  { %v4294_v48 = vmul.f32 %v8041_v8, %v3682_v17  ;;  %4752 = vst [vmem:[#allocation7 + $0x50] sm:$0xff] %v4718_v49  ;;  %v8057_v17 = vmul.f32 0.020408163, %v7934_v55  ;;  %v3820_v55 = vld [vmem:[%s8157_s2 + $0xf0] sm:$0xff] }
 0x61f   :  { %v4187_v31 = vsel %vm4186_vm13, %v6526_v14, %v4183_v50  ;;  %v8257_v50 = vld [vmem:[#allocation40_spill] sm:$0xff] }
 0x620   :  { %v4328_v15 = vsub.f32 %v4260_v38, %v4294_v48  ;;  %v8053_v22 = vmul.f32 %v4187_v31, %v3822_v6  ;;  %v8256_v48 = vld [vmem:[#allocation34_spill] sm:$0xff]  ;;  %v4284_v10 = vmul.f32 %v7911_v51, %v8257_v50  ;;  %v4250_v6 = vld [vmem:[%s8158_s3 + $0x90] sm:$0xff] }
 0x622   :  { %4680 = vperm.xlu0 %6464, %v4328_v15   ;;  %v4281_v15 = vmul.f32 %v7879_v47, %v8256_v48  ;;  %v4318_v31 = vsub.f32 %v4250_v6, %v4284_v10  ;;  %v3719_v47 = vmul.f32 0.020408163, %v7967_v62  ;;  %v4293_v10 = vmul.f32 %v8006_v37, %v7974_v11  ;;  %v4259_v6 = vld [vmem:[%s8158_s3 + $0xd8] sm:$0xff] }
 0x624   :  { %v4315_v12 = vsub.f32 %v4247_v2, %v4281_v15 }
 0x62a   :  { %4481 = vperm.xlu0 %6464, %v8004_v41   ;;  %v3752_v41 = vmul.f32 %v8057_v17, %v8057_v17 }
 0x62d   :  { %4401 = vperm.xlu1 %6463, %v7713_v34   ;;  %v3585_v34 = vmul.f32 %v7776_v35, %v7776_v35 }
 0x632   :  { %4496 = vperm.xlu0 %6464, %v8053_v22  }
 0x644   :  { %v3647_v42 = vpop.xlane.xlu1 %3646 }
 0x645   :  { %v3718_v20 = vmul.f32 0.020408163, %v3647_v42 }
 0x647   :  { %v3786_v56 = vsub.f32 %v3718_v20, %v3752_v41 }
 0x649   :  { %v3854_v58 = vadd.f32 1e-05, %v3786_v56  ;;  %v4287_v56 = vmul.f32 %v7923_v63, %v7829_v33  ;;  %v4290_v33 = vmul.f32 %v7943_v54, %v7884_v27  ;;  %v8258_v54 = vld [vmem:[#allocation22_spill] sm:$0xff] }
 0x64b   :  { %6527 = vrsqrt.f32 %v3854_v58  ;;  %vm4164_vm15 = vweird.f32 %v3854_v58 }
 0x651   :  { %v6528_v9 = vpop.eup %6527 }
 0x652   :  { %v4159_v26 = vmul.f32 %v6528_v9, %v3854_v58  ;;  %vm4165_vm14 = vweird.f32 %v6528_v9 }
 0x653   :  { %vm4166_vm0 = vmor %vm4164_vm15, %vm4165_vm14 }
 0x654   :  { %v4160_v14 = vmul.f32 %v6528_v9, %v4159_v26  ;;  %v8086_v26 = vpop.permute.xlu2 %4471 }
 0x656   :  { %v4161_v40 = vmul.f32 0.5, %v4160_v14 }
 0x657   :  { %3652 = vadd.xlane.f32.xlu1 %v3585_v34 }
 0x658   :  { %v4162_v32 = vsub.f32 1.5, %v4161_v40  ;;  %v4256_v40 = vld [vmem:[%s8158_s3 + $0xc0] sm:$0xff] }
 0x65a   :  { %v4163_v1 = vmul.f32 %v6528_v9, %v4162_v32 }
 0x65c   :  { %v4601_v4 = vpop.permute.xlu1 %4600  ;;  %v4167_v49 = vsel %vm4166_vm0, %v6528_v9, %v4163_v1  ;;  %v4686_v28 = vpop.permute.xlu2 %4685 }
 0x65d   :  { %v4720_v13 = vadd.f32 %v4601_v4, %v4516_v5  ;;  %v4228_v38 = vmul.f32 %v4167_v49, %v3820_v55  ;;  %v4324_v5 = vsub.f32 %v4256_v40, %v4290_v33  ;;  %v4265_v40 = vld [vmem:[%s8158_s3 + $0x108] sm:$0xff] }
 0x65f   :  { %4754 = vst [vmem:[#allocation7 + $0x60] sm:$0xff] %v4720_v13  ;;  %4486 = vperm.xlu2 %6462, %v4228_v38  }
 0x670   :  { %4615 = vperm.xlu1 %6463, %v4315_v12  }
 0x678   :  { %4416 = vperm.xlu1 %6463, %v7794_v16   ;;  %v4253_v16 = vld [vmem:[%s8158_s3 + $0xa8] sm:$0xff] }
 0x679   :  { %v4321_v9 = vsub.f32 %v4253_v16, %v4287_v56 }
 0x680   :  { %4630 = vperm.xlu1 %6463, %v4318_v31   ;;  %v4327_v31 = vsub.f32 %v4259_v6, %v4293_v10 }
 0x687   :  { %v3547_v42 = vpop.xlane.xlu1 %3546 }
 0x688   :  { %v3685_v41 = vmul.f32 0.020408163, %v3547_v42  ;;  %4431 = vperm.xlu1 %6463, %v7822_v23   ;;  %v4262_v42 = vld [vmem:[%s8158_s3 + $0xf0] sm:$0xff] }
 0x68a   :  { %v3753_v20 = vmul.f32 %v3685_v41, %v3685_v41 }
 0x68c   :  { %v3787_v51 = vsub.f32 %v3719_v47, %v3753_v20 }
 0x68e   :  { %v3855_v58 = vadd.f32 1e-05, %v3787_v51 }
 0x690   :  { %6529 = vrsqrt.f32 %v3855_v58  ;;  %4645 = vperm.xlu1 %6463, %v4321_v9   ;;  %vm4174_vm2 = vweird.f32 %v3855_v58 }
 0x694   :  { %v8088_v14 = vpop.permute.xlu0 %4680 }
 0x696   :  { %v6530_v23 = vpop.eup %6529 }
 0x697   :  { %v4169_v34 = vmul.f32 %v6530_v23, %v3855_v58  ;;  %vm4175_vm1 = vweird.f32 %v6530_v23 }
 0x698   :  { %4446 = vperm.xlu1 %6463, %v7866_v46   ;;  %v3821_v46 = vld [vmem:[%s8157_s2 + $0xf8] sm:$0xff]  ;;  %vm4176_vm3 = vmor %vm4174_vm2, %vm4175_vm1 }
 0x699   :  { %v4170_v62 = vmul.f32 %v6530_v23, %v4169_v34 }
 0x69b   :  { %v4171_v63 = vmul.f32 0.5, %v4170_v62 }
 0x69c   :  { %v4482_v32 = vpop.permute.xlu0 %4481 }
 0x69d   :  { %v4172_v55 = vsub.f32 1.5, %v4171_v63  ;;  %v4533_v1 = vmul.f32 %v4482_v32, %v7683_v21  ;;  %v4263_v21 = vld [vmem:[%s8158_s3 + $0xf8] sm:$0xff] }
 0x69f   :  { %v4173_v4 = vmul.f32 %v6530_v23, %v4172_v55  ;;  %v4737_v49 = vadd.f32 %v4686_v28, %v4533_v1  ;;  %v4402_v27 = vpop.permute.xlu1 %4401  ;;  %v4298_v55 = vmul.f32 %v8053_v22, %v7971_v52  ;;  %v8262_v22 = vld [vmem:[#allocation29_spill] sm:$0xff] }
 0x6a0   :  { %v4517_v13 = vmul.f32 %v4402_v27, %v8258_v54  ;;  %4660 = vperm.xlu1 %6463, %v4324_v5   ;;  %v8260_v5 = vld [vmem:[#allocation25_spill] sm:$0xff]  ;;  %v8261_v27 = vld [vmem:[#allocation27_spill] sm:$0xff] }
 0x6a1   :  { %v4177_v48 = vsel %vm4176_vm3, %v6530_v23, %v4173_v4  ;;  %4771 = vst [vmem:[#allocation7 + $0xe8] sm:$0xff] %v4737_v49  ;;  %v4522_v54 = vmul.f32 %v8008_v25, %v8261_v27 }
 0x6a2   :  { %v4229_v15 = vmul.f32 %v4177_v48, %v3821_v46  ;;  %v4721_v2 = vadd.f32 %v7954_v43, %v4517_v13  ;;  %v4296_v43 = vmul.f32 %v4228_v38, %v8057_v17  ;;  %v3823_v38 = vld [vmem:[%s8157_s2 + $0x108] sm:$0xff] }
 0x6a4   :  { %v4297_v12 = vmul.f32 %v4229_v15, %v3685_v41  ;;  %4755 = vst [vmem:[#allocation7 + $0x68] sm:$0xff] %v4721_v2  ;;  %v4330_v41 = vsub.f32 %v4262_v42, %v4296_v43 }
 0x6a6   :  { %v4331_v50 = vsub.f32 %v4263_v21, %v4297_v12  ;;  %v8263_v21 = vld [vmem:[#allocation32_spill] sm:$0xff] }
 0x6a7   :  { %v4525_v12 = vmul.f32 %v8024_v0, %v8263_v21 }
 0x6a8   :  { %4461 = vperm.xlu1 %6463, %v7945_v53   ;;  %4695 = vperm.xlu0 %6464, %v4331_v50   ;;  %v3687_v53 = vmul.f32 0.020408163, %v7969_v29  ;;  %v8259_v29 = vld [vmem:[#allocation24_spill] sm:$0xff] }
 0x6a9   :  { %v4519_v23 = vmul.f32 %v7989_v19, %v8259_v29  ;;  %v4264_v19 = vld [vmem:[%s8158_s3 + $0x100] sm:$0xff]  ;;  %s6618_s3 = smov [#allocation7]  }
 0x6aa   :  { %v3755_v37 = vmul.f32 %v3687_v53, %v3687_v53  ;;  %v4332_v4 = vsub.f32 %v4264_v19, %v4298_v55  ;;  %s4780_s24 = sshll.u32 %s6618_s3, 4  ;;  %s4781_s24 = int_to_ptr.vmem [resolvable:$true] %s4780_s24 }
 0x6b0   :  { %4675 = vperm.xlu1 %6463, %v4327_v31   ;;  %v4528_v31 = vmul.f32 %v8031_v60, %v7550_v61 }
 0x6b8   :  { %4476 = vperm.xlu1 %6463, %v8041_v8  }
 0x6b9   :  { %v4487_v60 = vpop.permute.xlu2 %4486 }
 0x6c0   :  { %4690 = vperm.xlu1 %6463, %v4330_v41  }
 0x6c8   :  { %4491 = vperm.xlu1 %6463, %v4229_v15  }
 0x6ca   :  { %v3653_v11 = vpop.xlane.xlu1 %3652 }
 0x6cb   :  { %v3721_v47 = vmul.f32 0.020408163, %v3653_v11 }
 0x6cd   :  { %v3789_v20 = vsub.f32 %v3721_v47, %v3755_v37  ;;  %v4534_v47 = vmul.f32 %v4487_v60, %v7702_v7 }
 0x6cf   :  { %v3857_v56 = vadd.f32 1e-05, %v3789_v20 }
 0x6d1   :  { %6531 = vrsqrt.f32 %v3857_v56  ;;  %vm4194_vm5 = vweird.f32 %v3857_v56 }
 0x6d7   :  { %v6532_v16 = vpop.eup %6531 }
 0x6d8   :  { %v4189_v51 = vmul.f32 %v6532_v16, %v3857_v56  ;;  %vm4195_vm4 = vweird.f32 %v6532_v16  ;;  %v4497_v56 = vpop.permute.xlu0 %4496 }
 0x6d9   :  { %vm4196_vm6 = vmor %vm4194_vm5, %vm4195_vm4 }
 0x6da   :  { %v4190_v8 = vmul.f32 %v6532_v16, %v4189_v51 }
 0x6dc   :  { %v4191_v58 = vmul.f32 0.5, %v4190_v8  ;;  %v4536_v8 = vmul.f32 %v4497_v56, %v7767_v36 }
 0x6de   :  { %v4192_v17 = vsub.f32 1.5, %v4191_v58 }
 0x6e0   :  { %v4193_v9 = vmul.f32 %v6532_v16, %v4192_v17 }
 0x6e2   :  { %v4616_v34 = vpop.permute.xlu1 %4615  ;;  %v4197_v62 = vsel %vm4196_vm6, %v6532_v16, %v4193_v9 }
 0x6e3   :  { %v4723_v33 = vadd.f32 %v4616_v34, %v4519_v23  ;;  %v4231_v63 = vmul.f32 %v4197_v62, %v3823_v38 }
 0x6e5   :  { %4757 = vst [vmem:[#allocation7 + $0x78] sm:$0xff] %v4723_v33  ;;  %4501 = vperm.xlu2 %6462, %v4231_v63   ;;  %v4299_v32 = vmul.f32 %v4231_v63, %v3687_v53  ;;  %v4531_v53 = vmul.f32 %v8086_v26, %v7629_v45 }
 0x6e7   :  { %v4333_v1 = vsub.f32 %v4265_v40, %v4299_v32 }
 0x6e9   :  { %4705 = vperm.xlu1 %6463, %v4333_v1  }
 0x6ea   :  { %v4417_v28 = vpop.permute.xlu1 %4416 }
 0x6eb   :  { %v4520_v46 = vmul.f32 %v4417_v28, %v8260_v5 }
 0x6ed   :  { %v4724_v49 = vadd.f32 %v7982_v24, %v4520_v46  ;;  %4700 = vperm.xlu2 %6462, %v4332_v4  }
 0x6ef   :  { %4758 = vst [vmem:[#allocation7 + $0x80] sm:$0xff] %v4724_v49 }
 0x6f2   :  { %v4631_v13 = vpop.permute.xlu1 %4630 }
 0x6f3   :  { %v4726_v48 = vadd.f32 %v4631_v13, %v4522_v54 }
 0x6f5   :  { %4760 = vst [vmem:[#allocation7 + $0x90] sm:$0xff] %v4726_v48 }
 0x6fa   :  { %v4432_v52 = vpop.permute.xlu1 %4431 }
 0x6fb   :  { %v4523_v15 = vmul.f32 %v4432_v52, %v8262_v22 }
 0x6fd   :  { %v4727_v2 = vadd.f32 %v7991_v18, %v4523_v15 }
 0x6ff   :  { %4761 = vst [vmem:[#allocation7 + $0x98] sm:$0xff] %v4727_v2 }
 0x702   :  { %v4646_v50 = vpop.permute.xlu1 %4645 }
 0x703   :  { %v4729_v10 = vadd.f32 %v4646_v50, %v4525_v12 }
 0x705   :  { %4763 = vst [vmem:[#allocation7 + $0xa8] sm:$0xff] %v4729_v10 }
 0x70a   :  { %v4447_v24 = vpop.permute.xlu1 %4446 }
 0x70b   :  { %v4526_v6 = vmul.f32 %v4447_v24, %v7545_v59 }
 0x70d   :  { %v4730_v25 = vadd.f32 %v8017_v39, %v4526_v6 }
 0x70f   :  { %4764 = vst [vmem:[#allocation7 + $0xb0] sm:$0xff] %v4730_v25 }
 0x712   :  { %v4661_v43 = vpop.permute.xlu1 %4660 }
 0x713   :  { %v4732_v42 = vadd.f32 %v4661_v43, %v4528_v31 }
 0x715   :  { %4766 = vst [vmem:[#allocation7 + $0xc0] sm:$0xff] %v4732_v42 }
 0x71a   :  { %v4462_v18 = vpop.permute.xlu1 %4461  ;;  %v4696_v45 = vpop.permute.xlu0 %4695 }
 0x71b   :  { %v4529_v41 = vmul.f32 %v4462_v18, %v7627_v57 }
 0x71d   :  { %v4733_v0 = vadd.f32 %v8033_v30, %v4529_v41 }
 0x71f   :  { %4767 = vst [vmem:[#allocation7 + $0xc8] sm:$0xff] %v4733_v0 }
 0x722   :  { %v4676_v11 = vpop.permute.xlu1 %4675 }
 0x723   :  { %v4735_v59 = vadd.f32 %v4676_v11, %v4531_v53 }
 0x725   :  { %4769 = vst [vmem:[#allocation7 + $0xd8] sm:$0xff] %v4735_v59 }
 0x72a   :  { %v4477_v39 = vpop.permute.xlu1 %4476 }
 0x72b   :  { %v4532_v37 = vmul.f32 %v4477_v39, %v7700_v3 }
 0x72d   :  { %v4736_v61 = vadd.f32 %v8088_v14, %v4532_v37 }
 0x72f   :  { %4770 = vst [vmem:[#allocation7 + $0xe0] sm:$0xff] %v4736_v61 }
 0x732   :  { %v4691_v20 = vpop.permute.xlu1 %4690 }
 0x733   :  { %v4738_v57 = vadd.f32 %v4691_v20, %v4534_v47 }
 0x735   :  { %4772 = vst [vmem:[#allocation7 + $0xf0] sm:$0xff] %v4738_v57 }
 0x73a   :  { %v4492_v30 = vpop.permute.xlu1 %4491 }
 0x73b   :  { %v4535_v16 = vmul.f32 %v4492_v30, %v7779_v44 }
 0x73d   :  { %v4739_v26 = vadd.f32 %v4696_v45, %v4535_v16 }
 0x73f   :  { %4773 = vst [vmem:[#allocation7 + $0xf8] sm:$0xff] %v4739_v26  ;;  %v4502_v51 = vpop.permute.xlu2 %4501 }
 0x740   :  { %v4537_v7 = vmul.f32 %v4502_v51, %v7776_v35 }
 0x747   :  { %v4701_v3 = vpop.permute.xlu2 %4700 }
 0x748   :  { %v4740_v58 = vadd.f32 %v4701_v3, %v4536_v8 }
 0x74a   :  { %4774 = vst [vmem:[#allocation7 + $0x100] sm:$0xff] %v4740_v58 }
 0x75b   :  { %v4706_v14 = vpop.permute.xlu1 %4705 }
 0x75c   :  { %v4741_v44 = vadd.f32 %v4706_v14, %v4537_v7 }
 0x75e   :  { %4775 = vst [vmem:[#allocation7 + $0x108] sm:$0xff] %v4741_v44 }
 0x75f   :  { %4788 = dma.vmem_to_hbm [thread:$0]  %s4781_s24, 4352, %s4783_s27, [#allocation4], %s6619_s28, %s6619_s28, %s6620_s0  }
 0x760   :  { %6609 = dma.done.wait [#allocation4], 4352  }
 0x761   :  { %6610 = vsyncadd [#allocation4], 4294962944 }
 0x762   :  { %4793 = vsyncpa [#allocation3], 1 }
 0x763   :  { %4794 = vsyncpa [#allocation6], 1 }
 0x764   :  { %4795 = vsyncpa [#allocation4], 1 }

</bundles_post_ra>
